<compile_context>
chip_gen: v7x
topology: tpu7x:2x2x1
jax: 0.10.0
libtpu: 0.0.40
codegen_flags: <defaults>
</compile_context>

<pallas_src>
import functools

import jax
import jax.numpy as jnp
from jax.experimental import pallas as pl
from jax.experimental.pallas import tpu as pltpu

# ----------------------------- config ----------------------------------------
B = 2                        # batch
SEQ_LEN = 16                 # args.seq_len
PATCH_LEN = 4                # args.patch_len
N_PATCHES = SEQ_LEN // PATCH_LEN          # 4
N_HEADS = 2                  # args.n_heads
D_MODEL = 32                 # args.d_model (== inner_dim)
D_HEAD = D_MODEL // N_HEADS               # 16
D_FF = 64                    # args.d_ff
E_LAYERS = 1                 # args.e_layers
CA_LAYERS = 1                # args.ca_layers
C_OUT = 3                    # args.c_out
N_TRACES = 2                 # args.features == 'ALL'
N_TOK = N_PATCHES + 1        # 5 (CLS appended at the END -> [:, -1])
N_PAD = 8                    # token axis padded to sublane granularity

G = N_TRACES * B             # 4  (trace, batch) groups per token position
NR = N_PAD * G               # 32 fused rows: row = tok*G + trace*B + batch
N_ATTN_GRP = (E_LAYERS + CA_LAYERS) * N_HEADS   # 4 -> attention slab width = 4*32 = 128 lanes

_NEG_INF = -1e30
_VMEM = pl.BlockSpec(memory_space=pltpu.MemorySpace.VMEM)

_ROW_TRACE = [(r % G) // B for r in range(NR)]
_ROW_TOK = [r // G for r in range(NR)]


# ----------------------------- packed weight-slab layout ----------------------
def _block_entries(pfx, cross):
    e = [(pfx + "ln1_g", (NR, D_MODEL)), (pfx + "ln1_b", (NR, D_MODEL))]
    if cross:
        e += [(pfx + "lnc_g", (NR, D_MODEL)), (pfx + "lnc_b", (NR, D_MODEL)),
              (pfx + "wq", (2 * D_MODEL, D_MODEL)), (pfx + "bq", (NR, D_MODEL)),
              (pfx + "wkv", (2 * D_MODEL, 2 * D_MODEL)), (pfx + "bkv", (NR, 2 * D_MODEL))]
    else:
        e += [(pfx + "wqkv", (2 * D_MODEL, 3 * D_MODEL)), (pfx + "bqkv", (NR, 3 * D_MODEL))]
    e += [(pfx + "wo", (2 * D_MODEL, D_MODEL)), (pfx + "bo", (NR, D_MODEL)),
          (pfx + "ln2_g", (NR, D_MODEL)), (pfx + "ln2_b", (NR, D_MODEL)),
          (pfx + "ff_w1", (2 * D_MODEL, D_FF)), (pfx + "ff_b1", (NR, D_FF)),
          (pfx + "ff_w2", (2 * D_FF, D_MODEL)), (pfx + "ff_b2", (NR, D_MODEL))]
    return e


def _layout_entries():
    e = [("m_eeg", (NR, 1)),
         ("mg_eeg", (G, 1)),
         ("bias_self", (NR, NR)),
         ("bias_cross", (NR, NR)),
         ("patch_w", (2 * PATCH_LEN, D_MODEL)),
         ("add_rows", (NR, D_MODEL))]
    for li in range(E_LAYERS):
        e += _block_entries(f"enc{li}_", cross=False)
    e += [("norm_g", (NR, D_MODEL)), ("norm_b", (NR, D_MODEL))]
    for li in range(CA_LAYERS):
        e += _block_entries(f"cm{li}_", cross=True)
    e += [("head_ln_g", (1, 2 * D_MODEL)), ("head_ln_b", (1, 2 * D_MODEL)),
          ("head_w", (2 * D_MODEL, C_OUT)), ("head_b", (1, C_OUT))]
    return e


def _build_layout():
    layout, off = {}, 0
    for name, (r, c) in _layout_entries():
        layout[name] = (off, r, c)
        off += -(-r // 8) * 8          # 8-row (sublane) aligned offsets
    return layout, off


_LAYOUT, _SLAB_ROWS = _build_layout()


# ----------------------------- the fused kernel --------------------------------
def _fwd_kernel(slab_ref, x_ref, *out_refs, output_attentions):
    out_ref, emb_ref = out_refs[0], out_refs[1]
    attn_ref = out_refs[2] if output_attentions else None

    def W(name):
        off, r, c = _LAYOUT[name]
        return slab_ref[off:off + r, 0:c]

    # precomputed row-trace masks and additive attention masks (from the slab)
    m_eeg = W("m_eeg")                         # (NR, 1)   1.0 on EEG rows
    m_emg = 1.0 - m_eeg
    mg_eeg = W("mg_eeg")                       # (G, 1)
    mg_emg = 1.0 - mg_eeg
    bias_self = W("bias_self")                 # (NR, NR)  0 / -1e30
    bias_cross = W("bias_cross")

    def widen(x, swap=False):
        # block-diagonal-over-traces trick: per-trace linear == one matmul on the widened input.
        a = x * (m_emg if swap else m_eeg)
        b = x * (m_eeg if swap else m_emg)
        return jnp.concatenate([a, b], axis=1)

    def lin(x, wname, bname, swap=False):
        return (jnp.dot(widen(x, swap), W(wname), preferred_element_type=jnp.float32)
                + W(bname))

    def ln(x, gname, bname):
        mu = jnp.mean(x, axis=-1, keepdims=True)
        var = jnp.mean(jnp.square(x - mu), axis=-1, keepdims=True)
        return (x - mu) * jax.lax.rsqrt(var + 1e-5) * W(gname) + W(bname)

    def dot_nt(a, b):                          # (m,k) x (n,k) -> (m,n)
        return jax.lax.dot_general(a, b, (((1,), (1,)), ((), ())),
                                   preferred_element_type=jnp.float32)

    # ---- patch embedding + CLS + positional (padding-token rows stay zero) ----
    parts = []
    for p in range(N_PATCHES):
        xp = x_ref[:, p * PATCH_LEN:(p + 1) * PATCH_LEN]               # (G, PATCH_LEN)
        xpw = jnp.concatenate([xp * mg_eeg, xp * mg_emg], axis=1)       # (G, 2*PATCH_LEN)
        parts.append(jnp.dot(xpw, W("patch_w"), preferred_element_type=jnp.float32))
    parts.append(jnp.zeros((NR - N_PATCHES * G, D_MODEL), jnp.float32))
    # add_rows = positional emb (+ patch bias on patch rows, + CLS emb on CLS rows), per trace
    x2 = jnp.concatenate(parts, axis=0) + W("add_rows")

    # ---- fused transformer block (both traces / both cross directions at once) ----
    def attention(x2, pfx, bias, cross, attn_base):
        hq = ln(x2, pfx + "ln1_g", pfx + "ln1_b")
        if cross:
            # key/value rows are normalized & projected with the OPPOSITE block's params
            hk = ln(x2, pfx + "lnc_g", pfx + "lnc_b")
            q = lin(hq, pfx + "wq", pfx + "bq")
            kv = lin(hk, pfx + "wkv", pfx + "bkv", swap=True)
            k, v = kv[:, :D_MODEL], kv[:, D_MODEL:]
        else:
            qkv = lin(hq, pfx + "wqkv", pfx + "bqkv")                   # fused QKV matmul
            q = qkv[:, :D_MODEL]
            k = qkv[:, D_MODEL:2 * D_MODEL]
            v = qkv[:, 2 * D_MODEL:]
        q = q * (D_HEAD ** -0.5)
        o_heads = []
        for h in range(N_HEADS):
            sl = slice(h * D_HEAD, (h + 1) * D_HEAD)
            s = dot_nt(q[:, sl], k[:, sl]) + bias                       # (NR, NR)
            s = s - jnp.max(s, axis=-1, keepdims=True)
            e = jnp.exp(s)
            prob = e / jnp.sum(e, axis=-1, keepdims=True)               # exact divide (maps are outputs)
            if output_attentions:
                g0 = (attn_base + h) * NR
                attn_ref[:, g0:g0 + NR] = prob
            o_heads.append(jnp.dot(prob, v[:, sl], preferred_element_type=jnp.float32))
        o = jnp.concatenate(o_heads, axis=1)
        return lin(o, pfx + "wo", pfx + "bo")

    def block(x2, pfx, bias, cross, attn_base):
        x2 = x2 + attention(x2, pfx, bias, cross, attn_base)
        h = ln(x2, pfx + "ln2_g", pfx + "ln2_b")
        h = lin(h, pfx + "ff_w1", pfx + "ff_b1")
        h = jax.nn.gelu(h, approximate=True)   # TODO(synk): PyTorch nn.GELU default is erf-based
        h = lin(h, pfx + "ff_w2", pfx + "ff_b2")
        return x2 + h

    for li in range(E_LAYERS):
        x2 = block(x2, f"enc{li}_", bias_self, cross=False, attn_base=li * N_HEADS)
    x2 = ln(x2, "norm_g", "norm_b")            # encoder final norm (both traces at once)
    for li in range(CA_LAYERS):
        x2 = block(x2, f"cm{li}_", bias_cross, cross=True,
                   attn_base=(E_LAYERS + li) * N_HEADS)

    # ---- CLS extraction (static contiguous rows) + fused LayerNorm/Linear head ----
    cls = x2[N_PATCHES * G:(N_PATCHES + 1) * G, :]                      # (G, D): eeg b0, eeg b1, emg b0, emg b1
    emb = jnp.concatenate([cls[0:B, :], cls[B:2 * B, :]], axis=1)       # (B, 2D)
    emb_ref[...] = emb

    mu = jnp.mean(emb, axis=-1, keepdims=True)
    var = jnp.mean(jnp.square(emb - mu), axis=-1, keepdims=True)
    y = (emb - mu) * jax.lax.rsqrt(var + 1e-5) * W("head_ln_g") + W("head_ln_b")
    out_ref[...] = (jnp.dot(y, W("head_w"), preferred_element_type=jnp.float32)
                    + W("head_b"))


# ----------------------------- model forward ----------------------------------
@functools.partial(jax.jit, static_argnames=("output_attentions",))
def model_forward(slab, x, label, output_attentions=True):
    # (B, n_traces, seq_len) -> (n_traces*B, seq_len); row = trace*B + batch (lane-dense input)
    x_in = x.transpose(1, 0, 2).reshape(N_TRACES * B, SEQ_LEN)

    out_shapes = [jax.ShapeDtypeStruct((B, C_OUT), jnp.float32),
                  jax.ShapeDtypeStruct((B, 2 * D_MODEL), jnp.float32)]
    if output_attentions:
        out_shapes.append(jax.ShapeDtypeStruct((NR, N_ATTN_GRP * NR), jnp.float32))

    res = pl.pallas_call(
        functools.partial(_fwd_kernel, output_attentions=output_attentions),
        out_shape=tuple(out_shapes),
        in_specs=[_VMEM, _VMEM],
        out_specs=tuple([_VMEM] * len(out_shapes)),
    )(slab, x_in)
    out, emb = res[0], res[1]

    if output_attentions:
        # (query_tok, query_grp, attn_grp, key_tok, key_grp)
        A = res[2].reshape(N_PAD, G, N_ATTN_GRP, N_PAD, G)
        EH = E_LAYERS * N_HEADS

        def unpack(blockA, n_layers, roll_keys):
            if roll_keys:  # cross attention: key group = opposite trace, same batch
                blockA = jnp.roll(blockA, -B, axis=4)
            d = jnp.diagonal(blockA, axis1=1, axis2=4)          # (N_PAD, L*H, N_PAD, G)
            d = d[:N_TOK, :, :N_TOK, :].transpose(3, 1, 0, 2)   # (G, L*H, N_TOK, N_TOK)
            return d.reshape(N_TRACES, B, n_layers, N_HEADS, N_TOK, N_TOK)

        enc_maps = unpack(A[:, :, :EH], E_LAYERS, roll_keys=False)
        cm_maps = unpack(A[:, :, EH:], CA_LAYERS, roll_keys=True)
        eeg_attn, emg_attn = enc_maps[0], enc_maps[1]
        cm_eeg_attn, cm_emg_attn = cm_maps[0], cm_maps[1]
    else:
        eeg_attn = emg_attn = cm_eeg_attn = cm_emg_attn = None

    return {"out": out, "eeg_attn": eeg_attn, "emg_attn": emg_attn,
            "cm_eeg_attn": cm_eeg_attn, "cm_emg_attn": cm_emg_attn,
            "emb": emb, "label": label}


# ----------------------------- parameter init ----------------------------------
def trunc_normal(key, shape, std=0.02):
    return std * jax.random.truncated_normal(key, -2.0, 2.0, shape, jnp.float32)


def init_block(key):
    ks = jax.random.split(key, 4)
    ones = jnp.ones((1, D_MODEL), jnp.float32)
    zeros = jnp.zeros((1, D_MODEL), jnp.float32)
    return {
        "ln1_g": ones, "ln1_b": zeros,
        "lnc_g": ones, "lnc_b": zeros,       # used only by cross blocks
        "ln2_g": ones, "ln2_b": zeros,
        "wqkv": trunc_normal(ks[0], (D_MODEL, 3 * D_MODEL)),
        "bqkv": jnp.zeros((1, 3 * D_MODEL), jnp.float32),
        "wo": trunc_normal(ks[1], (D_MODEL, D_MODEL)),
        "bo": zeros,
        "ff_w1": trunc_normal(ks[2], (D_MODEL, D_FF)),
        "ff_b1": jnp.zeros((1, D_FF), jnp.float32),
        "ff_w2": trunc_normal(ks[3], (D_FF, D_MODEL)),
        "ff_b2": zeros,
    }


def init_encoder(key):
    ks = jax.random.split(key, 3 + E_LAYERS)
    return {
        "patch_w": trunc_normal(ks[0], (PATCH_LEN, D_MODEL)),
        "patch_b": jnp.zeros((1, D_MODEL), jnp.float32),
        "cls": trunc_normal(ks[1], (1, D_MODEL)),
        "pos": trunc_normal(ks[2], (N_TOK, D_MODEL)),
        "layers": [init_block(ks[3 + i]) for i in range(E_LAYERS)],
        "norm_g": jnp.ones((1, D_MODEL), jnp.float32),
        "norm_b": jnp.zeros((1, D_MODEL), jnp.float32),
    }


def init_cross_head(key):
    ks = jax.random.split(key, 2 * CA_LAYERS + 1)
    layers = [{"eeg": init_block(ks[2 * i]), "emg": init_block(ks[2 * i + 1])}
              for i in range(CA_LAYERS)]
    return {"cm": {"layers": layers},
            "head": {"ln_g": jnp.ones((1, 2 * D_MODEL), jnp.float32),
                     "ln_b": jnp.zeros((1, 2 * D_MODEL), jnp.float32),
                     "w": trunc_normal(ks[-1], (2 * D_MODEL, C_OUT)),
                     "b": jnp.zeros((1, C_OUT), jnp.float32)}}


def init_model(key):
    k1, k2, k3 = jax.random.split(key, 3)
    return {"eeg": init_encoder(k1), "emg": init_encoder(k2), "cm_head": init_cross_head(k3)}


# ----------------------------- host-side one-time weight packing ---------------
def _rows_by_trace(a_eeg, a_emg, swap=False):
    # pre-broadcast a (1, C) per-trace parameter to an (NR, C) per-row slab
    picks = []
    for t in _ROW_TRACE:
        use_eeg = (t == 0) != swap
        picks.append(a_eeg if use_eeg else a_emg)
    return jnp.concatenate(picks, axis=0)


def _vstack(a, b):
    return jnp.concatenate([a, b], axis=0)


def _attn_bias(cross):
    rows = []
    for r in range(NR):
        row = []
        for c in range(NR):
            same_b = (r % B) == (c % B)
            same_t = ((r % G) // B) == ((c % G) // B)
            ok = same_b and (same_t != cross) and ((c // G) < N_TOK)
            row.append(0.0 if ok else _NEG_INF)
        rows.append(row)
    return jnp.array(rows, jnp.float32)


def _pack_block(vals, pfx, p_eeg, p_emg, cross):
    vals[pfx + "ln1_g"] = _rows_by_trace(p_eeg["ln1_g"], p_emg["ln1_g"])
    vals[pfx + "ln1_b"] = _rows_by_trace(p_eeg["ln1_b"], p_emg["ln1_b"])
    if cross:
        # key rows are the opposite block's context -> swapped selection for lnc / kv
        vals[pfx + "lnc_g"] = _rows_by_trace(p_eeg["lnc_g"], p_emg["lnc_g"], swap=True)
        vals[pfx + "lnc_b"] = _rows_by_trace(p_eeg["lnc_b"], p_emg["lnc_b"], swap=True)
        vals[pfx + "wq"] = _vstack(p_eeg["wqkv"][:, :D_MODEL], p_emg["wqkv"][:, :D_MODEL])
        vals[pfx + "bq"] = _rows_by_trace(p_eeg["bqkv"][:, :D_MODEL], p_emg["bqkv"][:, :D_MODEL])
        vals[pfx + "wkv"] = _vstack(p_eeg["wqkv"][:, D_MODEL:], p_emg["wqkv"][:, D_MODEL:])
        vals[pfx + "bkv"] = _rows_by_trace(p_eeg["bqkv"][:, D_MODEL:], p_emg["bqkv"][:, D_MODEL:],
                                           swap=True)
    else:
        vals[pfx + "wqkv"] = _vstack(p_eeg["wqkv"], p_emg["wqkv"])
        vals[pfx + "bqkv"] = _rows_by_trace(p_eeg["bqkv"], p_emg["bqkv"])
    vals[pfx + "wo"] = _vstack(p_eeg["wo"], p_emg["wo"])
    vals[pfx + "bo"] = _rows_by_trace(p_eeg["bo"], p_emg["bo"])
    vals[pfx + "ln2_g"] = _rows_by_trace(p_eeg["ln2_g"], p_emg["ln2_g"])
    vals[pfx + "ln2_b"] = _rows_by_trace(p_eeg["ln2_b"], p_emg["ln2_b"])
    vals[pfx + "ff_w1"] = _vstack(p_eeg["ff_w1"], p_emg["ff_w1"])
    vals[pfx + "ff_b1"] = _rows_by_trace(p_eeg["ff_b1"], p_emg["ff_b1"])
    vals[pfx + "ff_w2"] = _vstack(p_eeg["ff_w2"], p_emg["ff_w2"])
    vals[pfx + "ff_b2"] = _rows_by_trace(p_eeg["ff_b2"], p_emg["ff_b2"])


def pack_params(params):
    eeg, emg, cmh = params["eeg"], params["emg"], params["cm_head"]
    vals = {}
    vals["m_eeg"] = jnp.array([[1.0] if t == 0 else [0.0] for t in _ROW_TRACE], jnp.float32)
    vals["mg_eeg"] = jnp.array([[1.0] if (g // B) == 0 else [0.0] for g in range(G)], jnp.float32)
    vals["bias_self"] = _attn_bias(cross=False)
    vals["bias_cross"] = _attn_bias(cross=True)
    vals["patch_w"] = _vstack(eeg["patch_w"], emg["patch_w"])

    add = []
    for r in range(NR):
        enc = eeg if _ROW_TRACE[r] == 0 else emg
        tok = _ROW_TOK[r]
        if tok < N_PATCHES:
            add.append(enc["pos"][tok:tok + 1] + enc["patch_b"])
        elif tok == N_PATCHES:
            add.append(enc["pos"][tok:tok + 1] + enc["cls"])
        else:
            add.append(jnp.zeros((1, D_MODEL), jnp.float32))
    vals["add_rows"] = jnp.concatenate(add, axis=0)

    for li in range(E_LAYERS):
        _pack_block(vals, f"enc{li}_", eeg["layers"][li], emg["layers"][li], cross=False)
    vals["norm_g"] = _rows_by_trace(eeg["norm_g"], emg["norm_g"])
    vals["norm_b"] = _rows_by_trace(eeg["norm_b"], emg["norm_b"])
    for li in range(CA_LAYERS):
        lyr = cmh["cm"]["layers"][li]
        _pack_block(vals, f"cm{li}_", lyr["eeg"], lyr["emg"], cross=True)
    head = cmh["head"]
    vals["head_ln_g"] = head["ln_g"]
    vals["head_ln_b"] = head["ln_b"]
    vals["head_w"] = head["w"]
    vals["head_b"] = head["b"]

    slab = jnp.zeros((_SLAB_ROWS, 128), jnp.float32)
    for name, arr in vals.items():
        off, r, c = _LAYOUT[name]
        assert arr.shape == (r, c), (name, arr.shape, (r, c))
        slab = slab.at[off:off + r, :c].set(arr)
    return slab


# ----------------------------- main ---------------------------------------------
if __name__ == "__main__":
    key = jax.random.PRNGKey(0)
    pkey, xkey, lkey = jax.random.split(key, 3)

    params = init_model(pkey)
    slab = pack_params(params)                 # one-time, lane-dense (rows, 128) weight slab

    x = jax.random.normal(xkey, (B, N_TRACES, SEQ_LEN), jnp.float32)
    label = jax.random.randint(lkey, (B,), 0, C_OUT, dtype=jnp.int32)

    out_dict = jax.block_until_ready(model_forward(slab, x, label, output_attentions=True))

    assert out_dict["out"].shape == (B, C_OUT)
    assert out_dict["emb"].shape == (B, N_TRACES * D_MODEL)
    assert out_dict["eeg_attn"].shape == (B, E_LAYERS, N_HEADS, N_TOK, N_TOK)
    assert out_dict["emg_attn"].shape == (B, E_LAYERS, N_HEADS, N_TOK, N_TOK)
    assert out_dict["cm_eeg_attn"].shape == (B, CA_LAYERS, N_HEADS, N_TOK, N_TOK)
    assert out_dict["cm_emg_attn"].shape == (B, CA_LAYERS, N_HEADS, N_TOK, N_TOK)
    assert bool(jnp.all(jnp.isfinite(out_dict["out"])))
    # attention rows over the valid (un-padded) keys must sum to 1
    for k in ("eeg_attn", "emg_attn", "cm_eeg_attn", "cm_emg_attn"):
        assert bool(jnp.allclose(out_dict[k].sum(-1), 1.0, atol=1e-3)), k
    print("KERNEL_OK")
</pallas_src>

<mosaic_0001>
module attributes {stable_mosaic.version = 11 : i64} {
  func.func @_fwd_kernel(%arg0: memref<1608x128xf32, #tpu.memory_space<vmem>>, %arg1: memref<4x16xf32, #tpu.memory_space<vmem>>, %arg2: memref<2x3xf32, #tpu.memory_space<vmem>>, %arg3: memref<2x64xf32, #tpu.memory_space<vmem>>, %arg4: memref<32x128xf32, #tpu.memory_space<vmem>>) attributes {dimension_semantics = [], scalar_prefetch = 0 : i64, scratch_operands = 0 : i64, tpu.core_type = #tpu.core_type<tc>} {
    %c0 = arith.constant 0 : index
    %c0_0 = arith.constant 0 : index
    %0 = vector.load %arg0[%c0, %c0_0] : memref<1608x128xf32, #tpu.memory_space<vmem>>, vector<32x1xf32>
    %cst = arith.constant 1.000000e+00 : f32
    %1 = vector.broadcast %cst : f32 to vector<32x1xf32>
    %2 = arith.subf %1, %0 : vector<32x1xf32>
    %c32 = arith.constant 32 : index
    %c0_1 = arith.constant 0 : index
    %3 = vector.load %arg0[%c32, %c0_1] : memref<1608x128xf32, #tpu.memory_space<vmem>>, vector<4x1xf32>
    %cst_2 = arith.constant 1.000000e+00 : f32
    %4 = vector.broadcast %cst_2 : f32 to vector<4x1xf32>
    %5 = arith.subf %4, %3 : vector<4x1xf32>
    %c40 = arith.constant 40 : index
    %c0_3 = arith.constant 0 : index
    %6 = vector.load %arg0[%c40, %c0_3] : memref<1608x128xf32, #tpu.memory_space<vmem>>, vector<32x32xf32>
    %c72 = arith.constant 72 : index
    %c0_4 = arith.constant 0 : index
    %7 = vector.load %arg0[%c72, %c0_4] : memref<1608x128xf32, #tpu.memory_space<vmem>>, vector<32x32xf32>
    %c0_5 = arith.constant 0 : index
    %c0_6 = arith.constant 0 : index
    %8 = vector.load %arg1[%c0_5, %c0_6] : memref<4x16xf32, #tpu.memory_space<vmem>>, vector<4x4xf32>
    %9 = vector.broadcast %3 : vector<4x1xf32> to vector<4x4xf32>
    %10 = arith.mulf %8, %9 : vector<4x4xf32>
    %11 = vector.broadcast %5 : vector<4x1xf32> to vector<4x4xf32>
    %12 = arith.mulf %8, %11 : vector<4x4xf32>
    %13 = tpu.concatenate %10, %12 in 1 : vector<4x4xf32>, vector<4x4xf32> -> vector<4x8xf32>
    %c104 = arith.constant 104 : index
    %c0_7 = arith.constant 0 : index
    %14 = vector.load %arg0[%c104, %c0_7] : memref<1608x128xf32, #tpu.memory_space<vmem>>, vector<8x32xf32>
    %cst_8 = arith.constant dense<0.000000e+00> : vector<4x32xf32>
    %15 = tpu.matmul %13, %14, %cst_8 {dimension_numbers = #tpu.dot_dimension_numbers<[1], [0], [0], [1], [0, 0, 1, 1], [], []>} : vector<4x8xf32>, vector<8x32xf32>, vector<4x32xf32> -> vector<4x32xf32>
    %c0_9 = arith.constant 0 : index
    %c4 = arith.constant 4 : index
    %16 = vector.load %arg1[%c0_9, %c4] : memref<4x16xf32, #tpu.memory_space<vmem>>, vector<4x4xf32>
    %17 = vector.broadcast %3 : vector<4x1xf32> to vector<4x4xf32>
    %18 = arith.mulf %16, %17 : vector<4x4xf32>
    %19 = vector.broadcast %5 : vector<4x1xf32> to vector<4x4xf32>
    %20 = arith.mulf %16, %19 : vector<4x4xf32>
    %21 = tpu.concatenate %18, %20 in 1 : vector<4x4xf32>, vector<4x4xf32> -> vector<4x8xf32>
    %c104_10 = arith.constant 104 : index
    %c0_11 = arith.constant 0 : index
    %22 = vector.load %arg0[%c104_10, %c0_11] : memref<1608x128xf32, #tpu.memory_space<vmem>>, vector<8x32xf32>
    %cst_12 = arith.constant dense<0.000000e+00> : vector<4x32xf32>
    %23 = tpu.matmul %21, %22, %cst_12 {dimension_numbers = #tpu.dot_dimension_numbers<[1], [0], [0], [1], [0, 0, 1, 1], [], []>} : vector<4x8xf32>, vector<8x32xf32>, vector<4x32xf32> -> vector<4x32xf32>
    %c0_13 = arith.constant 0 : index
    %c8 = arith.constant 8 : index
    %24 = vector.load %arg1[%c0_13, %c8] : memref<4x16xf32, #tpu.memory_space<vmem>>, vector<4x4xf32>
    %25 = vector.broadcast %3 : vector<4x1xf32> to vector<4x4xf32>
    %26 = arith.mulf %24, %25 : vector<4x4xf32>
    %27 = vector.broadcast %5 : vector<4x1xf32> to vector<4x4xf32>
    %28 = arith.mulf %24, %27 : vector<4x4xf32>
    %29 = tpu.concatenate %26, %28 in 1 : vector<4x4xf32>, vector<4x4xf32> -> vector<4x8xf32>
    %c104_14 = arith.constant 104 : index
    %c0_15 = arith.constant 0 : index
    %30 = vector.load %arg0[%c104_14, %c0_15] : memref<1608x128xf32, #tpu.memory_space<vmem>>, vector<8x32xf32>
    %cst_16 = arith.constant dense<0.000000e+00> : vector<4x32xf32>
    %31 = tpu.matmul %29, %30, %cst_16 {dimension_numbers = #tpu.dot_dimension_numbers<[1], [0], [0], [1], [0, 0, 1, 1], [], []>} : vector<4x8xf32>, vector<8x32xf32>, vector<4x32xf32> -> vector<4x32xf32>
    %c0_17 = arith.constant 0 : index
    %c12 = arith.constant 12 : index
    %32 = vector.load %arg1[%c0_17, %c12] : memref<4x16xf32, #tpu.memory_space<vmem>>, vector<4x4xf32>
    %33 = vector.broadcast %3 : vector<4x1xf32> to vector<4x4xf32>
    %34 = arith.mulf %32, %33 : vector<4x4xf32>
    %35 = vector.broadcast %5 : vector<4x1xf32> to vector<4x4xf32>
    %36 = arith.mulf %32, %35 : vector<4x4xf32>
    %37 = tpu.concatenate %34, %36 in 1 : vector<4x4xf32>, vector<4x4xf32> -> vector<4x8xf32>
    %c104_18 = arith.constant 104 : index
    %c0_19 = arith.constant 0 : index
    %38 = vector.load %arg0[%c104_18, %c0_19] : memref<1608x128xf32, #tpu.memory_space<vmem>>, vector<8x32xf32>
    %cst_20 = arith.constant dense<0.000000e+00> : vector<4x32xf32>
    %39 = tpu.matmul %37, %38, %cst_20 {dimension_numbers = #tpu.dot_dimension_numbers<[1], [0], [0], [1], [0, 0, 1, 1], [], []>} : vector<4x8xf32>, vector<8x32xf32>, vector<4x32xf32> -> vector<4x32xf32>
    %cst_21 = arith.constant 0.000000e+00 : f32
    %40 = vector.broadcast %cst_21 : f32 to vector<16x32xf32>
    %41 = tpu.concatenate %15, %23, %31, %39, %40 in 0 : vector<4x32xf32>, vector<4x32xf32>, vector<4x32xf32>, vector<4x32xf32>, vector<16x32xf32> -> vector<32x32xf32>
    %c112 = arith.constant 112 : index
    %c0_22 = arith.constant 0 : index
    %42 = vector.load %arg0[%c112, %c0_22] : memref<1608x128xf32, #tpu.memory_space<vmem>>, vector<32x32xf32>
    %43 = arith.addf %41, %42 : vector<32x32xf32>
    %cst_23 = arith.constant dense<0.000000e+00> : vector<32xf32>
    %44 = vector.multi_reduction <add>, %43, %cst_23 [1] : vector<32x32xf32> to vector<32xf32>
    %45 = vector.shape_cast %44 : vector<32xf32> to vector<32x1xf32>
    %cst_24 = arith.constant 3.200000e+01 : f32
    %46 = vector.broadcast %cst_24 : f32 to vector<32x1xf32>
    %47 = arith.divf %45, %46 : vector<32x1xf32>
    %48 = vector.broadcast %47 : vector<32x1xf32> to vector<32x32xf32>
    %49 = arith.subf %43, %48 : vector<32x32xf32>
    %50 = arith.mulf %49, %49 : vector<32x32xf32>
    %cst_25 = arith.constant dense<0.000000e+00> : vector<32xf32>
    %51 = vector.multi_reduction <add>, %50, %cst_25 [1] : vector<32x32xf32> to vector<32xf32>
    %52 = vector.shape_cast %51 : vector<32xf32> to vector<32x1xf32>
    %cst_26 = arith.constant 3.200000e+01 : f32
    %53 = vector.broadcast %cst_26 : f32 to vector<32x1xf32>
    %54 = arith.divf %52, %53 : vector<32x1xf32>
    %55 = vector.broadcast %47 : vector<32x1xf32> to vector<32x32xf32>
    %56 = arith.subf %43, %55 : vector<32x32xf32>
    %cst_27 = arith.constant 9.99999974E-6 : f32
    %57 = vector.broadcast %cst_27 : f32 to vector<32x1xf32>
    %58 = arith.addf %54, %57 : vector<32x1xf32>
    %59 = math.rsqrt %58 : vector<32x1xf32>
    %60 = vector.broadcast %59 : vector<32x1xf32> to vector<32x32xf32>
    %61 = arith.mulf %56, %60 : vector<32x32xf32>
    %c144 = arith.constant 144 : index
    %c0_28 = arith.constant 0 : index
    %62 = vector.load %arg0[%c144, %c0_28] : memref<1608x128xf32, #tpu.memory_space<vmem>>, vector<32x32xf32>
    %63 = arith.mulf %61, %62 : vector<32x32xf32>
    %c176 = arith.constant 176 : index
    %c0_29 = arith.constant 0 : index
    %64 = vector.load %arg0[%c176, %c0_29] : memref<1608x128xf32, #tpu.memory_space<vmem>>, vector<32x32xf32>
    %65 = arith.addf %63, %64 : vector<32x32xf32>
    %66 = vector.broadcast %0 : vector<32x1xf32> to vector<32x32xf32>
    %67 = arith.mulf %65, %66 : vector<32x32xf32>
    %68 = vector.broadcast %2 : vector<32x1xf32> to vector<32x32xf32>
    %69 = arith.mulf %65, %68 : vector<32x32xf32>
    %70 = tpu.concatenate %67, %69 in 1 : vector<32x32xf32>, vector<32x32xf32> -> vector<32x64xf32>
    %c208 = arith.constant 208 : index
    %c0_30 = arith.constant 0 : index
    %71 = vector.load %arg0[%c208, %c0_30] : memref<1608x128xf32, #tpu.memory_space<vmem>>, vector<64x96xf32>
    %cst_31 = arith.constant dense<0.000000e+00> : vector<32x96xf32>
    %72 = tpu.matmul %70, %71, %cst_31 {dimension_numbers = #tpu.dot_dimension_numbers<[1], [0], [0], [1], [0, 0, 1, 1], [], []>} : vector<32x64xf32>, vector<64x96xf32>, vector<32x96xf32> -> vector<32x96xf32>
    %c272 = arith.constant 272 : index
    %c0_32 = arith.constant 0 : index
    %73 = vector.load %arg0[%c272, %c0_32] : memref<1608x128xf32, #tpu.memory_space<vmem>>, vector<32x96xf32>
    %74 = arith.addf %72, %73 : vector<32x96xf32>
    %75 = vector.extract_strided_slice %74 {offsets = [0, 0], sizes = [32, 32], strides = [1, 1]} : vector<32x96xf32> to vector<32x32xf32>
    %76 = vector.extract_strided_slice %74 {offsets = [0, 32], sizes = [32, 32], strides = [1, 1]} : vector<32x96xf32> to vector<32x32xf32>
    %77 = vector.extract_strided_slice %74 {offsets = [0, 64], sizes = [32, 32], strides = [1, 1]} : vector<32x96xf32> to vector<32x32xf32>
    %cst_33 = arith.constant 2.500000e-01 : f32
    %78 = vector.broadcast %cst_33 : f32 to vector<32x32xf32>
    %79 = arith.mulf %75, %78 : vector<32x32xf32>
    %80 = vector.extract_strided_slice %79 {offsets = [0, 0], sizes = [32, 16], strides = [1, 1]} : vector<32x32xf32> to vector<32x16xf32>
    %81 = vector.extract_strided_slice %76 {offsets = [0, 0], sizes = [32, 16], strides = [1, 1]} : vector<32x32xf32> to vector<32x16xf32>
    %cst_34 = arith.constant dense<0.000000e+00> : vector<32x32xf32>
    %82 = tpu.matmul %80, %81, %cst_34 {dimension_numbers = #tpu.dot_dimension_numbers<[1], [1], [0], [0], [0, 0, 1, 0], [], []>} : vector<32x16xf32>, vector<32x16xf32>, vector<32x32xf32> -> vector<32x32xf32>
    %83 = arith.addf %82, %6 : vector<32x32xf32>
    %cst_35 = arith.constant dense<0xFF800000> : vector<32xf32>
    %84 = vector.multi_reduction <maximumf>, %83, %cst_35 [1] : vector<32x32xf32> to vector<32xf32>
    %85 = vector.shape_cast %84 : vector<32xf32> to vector<32x1xf32>
    %86 = vector.broadcast %85 : vector<32x1xf32> to vector<32x32xf32>
    %87 = arith.subf %83, %86 : vector<32x32xf32>
    %88 = math.exp %87 : vector<32x32xf32>
    %cst_36 = arith.constant dense<0.000000e+00> : vector<32xf32>
    %89 = vector.multi_reduction <add>, %88, %cst_36 [1] : vector<32x32xf32> to vector<32xf32>
    %90 = vector.shape_cast %89 : vector<32xf32> to vector<32x1xf32>
    %91 = vector.broadcast %90 : vector<32x1xf32> to vector<32x32xf32>
    %92 = arith.divf %88, %91 : vector<32x32xf32>
    %c0_37 = arith.constant 0 : index
    %c0_38 = arith.constant 0 : index
    %93 = vector.load %arg4[%c0_37, %c0_38] : memref<32x128xf32, #tpu.memory_space<vmem>>, vector<32x32xf32>
    tpu.vector_store %arg4[%c0_37, %c0_38], %92 {strides = array<i32>} : memref<32x128xf32, #tpu.memory_space<vmem>>, vector<32x32xf32>,
    %94 = vector.extract_strided_slice %77 {offsets = [0, 0], sizes = [32, 16], strides = [1, 1]} : vector<32x32xf32> to vector<32x16xf32>
    %cst_39 = arith.constant dense<0.000000e+00> : vector<32x16xf32>
    %95 = tpu.matmul %92, %94, %cst_39 {dimension_numbers = #tpu.dot_dimension_numbers<[1], [0], [0], [1], [0, 0, 1, 1], [], []>} : vector<32x32xf32>, vector<32x16xf32>, vector<32x16xf32> -> vector<32x16xf32>
    %96 = vector.extract_strided_slice %79 {offsets = [0, 16], sizes = [32, 16], strides = [1, 1]} : vector<32x32xf32> to vector<32x16xf32>
    %97 = vector.extract_strided_slice %76 {offsets = [0, 16], sizes = [32, 16], strides = [1, 1]} : vector<32x32xf32> to vector<32x16xf32>
    %cst_40 = arith.constant dense<0.000000e+00> : vector<32x32xf32>
    %98 = tpu.matmul %96, %97, %cst_40 {dimension_numbers = #tpu.dot_dimension_numbers<[1], [1], [0], [0], [0, 0, 1, 0], [], []>} : vector<32x16xf32>, vector<32x16xf32>, vector<32x32xf32> -> vector<32x32xf32>
    %99 = arith.addf %98, %6 : vector<32x32xf32>
    %cst_41 = arith.constant dense<0xFF800000> : vector<32xf32>
    %100 = vector.multi_reduction <maximumf>, %99, %cst_41 [1] : vector<32x32xf32> to vector<32xf32>
    %101 = vector.shape_cast %100 : vector<32xf32> to vector<32x1xf32>
    %102 = vector.broadcast %101 : vector<32x1xf32> to vector<32x32xf32>
    %103 = arith.subf %99, %102 : vector<32x32xf32>
    %104 = math.exp %103 : vector<32x32xf32>
    %cst_42 = arith.constant dense<0.000000e+00> : vector<32xf32>
    %105 = vector.multi_reduction <add>, %104, %cst_42 [1] : vector<32x32xf32> to vector<32xf32>
    %106 = vector.shape_cast %105 : vector<32xf32> to vector<32x1xf32>
    %107 = vector.broadcast %106 : vector<32x1xf32> to vector<32x32xf32>
    %108 = arith.divf %104, %107 : vector<32x32xf32>
    %c0_43 = arith.constant 0 : index
    %c32_44 = arith.constant 32 : index
    %109 = vector.load %arg4[%c0_43, %c32_44] : memref<32x128xf32, #tpu.memory_space<vmem>>, vector<32x32xf32>
    tpu.vector_store %arg4[%c0_43, %c32_44], %108 {strides = array<i32>} : memref<32x128xf32, #tpu.memory_space<vmem>>, vector<32x32xf32>,
    %110 = vector.extract_strided_slice %77 {offsets = [0, 16], sizes = [32, 16], strides = [1, 1]} : vector<32x32xf32> to vector<32x16xf32>
    %cst_45 = arith.constant dense<0.000000e+00> : vector<32x16xf32>
    %111 = tpu.matmul %108, %110, %cst_45 {dimension_numbers = #tpu.dot_dimension_numbers<[1], [0], [0], [1], [0, 0, 1, 1], [], []>} : vector<32x32xf32>, vector<32x16xf32>, vector<32x16xf32> -> vector<32x16xf32>
    %112 = tpu.concatenate %95, %111 in 1 : vector<32x16xf32>, vector<32x16xf32> -> vector<32x32xf32>
    %113 = vector.broadcast %0 : vector<32x1xf32> to vector<32x32xf32>
    %114 = arith.mulf %112, %113 : vector<32x32xf32>
    %115 = vector.broadcast %2 : vector<32x1xf32> to vector<32x32xf32>
    %116 = arith.mulf %112, %115 : vector<32x32xf32>
    %117 = tpu.concatenate %114, %116 in 1 : vector<32x32xf32>, vector<32x32xf32> -> vector<32x64xf32>
    %c304 = arith.constant 304 : index
    %c0_46 = arith.constant 0 : index
    %118 = vector.load %arg0[%c304, %c0_46] : memref<1608x128xf32, #tpu.memory_space<vmem>>, vector<64x32xf32>
    %cst_47 = arith.constant dense<0.000000e+00> : vector<32x32xf32>
    %119 = tpu.matmul %117, %118, %cst_47 {dimension_numbers = #tpu.dot_dimension_numbers<[1], [0], [0], [1], [0, 0, 1, 1], [], []>} : vector<32x64xf32>, vector<64x32xf32>, vector<32x32xf32> -> vector<32x32xf32>
    %c368 = arith.constant 368 : index
    %c0_48 = arith.constant 0 : index
    %120 = vector.load %arg0[%c368, %c0_48] : memref<1608x128xf32, #tpu.memory_space<vmem>>, vector<32x32xf32>
    %121 = arith.addf %119, %120 : vector<32x32xf32>
    %122 = arith.addf %43, %121 : vector<32x32xf32>
    %cst_49 = arith.constant dense<0.000000e+00> : vector<32xf32>
    %123 = vector.multi_reduction <add>, %122, %cst_49 [1] : vector<32x32xf32> to vector<32xf32>
    %124 = vector.shape_cast %123 : vector<32xf32> to vector<32x1xf32>
    %cst_50 = arith.constant 3.200000e+01 : f32
    %125 = vector.broadcast %cst_50 : f32 to vector<32x1xf32>
    %126 = arith.divf %124, %125 : vector<32x1xf32>
    %127 = vector.broadcast %126 : vector<32x1xf32> to vector<32x32xf32>
    %128 = arith.subf %122, %127 : vector<32x32xf32>
    %129 = arith.mulf %128, %128 : vector<32x32xf32>
    %cst_51 = arith.constant dense<0.000000e+00> : vector<32xf32>
    %130 = vector.multi_reduction <add>, %129, %cst_51 [1] : vector<32x32xf32> to vector<32xf32>
    %131 = vector.shape_cast %130 : vector<32xf32> to vector<32x1xf32>
    %cst_52 = arith.constant 3.200000e+01 : f32
    %132 = vector.broadcast %cst_52 : f32 to vector<32x1xf32>
    %133 = arith.divf %131, %132 : vector<32x1xf32>
    %134 = vector.broadcast %126 : vector<32x1xf32> to vector<32x32xf32>
    %135 = arith.subf %122, %134 : vector<32x32xf32>
    %cst_53 = arith.constant 9.99999974E-6 : f32
    %136 = vector.broadcast %cst_53 : f32 to vector<32x1xf32>
    %137 = arith.addf %133, %136 : vector<32x1xf32>
    %138 = math.rsqrt %137 : vector<32x1xf32>
    %139 = vector.broadcast %138 : vector<32x1xf32> to vector<32x32xf32>
    %140 = arith.mulf %135, %139 : vector<32x32xf32>
    %c400 = arith.constant 400 : index
    %c0_54 = arith.constant 0 : index
    %141 = vector.load %arg0[%c400, %c0_54] : memref<1608x128xf32, #tpu.memory_space<vmem>>, vector<32x32xf32>
    %142 = arith.mulf %140, %141 : vector<32x32xf32>
    %c432 = arith.constant 432 : index
    %c0_55 = arith.constant 0 : index
    %143 = vector.load %arg0[%c432, %c0_55] : memref<1608x128xf32, #tpu.memory_space<vmem>>, vector<32x32xf32>
    %144 = arith.addf %142, %143 : vector<32x32xf32>
    %145 = vector.broadcast %0 : vector<32x1xf32> to vector<32x32xf32>
    %146 = arith.mulf %144, %145 : vector<32x32xf32>
    %147 = vector.broadcast %2 : vector<32x1xf32> to vector<32x32xf32>
    %148 = arith.mulf %144, %147 : vector<32x32xf32>
    %149 = tpu.concatenate %146, %148 in 1 : vector<32x32xf32>, vector<32x32xf32> -> vector<32x64xf32>
    %c464 = arith.constant 464 : index
    %c0_56 = arith.constant 0 : index
    %150 = vector.load %arg0[%c464, %c0_56] : memref<1608x128xf32, #tpu.memory_space<vmem>>, vector<64x64xf32>
    %cst_57 = arith.constant dense<0.000000e+00> : vector<32x64xf32>
    %151 = tpu.matmul %149, %150, %cst_57 {dimension_numbers = #tpu.dot_dimension_numbers<[1], [0], [0], [1], [0, 0, 1, 1], [], []>} : vector<32x64xf32>, vector<64x64xf32>, vector<32x64xf32> -> vector<32x64xf32>
    %c528 = arith.constant 528 : index
    %c0_58 = arith.constant 0 : index
    %152 = vector.load %arg0[%c528, %c0_58] : memref<1608x128xf32, #tpu.memory_space<vmem>>, vector<32x64xf32>
    %153 = arith.addf %151, %152 : vector<32x64xf32>
    %154 = arith.mulf %153, %153 : vector<32x64xf32>
    %155 = arith.mulf %153, %154 : vector<32x64xf32>
    %cst_59 = arith.constant 4.471500e-02 : f32
    %156 = vector.broadcast %cst_59 : f32 to vector<32x64xf32>
    %157 = arith.mulf %156, %155 : vector<32x64xf32>
    %158 = arith.addf %153, %157 : vector<32x64xf32>
    %cst_60 = arith.constant 0.797884583 : f32
    %159 = vector.broadcast %cst_60 : f32 to vector<32x64xf32>
    %160 = arith.mulf %159, %158 : vector<32x64xf32>
    %161 = math.tanh %160 : vector<32x64xf32>
    %cst_61 = arith.constant 1.000000e+00 : f32
    %162 = vector.broadcast %cst_61 : f32 to vector<32x64xf32>
    %163 = arith.addf %162, %161 : vector<32x64xf32>
    %cst_62 = arith.constant 5.000000e-01 : f32
    %164 = vector.broadcast %cst_62 : f32 to vector<32x64xf32>
    %165 = arith.mulf %164, %163 : vector<32x64xf32>
    %166 = arith.mulf %153, %165 : vector<32x64xf32>
    %167 = vector.broadcast %0 : vector<32x1xf32> to vector<32x64xf32>
    %168 = arith.mulf %166, %167 : vector<32x64xf32>
    %169 = vector.broadcast %2 : vector<32x1xf32> to vector<32x64xf32>
    %170 = arith.mulf %166, %169 : vector<32x64xf32>
    %171 = tpu.concatenate %168, %170 in 1 : vector<32x64xf32>, vector<32x64xf32> -> vector<32x128xf32>
    %c560 = arith.constant 560 : index
    %c0_63 = arith.constant 0 : index
    %172 = vector.load %arg0[%c560, %c0_63] : memref<1608x128xf32, #tpu.memory_space<vmem>>, vector<128x32xf32>
    %cst_64 = arith.constant dense<0.000000e+00> : vector<32x32xf32>
    %173 = tpu.matmul %171, %172, %cst_64 {dimension_numbers = #tpu.dot_dimension_numbers<[1], [0], [0], [1], [0, 0, 1, 1], [], []>} : vector<32x128xf32>, vector<128x32xf32>, vector<32x32xf32> -> vector<32x32xf32>
    %c688 = arith.constant 688 : index
    %c0_65 = arith.constant 0 : index
    %174 = vector.load %arg0[%c688, %c0_65] : memref<1608x128xf32, #tpu.memory_space<vmem>>, vector<32x32xf32>
    %175 = arith.addf %173, %174 : vector<32x32xf32>
    %176 = arith.addf %122, %175 : vector<32x32xf32>
    %cst_66 = arith.constant dense<0.000000e+00> : vector<32xf32>
    %177 = vector.multi_reduction <add>, %176, %cst_66 [1] : vector<32x32xf32> to vector<32xf32>
    %178 = vector.shape_cast %177 : vector<32xf32> to vector<32x1xf32>
    %cst_67 = arith.constant 3.200000e+01 : f32
    %179 = vector.broadcast %cst_67 : f32 to vector<32x1xf32>
    %180 = arith.divf %178, %179 : vector<32x1xf32>
    %181 = vector.broadcast %180 : vector<32x1xf32> to vector<32x32xf32>
    %182 = arith.subf %176, %181 : vector<32x32xf32>
    %183 = arith.mulf %182, %182 : vector<32x32xf32>
    %cst_68 = arith.constant dense<0.000000e+00> : vector<32xf32>
    %184 = vector.multi_reduction <add>, %183, %cst_68 [1] : vector<32x32xf32> to vector<32xf32>
    %185 = vector.shape_cast %184 : vector<32xf32> to vector<32x1xf32>
    %cst_69 = arith.constant 3.200000e+01 : f32
    %186 = vector.broadcast %cst_69 : f32 to vector<32x1xf32>
    %187 = arith.divf %185, %186 : vector<32x1xf32>
    %188 = vector.broadcast %180 : vector<32x1xf32> to vector<32x32xf32>
    %189 = arith.subf %176, %188 : vector<32x32xf32>
    %cst_70 = arith.constant 9.99999974E-6 : f32
    %190 = vector.broadcast %cst_70 : f32 to vector<32x1xf32>
    %191 = arith.addf %187, %190 : vector<32x1xf32>
    %192 = math.rsqrt %191 : vector<32x1xf32>
    %193 = vector.broadcast %192 : vector<32x1xf32> to vector<32x32xf32>
    %194 = arith.mulf %189, %193 : vector<32x32xf32>
    %c720 = arith.constant 720 : index
    %c0_71 = arith.constant 0 : index
    %195 = vector.load %arg0[%c720, %c0_71] : memref<1608x128xf32, #tpu.memory_space<vmem>>, vector<32x32xf32>
    %196 = arith.mulf %194, %195 : vector<32x32xf32>
    %c752 = arith.constant 752 : index
    %c0_72 = arith.constant 0 : index
    %197 = vector.load %arg0[%c752, %c0_72] : memref<1608x128xf32, #tpu.memory_space<vmem>>, vector<32x32xf32>
    %198 = arith.addf %196, %197 : vector<32x32xf32>
    %cst_73 = arith.constant dense<0.000000e+00> : vector<32xf32>
    %199 = vector.multi_reduction <add>, %198, %cst_73 [1] : vector<32x32xf32> to vector<32xf32>
    %200 = vector.shape_cast %199 : vector<32xf32> to vector<32x1xf32>
    %cst_74 = arith.constant 3.200000e+01 : f32
    %201 = vector.broadcast %cst_74 : f32 to vector<32x1xf32>
    %202 = arith.divf %200, %201 : vector<32x1xf32>
    %203 = vector.broadcast %202 : vector<32x1xf32> to vector<32x32xf32>
    %204 = arith.subf %198, %203 : vector<32x32xf32>
    %205 = arith.mulf %204, %204 : vector<32x32xf32>
    %cst_75 = arith.constant dense<0.000000e+00> : vector<32xf32>
    %206 = vector.multi_reduction <add>, %205, %cst_75 [1] : vector<32x32xf32> to vector<32xf32>
    %207 = vector.shape_cast %206 : vector<32xf32> to vector<32x1xf32>
    %cst_76 = arith.constant 3.200000e+01 : f32
    %208 = vector.broadcast %cst_76 : f32 to vector<32x1xf32>
    %209 = arith.divf %207, %208 : vector<32x1xf32>
    %210 = vector.broadcast %202 : vector<32x1xf32> to vector<32x32xf32>
    %211 = arith.subf %198, %210 : vector<32x32xf32>
    %cst_77 = arith.constant 9.99999974E-6 : f32
    %212 = vector.broadcast %cst_77 : f32 to vector<32x1xf32>
    %213 = arith.addf %209, %212 : vector<32x1xf32>
    %214 = math.rsqrt %213 : vector<32x1xf32>
    %215 = vector.broadcast %214 : vector<32x1xf32> to vector<32x32xf32>
    %216 = arith.mulf %211, %215 : vector<32x32xf32>
    %c784 = arith.constant 784 : index
    %c0_78 = arith.constant 0 : index
    %217 = vector.load %arg0[%c784, %c0_78] : memref<1608x128xf32, #tpu.memory_space<vmem>>, vector<32x32xf32>
    %218 = arith.mulf %216, %217 : vector<32x32xf32>
    %c816 = arith.constant 816 : index
    %c0_79 = arith.constant 0 : index
    %219 = vector.load %arg0[%c816, %c0_79] : memref<1608x128xf32, #tpu.memory_space<vmem>>, vector<32x32xf32>
    %220 = arith.addf %218, %219 : vector<32x32xf32>
    %cst_80 = arith.constant dense<0.000000e+00> : vector<32xf32>
    %221 = vector.multi_reduction <add>, %198, %cst_80 [1] : vector<32x32xf32> to vector<32xf32>
    %222 = vector.shape_cast %221 : vector<32xf32> to vector<32x1xf32>
    %cst_81 = arith.constant 3.200000e+01 : f32
    %223 = vector.broadcast %cst_81 : f32 to vector<32x1xf32>
    %224 = arith.divf %222, %223 : vector<32x1xf32>
    %225 = vector.broadcast %224 : vector<32x1xf32> to vector<32x32xf32>
    %226 = arith.subf %198, %225 : vector<32x32xf32>
    %227 = arith.mulf %226, %226 : vector<32x32xf32>
    %cst_82 = arith.constant dense<0.000000e+00> : vector<32xf32>
    %228 = vector.multi_reduction <add>, %227, %cst_82 [1] : vector<32x32xf32> to vector<32xf32>
    %229 = vector.shape_cast %228 : vector<32xf32> to vector<32x1xf32>
    %cst_83 = arith.constant 3.200000e+01 : f32
    %230 = vector.broadcast %cst_83 : f32 to vector<32x1xf32>
    %231 = arith.divf %229, %230 : vector<32x1xf32>
    %232 = vector.broadcast %224 : vector<32x1xf32> to vector<32x32xf32>
    %233 = arith.subf %198, %232 : vector<32x32xf32>
    %cst_84 = arith.constant 9.99999974E-6 : f32
    %234 = vector.broadcast %cst_84 : f32 to vector<32x1xf32>
    %235 = arith.addf %231, %234 : vector<32x1xf32>
    %236 = math.rsqrt %235 : vector<32x1xf32>
    %237 = vector.broadcast %236 : vector<32x1xf32> to vector<32x32xf32>
    %238 = arith.mulf %233, %237 : vector<32x32xf32>
    %c848 = arith.constant 848 : index
    %c0_85 = arith.constant 0 : index
    %239 = vector.load %arg0[%c848, %c0_85] : memref<1608x128xf32, #tpu.memory_space<vmem>>, vector<32x32xf32>
    %240 = arith.mulf %238, %239 : vector<32x32xf32>
    %c880 = arith.constant 880 : index
    %c0_86 = arith.constant 0 : index
    %241 = vector.load %arg0[%c880, %c0_86] : memref<1608x128xf32, #tpu.memory_space<vmem>>, vector<32x32xf32>
    %242 = arith.addf %240, %241 : vector<32x32xf32>
    %243 = vector.broadcast %0 : vector<32x1xf32> to vector<32x32xf32>
    %244 = arith.mulf %220, %243 : vector<32x32xf32>
    %245 = vector.broadcast %2 : vector<32x1xf32> to vector<32x32xf32>
    %246 = arith.mulf %220, %245 : vector<32x32xf32>
    %247 = tpu.concatenate %244, %246 in 1 : vector<32x32xf32>, vector<32x32xf32> -> vector<32x64xf32>
    %c912 = arith.constant 912 : index
    %c0_87 = arith.constant 0 : index
    %248 = vector.load %arg0[%c912, %c0_87] : memref<1608x128xf32, #tpu.memory_space<vmem>>, vector<64x32xf32>
    %cst_88 = arith.constant dense<0.000000e+00> : vector<32x32xf32>
    %249 = tpu.matmul %247, %248, %cst_88 {dimension_numbers = #tpu.dot_dimension_numbers<[1], [0], [0], [1], [0, 0, 1, 1], [], []>} : vector<32x64xf32>, vector<64x32xf32>, vector<32x32xf32> -> vector<32x32xf32>
    %c976 = arith.constant 976 : index
    %c0_89 = arith.constant 0 : index
    %250 = vector.load %arg0[%c976, %c0_89] : memref<1608x128xf32, #tpu.memory_space<vmem>>, vector<32x32xf32>
    %251 = arith.addf %249, %250 : vector<32x32xf32>
    %252 = vector.broadcast %2 : vector<32x1xf32> to vector<32x32xf32>
    %253 = arith.mulf %242, %252 : vector<32x32xf32>
    %254 = vector.broadcast %0 : vector<32x1xf32> to vector<32x32xf32>
    %255 = arith.mulf %242, %254 : vector<32x32xf32>
    %256 = tpu.concatenate %253, %255 in 1 : vector<32x32xf32>, vector<32x32xf32> -> vector<32x64xf32>
    %c1008 = arith.constant 1008 : index
    %c0_90 = arith.constant 0 : index
    %257 = vector.load %arg0[%c1008, %c0_90] : memref<1608x128xf32, #tpu.memory_space<vmem>>, vector<64x64xf32>
    %cst_91 = arith.constant dense<0.000000e+00> : vector<32x64xf32>
    %258 = tpu.matmul %256, %257, %cst_91 {dimension_numbers = #tpu.dot_dimension_numbers<[1], [0], [0], [1], [0, 0, 1, 1], [], []>} : vector<32x64xf32>, vector<64x64xf32>, vector<32x64xf32> -> vector<32x64xf32>
    %c1072 = arith.constant 1072 : index
    %c0_92 = arith.constant 0 : index
    %259 = vector.load %arg0[%c1072, %c0_92] : memref<1608x128xf32, #tpu.memory_space<vmem>>, vector<32x64xf32>
    %260 = arith.addf %258, %259 : vector<32x64xf32>
    %261 = vector.extract_strided_slice %260 {offsets = [0, 0], sizes = [32, 32], strides = [1, 1]} : vector<32x64xf32> to vector<32x32xf32>
    %262 = vector.extract_strided_slice %260 {offsets = [0, 32], sizes = [32, 32], strides = [1, 1]} : vector<32x64xf32> to vector<32x32xf32>
    %cst_93 = arith.constant 2.500000e-01 : f32
    %263 = vector.broadcast %cst_93 : f32 to vector<32x32xf32>
    %264 = arith.mulf %251, %263 : vector<32x32xf32>
    %265 = vector.extract_strided_slice %264 {offsets = [0, 0], sizes = [32, 16], strides = [1, 1]} : vector<32x32xf32> to vector<32x16xf32>
    %266 = vector.extract_strided_slice %261 {offsets = [0, 0], sizes = [32, 16], strides = [1, 1]} : vector<32x32xf32> to vector<32x16xf32>
    %cst_94 = arith.constant dense<0.000000e+00> : vector<32x32xf32>
    %267 = tpu.matmul %265, %266, %cst_94 {dimension_numbers = #tpu.dot_dimension_numbers<[1], [1], [0], [0], [0, 0, 1, 0], [], []>} : vector<32x16xf32>, vector<32x16xf32>, vector<32x32xf32> -> vector<32x32xf32>
    %268 = arith.addf %267, %7 : vector<32x32xf32>
    %cst_95 = arith.constant dense<0xFF800000> : vector<32xf32>
    %269 = vector.multi_reduction <maximumf>, %268, %cst_95 [1] : vector<32x32xf32> to vector<32xf32>
    %270 = vector.shape_cast %269 : vector<32xf32> to vector<32x1xf32>
    %271 = vector.broadcast %270 : vector<32x1xf32> to vector<32x32xf32>
    %272 = arith.subf %268, %271 : vector<32x32xf32>
    %273 = math.exp %272 : vector<32x32xf32>
    %cst_96 = arith.constant dense<0.000000e+00> : vector<32xf32>
    %274 = vector.multi_reduction <add>, %273, %cst_96 [1] : vector<32x32xf32> to vector<32xf32>
    %275 = vector.shape_cast %274 : vector<32xf32> to vector<32x1xf32>
    %276 = vector.broadcast %275 : vector<32x1xf32> to vector<32x32xf32>
    %277 = arith.divf %273, %276 : vector<32x32xf32>
    %c0_97 = arith.constant 0 : index
    %c64 = arith.constant 64 : index
    %278 = vector.load %arg4[%c0_97, %c64] : memref<32x128xf32, #tpu.memory_space<vmem>>, vector<32x32xf32>
    tpu.vector_store %arg4[%c0_97, %c64], %277 {strides = array<i32>} : memref<32x128xf32, #tpu.memory_space<vmem>>, vector<32x32xf32>,
    %279 = vector.extract_strided_slice %262 {offsets = [0, 0], sizes = [32, 16], strides = [1, 1]} : vector<32x32xf32> to vector<32x16xf32>
    %cst_98 = arith.constant dense<0.000000e+00> : vector<32x16xf32>
    %280 = tpu.matmul %277, %279, %cst_98 {dimension_numbers = #tpu.dot_dimension_numbers<[1], [0], [0], [1], [0, 0, 1, 1], [], []>} : vector<32x32xf32>, vector<32x16xf32>, vector<32x16xf32> -> vector<32x16xf32>
    %281 = vector.extract_strided_slice %264 {offsets = [0, 16], sizes = [32, 16], strides = [1, 1]} : vector<32x32xf32> to vector<32x16xf32>
    %282 = vector.extract_strided_slice %261 {offsets = [0, 16], sizes = [32, 16], strides = [1, 1]} : vector<32x32xf32> to vector<32x16xf32>
    %cst_99 = arith.constant dense<0.000000e+00> : vector<32x32xf32>
    %283 = tpu.matmul %281, %282, %cst_99 {dimension_numbers = #tpu.dot_dimension_numbers<[1], [1], [0], [0], [0, 0, 1, 0], [], []>} : vector<32x16xf32>, vector<32x16xf32>, vector<32x32xf32> -> vector<32x32xf32>
    %284 = arith.addf %283, %7 : vector<32x32xf32>
    %cst_100 = arith.constant dense<0xFF800000> : vector<32xf32>
    %285 = vector.multi_reduction <maximumf>, %284, %cst_100 [1] : vector<32x32xf32> to vector<32xf32>
    %286 = vector.shape_cast %285 : vector<32xf32> to vector<32x1xf32>
    %287 = vector.broadcast %286 : vector<32x1xf32> to vector<32x32xf32>
    %288 = arith.subf %284, %287 : vector<32x32xf32>
    %289 = math.exp %288 : vector<32x32xf32>
    %cst_101 = arith.constant dense<0.000000e+00> : vector<32xf32>
    %290 = vector.multi_reduction <add>, %289, %cst_101 [1] : vector<32x32xf32> to vector<32xf32>
    %291 = vector.shape_cast %290 : vector<32xf32> to vector<32x1xf32>
    %292 = vector.broadcast %291 : vector<32x1xf32> to vector<32x32xf32>
    %293 = arith.divf %289, %292 : vector<32x32xf32>
    %c0_102 = arith.constant 0 : index
    %c96 = arith.constant 96 : index
    %294 = vector.load %arg4[%c0_102, %c96] : memref<32x128xf32, #tpu.memory_space<vmem>>, vector<32x32xf32>
    tpu.vector_store %arg4[%c0_102, %c96], %293 {strides = array<i32>} : memref<32x128xf32, #tpu.memory_space<vmem>>, vector<32x32xf32>,
    %295 = vector.extract_strided_slice %262 {offsets = [0, 16], sizes = [32, 16], strides = [1, 1]} : vector<32x32xf32> to vector<32x16xf32>
    %cst_103 = arith.constant dense<0.000000e+00> : vector<32x16xf32>
    %296 = tpu.matmul %293, %295, %cst_103 {dimension_numbers = #tpu.dot_dimension_numbers<[1], [0], [0], [1], [0, 0, 1, 1], [], []>} : vector<32x32xf32>, vector<32x16xf32>, vector<32x16xf32> -> vector<32x16xf32>
    %297 = tpu.concatenate %280, %296 in 1 : vector<32x16xf32>, vector<32x16xf32> -> vector<32x32xf32>
    %298 = vector.broadcast %0 : vector<32x1xf32> to vector<32x32xf32>
    %299 = arith.mulf %297, %298 : vector<32x32xf32>
    %300 = vector.broadcast %2 : vector<32x1xf32> to vector<32x32xf32>
    %301 = arith.mulf %297, %300 : vector<32x32xf32>
    %302 = tpu.concatenate %299, %301 in 1 : vector<32x32xf32>, vector<32x32xf32> -> vector<32x64xf32>
    %c1104 = arith.constant 1104 : index
    %c0_104 = arith.constant 0 : index
    %303 = vector.load %arg0[%c1104, %c0_104] : memref<1608x128xf32, #tpu.memory_space<vmem>>, vector<64x32xf32>
    %cst_105 = arith.constant dense<0.000000e+00> : vector<32x32xf32>
    %304 = tpu.matmul %302, %303, %cst_105 {dimension_numbers = #tpu.dot_dimension_numbers<[1], [0], [0], [1], [0, 0, 1, 1], [], []>} : vector<32x64xf32>, vector<64x32xf32>, vector<32x32xf32> -> vector<32x32xf32>
    %c1168 = arith.constant 1168 : index
    %c0_106 = arith.constant 0 : index
    %305 = vector.load %arg0[%c1168, %c0_106] : memref<1608x128xf32, #tpu.memory_space<vmem>>, vector<32x32xf32>
    %306 = arith.addf %304, %305 : vector<32x32xf32>
    %307 = arith.addf %198, %306 : vector<32x32xf32>
    %cst_107 = arith.constant dense<0.000000e+00> : vector<32xf32>
    %308 = vector.multi_reduction <add>, %307, %cst_107 [1] : vector<32x32xf32> to vector<32xf32>
    %309 = vector.shape_cast %308 : vector<32xf32> to vector<32x1xf32>
    %cst_108 = arith.constant 3.200000e+01 : f32
    %310 = vector.broadcast %cst_108 : f32 to vector<32x1xf32>
    %311 = arith.divf %309, %310 : vector<32x1xf32>
    %312 = vector.broadcast %311 : vector<32x1xf32> to vector<32x32xf32>
    %313 = arith.subf %307, %312 : vector<32x32xf32>
    %314 = arith.mulf %313, %313 : vector<32x32xf32>
    %cst_109 = arith.constant dense<0.000000e+00> : vector<32xf32>
    %315 = vector.multi_reduction <add>, %314, %cst_109 [1] : vector<32x32xf32> to vector<32xf32>
    %316 = vector.shape_cast %315 : vector<32xf32> to vector<32x1xf32>
    %cst_110 = arith.constant 3.200000e+01 : f32
    %317 = vector.broadcast %cst_110 : f32 to vector<32x1xf32>
    %318 = arith.divf %316, %317 : vector<32x1xf32>
    %319 = vector.broadcast %311 : vector<32x1xf32> to vector<32x32xf32>
    %320 = arith.subf %307, %319 : vector<32x32xf32>
    %cst_111 = arith.constant 9.99999974E-6 : f32
    %321 = vector.broadcast %cst_111 : f32 to vector<32x1xf32>
    %322 = arith.addf %318, %321 : vector<32x1xf32>
    %323 = math.rsqrt %322 : vector<32x1xf32>
    %324 = vector.broadcast %323 : vector<32x1xf32> to vector<32x32xf32>
    %325 = arith.mulf %320, %324 : vector<32x32xf32>
    %c1200 = arith.constant 1200 : index
    %c0_112 = arith.constant 0 : index
    %326 = vector.load %arg0[%c1200, %c0_112] : memref<1608x128xf32, #tpu.memory_space<vmem>>, vector<32x32xf32>
    %327 = arith.mulf %325, %326 : vector<32x32xf32>
    %c1232 = arith.constant 1232 : index
    %c0_113 = arith.constant 0 : index
    %328 = vector.load %arg0[%c1232, %c0_113] : memref<1608x128xf32, #tpu.memory_space<vmem>>, vector<32x32xf32>
    %329 = arith.addf %327, %328 : vector<32x32xf32>
    %330 = vector.broadcast %0 : vector<32x1xf32> to vector<32x32xf32>
    %331 = arith.mulf %329, %330 : vector<32x32xf32>
    %332 = vector.broadcast %2 : vector<32x1xf32> to vector<32x32xf32>
    %333 = arith.mulf %329, %332 : vector<32x32xf32>
    %334 = tpu.concatenate %331, %333 in 1 : vector<32x32xf32>, vector<32x32xf32> -> vector<32x64xf32>
    %c1264 = arith.constant 1264 : index
    %c0_114 = arith.constant 0 : index
    %335 = vector.load %arg0[%c1264, %c0_114] : memref<1608x128xf32, #tpu.memory_space<vmem>>, vector<64x64xf32>
    %cst_115 = arith.constant dense<0.000000e+00> : vector<32x64xf32>
    %336 = tpu.matmul %334, %335, %cst_115 {dimension_numbers = #tpu.dot_dimension_numbers<[1], [0], [0], [1], [0, 0, 1, 1], [], []>} : vector<32x64xf32>, vector<64x64xf32>, vector<32x64xf32> -> vector<32x64xf32>
    %c1328 = arith.constant 1328 : index
    %c0_116 = arith.constant 0 : index
    %337 = vector.load %arg0[%c1328, %c0_116] : memref<1608x128xf32, #tpu.memory_space<vmem>>, vector<32x64xf32>
    %338 = arith.addf %336, %337 : vector<32x64xf32>
    %339 = arith.mulf %338, %338 : vector<32x64xf32>
    %340 = arith.mulf %338, %339 : vector<32x64xf32>
    %cst_117 = arith.constant 4.471500e-02 : f32
    %341 = vector.broadcast %cst_117 : f32 to vector<32x64xf32>
    %342 = arith.mulf %341, %340 : vector<32x64xf32>
    %343 = arith.addf %338, %342 : vector<32x64xf32>
    %cst_118 = arith.constant 0.797884583 : f32
    %344 = vector.broadcast %cst_118 : f32 to vector<32x64xf32>
    %345 = arith.mulf %344, %343 : vector<32x64xf32>
    %346 = math.tanh %345 : vector<32x64xf32>
    %cst_119 = arith.constant 1.000000e+00 : f32
    %347 = vector.broadcast %cst_119 : f32 to vector<32x64xf32>
    %348 = arith.addf %347, %346 : vector<32x64xf32>
    %cst_120 = arith.constant 5.000000e-01 : f32
    %349 = vector.broadcast %cst_120 : f32 to vector<32x64xf32>
    %350 = arith.mulf %349, %348 : vector<32x64xf32>
    %351 = arith.mulf %338, %350 : vector<32x64xf32>
    %352 = vector.broadcast %0 : vector<32x1xf32> to vector<32x64xf32>
    %353 = arith.mulf %351, %352 : vector<32x64xf32>
    %354 = vector.broadcast %2 : vector<32x1xf32> to vector<32x64xf32>
    %355 = arith.mulf %351, %354 : vector<32x64xf32>
    %356 = tpu.concatenate %353, %355 in 1 : vector<32x64xf32>, vector<32x64xf32> -> vector<32x128xf32>
    %c1360 = arith.constant 1360 : index
    %c0_121 = arith.constant 0 : index
    %357 = vector.load %arg0[%c1360, %c0_121] : memref<1608x128xf32, #tpu.memory_space<vmem>>, vector<128x32xf32>
    %cst_122 = arith.constant dense<0.000000e+00> : vector<32x32xf32>
    %358 = tpu.matmul %356, %357, %cst_122 {dimension_numbers = #tpu.dot_dimension_numbers<[1], [0], [0], [1], [0, 0, 1, 1], [], []>} : vector<32x128xf32>, vector<128x32xf32>, vector<32x32xf32> -> vector<32x32xf32>
    %c1488 = arith.constant 1488 : index
    %c0_123 = arith.constant 0 : index
    %359 = vector.load %arg0[%c1488, %c0_123] : memref<1608x128xf32, #tpu.memory_space<vmem>>, vector<32x32xf32>
    %360 = arith.addf %358, %359 : vector<32x32xf32>
    %361 = arith.addf %307, %360 : vector<32x32xf32>
    %362 = vector.extract_strided_slice %361 {offsets = [16, 0], sizes = [4, 32], strides = [1, 1]} : vector<32x32xf32> to vector<4x32xf32>
    %363 = vector.extract_strided_slice %362 {offsets = [0, 0], sizes = [2, 32], strides = [1, 1]} : vector<4x32xf32> to vector<2x32xf32>
    %364 = vector.extract_strided_slice %362 {offsets = [2, 0], sizes = [2, 32], strides = [1, 1]} : vector<4x32xf32> to vector<2x32xf32>
    %365 = tpu.concatenate %363, %364 in 1 : vector<2x32xf32>, vector<2x32xf32> -> vector<2x64xf32>
    %c0_124 = arith.constant 0 : index
    %c0_125 = arith.constant 0 : index
    %366 = vector.load %arg3[%c0_124, %c0_125] : memref<2x64xf32, #tpu.memory_space<vmem>>, vector<2x64xf32>
    tpu.vector_store %arg3[%c0_124, %c0_125], %365 {strides = array<i32>} : memref<2x64xf32, #tpu.memory_space<vmem>>, vector<2x64xf32>,
    %cst_126 = arith.constant dense<0.000000e+00> : vector<2xf32>
    %367 = vector.multi_reduction <add>, %365, %cst_126 [1] : vector<2x64xf32> to vector<2xf32>
    %368 = vector.shape_cast %367 : vector<2xf32> to vector<2x1xf32>
    %cst_127 = arith.constant 6.400000e+01 : f32
    %369 = vector.broadcast %cst_127 : f32 to vector<2x1xf32>
    %370 = arith.divf %368, %369 : vector<2x1xf32>
    %371 = vector.broadcast %370 : vector<2x1xf32> to vector<2x64xf32>
    %372 = arith.subf %365, %371 : vector<2x64xf32>
    %373 = arith.mulf %372, %372 : vector<2x64xf32>
    %cst_128 = arith.constant dense<0.000000e+00> : vector<2xf32>
    %374 = vector.multi_reduction <add>, %373, %cst_128 [1] : vector<2x64xf32> to vector<2xf32>
    %375 = vector.shape_cast %374 : vector<2xf32> to vector<2x1xf32>
    %cst_129 = arith.constant 6.400000e+01 : f32
    %376 = vector.broadcast %cst_129 : f32 to vector<2x1xf32>
    %377 = arith.divf %375, %376 : vector<2x1xf32>
    %378 = vector.broadcast %370 : vector<2x1xf32> to vector<2x64xf32>
    %379 = arith.subf %365, %378 : vector<2x64xf32>
    %cst_130 = arith.constant 9.99999974E-6 : f32
    %380 = vector.broadcast %cst_130 : f32 to vector<2x1xf32>
    %381 = arith.addf %377, %380 : vector<2x1xf32>
    %382 = math.rsqrt %381 : vector<2x1xf32>
    %383 = vector.broadcast %382 : vector<2x1xf32> to vector<2x64xf32>
    %384 = arith.mulf %379, %383 : vector<2x64xf32>
    %c1520 = arith.constant 1520 : index
    %c0_131 = arith.constant 0 : index
    %385 = vector.load %arg0[%c1520, %c0_131] : memref<1608x128xf32, #tpu.memory_space<vmem>>, vector<1x64xf32>
    %386 = vector.broadcast %385 : vector<1x64xf32> to vector<2x64xf32>
    %387 = arith.mulf %384, %386 : vector<2x64xf32>
    %c1528 = arith.constant 1528 : index
    %c0_132 = arith.constant 0 : index
    %388 = vector.load %arg0[%c1528, %c0_132] : memref<1608x128xf32, #tpu.memory_space<vmem>>, vector<1x64xf32>
    %389 = vector.broadcast %388 : vector<1x64xf32> to vector<2x64xf32>
    %390 = arith.addf %387, %389 : vector<2x64xf32>
    %c1536 = arith.constant 1536 : index
    %c0_133 = arith.constant 0 : index
    %391 = vector.load %arg0[%c1536, %c0_133] : memref<1608x128xf32, #tpu.memory_space<vmem>>, vector<64x3xf32>
    %cst_134 = arith.constant dense<0.000000e+00> : vector<2x3xf32>
    %392 = tpu.matmul %390, %391, %cst_134 {dimension_numbers = #tpu.dot_dimension_numbers<[1], [0], [0], [1], [0, 0, 1, 1], [], []>} : vector<2x64xf32>, vector<64x3xf32>, vector<2x3xf32> -> vector<2x3xf32>
    %c1600 = arith.constant 1600 : index
    %c0_135 = arith.constant 0 : index
    %393 = vector.load %arg0[%c1600, %c0_135] : memref<1608x128xf32, #tpu.memory_space<vmem>>, vector<1x3xf32>
    %394 = vector.broadcast %393 : vector<1x3xf32> to vector<2x3xf32>
    %395 = arith.addf %392, %394 : vector<2x3xf32>
    %c0_136 = arith.constant 0 : index
    %c0_137 = arith.constant 0 : index
    %396 = vector.load %arg2[%c0_136, %c0_137] : memref<2x3xf32, #tpu.memory_space<vmem>>, vector<2x3xf32>
    tpu.vector_store %arg2[%c0_136, %c0_137], %395 {strides = array<i32>} : memref<2x3xf32, #tpu.memory_space<vmem>>, vector<2x3xf32>,
    return
  }
}

</mosaic_0001>

<bundles_post_ra>
// kernel: model_forward.1
= control target key start
LH: loop header
LB: loop body
LE: loop exit
PB: predicated region body
PF: predicated region fallthrough
CT: control target
= control target key end

     0   :  { %10 = vsyncpa [#allocation3], 0  ;;  %s5494_s0 = inlined_call_operand.hbm [shape: f32[1608,128], index: 0, kind: input, shape index: {}]   ;;  %s5495_s1 = inlined_call_operand.vmem [shape: f32[4,16], index: 1, kind: input, shape index: {}]   ;;  %s5496_s2 = inlined_call_operand.hbm [shape: f32[2,3], index: 2, kind: output, shape index: {0}]   ;;  %s5497_s3 = inlined_call_operand.hbm [shape: f32[2,64], index: 3, kind: output, shape index: {1}]   ;;  %s5498_s4 = inlined_call_operand.vmem [shape: f32[32,128], index: 4, kind: output, shape index: {2}]  }
   0x1   :  { %11 = vsyncpa [#allocation4], 0 }
   0x2   :  { %12 = vsyncpa [#allocation7], 0  ;;  %s4675_s15 = smov [#allocation2]   ;;  %s4603_s19 = scalar_lea.hbm %s5494_s0, 25728 }
   0x3   :  { %s18_s16 = sshll.u32 %s4675_s15, 4  ;;  %p4604_p0 = scmp.ne.s32.totalorder %s5494_s0, %s4603_s19  ;;  %s19_s16 = int_to_ptr.vmem [resolvable:$true] %s18_s16 }
   0x4   :  { %p4607_p1 = scmp.lt.u32.totalorder %s4603_s19, %s5494_s0 }
   0x6   :  { %p4609_p2 = pnand %p4607_p1, %p4604_p0 }
   0x8   :  { %4612 = shalt.err (!%p4609_p2)
}
   0x9   :  { %s4613_s24 = scalar_lea.vmem %s19_s16, 25728  ;;  %p4618_p4 = scmp.lt.s32.totalorder %s19_s16, %s19_s16 }
   0xa   :  { %p4614_p3 = scmp.ne.s32.totalorder %s19_s16, %s4613_s24  ;;  %p4619_p5 = scmp.lt.s32.totalorder %s4613_s24, %s4613_s24 }
   0xc   :  { %p4620_p6 = por %p4619_p5, %p4618_p4 }
   0xe   :  { %p4621_p7 = pnand %p4620_p6, %p4614_p3 }
  0x10   :  { %4624 = shalt.err (!%p4621_p7)
}
  0x11   :  { %s4676_s25 = smov 128   ;;  %s4677_s26 = smov 8  }
  0x12   :  { %24 = dma.hbm_to_vmem [thread:$0]  %s5494_s0, 25728, %s19_s16, [#allocation3], %s4676_s25, %s4676_s25, %s4677_s26  }
  0x13   :  { %4669 = dma.done.wait [#allocation3], 25728  }
  0x14   :  { %4670 = vsyncadd [#allocation3], 4294941568  ;;  %v4678_v0 = vmov 0   ;;  %v38_v1 = vld [vmem:[#allocation2 + $0x20] sm:$0xf]  ;;  %v4679_v3 = vmov 0.0  }
  0x15   :  { %4389 = vset.pattern.permute.xlu0 %v4678_v0  ;;  %4390 = vset.pattern.permute.xlu1 %v4678_v0  ;;  %v39_v2 = vsub.f32 1.0, %v38_v1  ;;  %v67_v4 = vld [vmem:[#allocation2 + $0x68] sm:$0xff]  ;;  %vm4680_vm0 = vmmov 0   ;;  %v48_v5 = vld [vmem:[%s5495_s1] sm:$0xf]  ;;  %s4681_s30 = smov 124  }
  0x16   :  { %51 = vperm.xlu0 %4389, %v38_v1   ;;  %3725 = vmatprep.subr.mxu1 %v4679_v3  ;;  %s4682_s5 = smov 116   ;;  %s4683_s6 = smov 120   ;;  %vm65_vm1 = vcmask 31744   ;;  %vm68_vm2 = vcmask 64512   ;;  %vm386_vm3 = vcmask 1043456   ;;  %v389_v23 = vld [vmem:[#allocation2 + $0x70] sm:$0xff] }
  0x17   :  { %3720 = vmatprep.subr.mxu0 %v4679_v3  ;;  %3726 = vmatpush3.msra.mxu1 %v67_v4  ;;  %s4684_s7 = smov 4   ;;  %vm397_vm4 = vcmask 261120   ;;  %v4758_v28 = vld [vmem:[#allocation2 + $0x80] sm:$0xff]  ;;  %v390_v34 = vld [vmem:[#allocation2 + $0x78] sm:$0xff]  ;;  %v4764_v35 = vld [vmem:[#allocation2 + $0x88] sm:$0xff]  ;;  %s4685_s1 = smov 32  }
  0x18   :  { %3727 = vmatprep.mubr.msk.f32.mxu1 %vm4680_vm0, %v4679_v3  ;;  %3721 = vmatpush3.msra.mxu0 %v67_v4  ;;  %v404_v32 = vsel %vm397_vm4, %v4758_v28, 0.0  ;;  %v407_v40 = vsel %vm397_vm4, %v4764_v35, 0.0  ;;  %v30_v58 = vld [vmem:[#allocation2] sm:$0xff]  ;;  %v31_v60 = vld [vmem:[#allocation2 + $0x8] sm:$0xff]  ;;  %v32_v62 = vld [vmem:[#allocation2 + $0x10] sm:$0xff]  ;;  %vm547_vm5 = vcmask 523264  }
  0x19   :  { %3722 = vmatprep.mubr.msk.f32.mxu0 %vm4680_vm0, %v4679_v3  ;;  %3735 = vmatprep.subr.mxu1 %v4679_v3  ;;  %v34_v59 = vsub.f32 1.0, %v30_v58  ;;  %v35_v61 = vsub.f32 1.0, %v31_v60  ;;  %vm661_vm6 = vcmask 130048   ;;  %s4686_s8 = smov 96   ;;  %s4687_s9 = smov 64   ;;  %vm3282_vm8 = vcmask 517120  }
  0x1a   :  { %57 = vperm.xlu0 %4389, %v39_v2   ;;  %3730 = vmatprep.subr.mxu0 %v4679_v3  ;;  %vm4845_vm7 = vmpackc.low %vm661_vm6, %vm661_vm6  ;;  %s4688_s10 = smov 80   ;;  %s4689_s11 = smov 112   ;;  %vm1101_vm9 = vcmask 523520   ;;  %vm2349_vm10 = vcmask 785920   ;;  %vm2636_vm11 = vcmask 1048320  }
  0x1b   :  { %s4690_s20 = smov 48   ;;  %s4691_s21 = smov 16  }
  0x1c   :  { %s4693_s18 = smov [#allocation6]  }
  0x1d   :  { %s3414_s19 = sshll.u32 %s4693_s18, 4  ;;  %s3415_s19 = int_to_ptr.vmem [resolvable:$true] %s3414_s19 }
  0x1e   :  { %p4630_p9 = scmp.lt.s32.totalorder %s3415_s19, %s3415_s19 }
  0x95   :  { %v52_v6 = vpop.permute.xlu0 %51 }
  0x96   :  { %v54_v7 = vmul.f32 %v52_v6, %v48_v5 }
  0x98   :  { %143 = vrot.lane.b32.xlu1 %v54_v7, %s4681_s30  ;;  %300 = vrot.lane.b32.xlu0 %v54_v7, %s4682_s5 }
  0x99   :  { %v58_v8 = vpop.permute.xlu0 %57 }
  0x9a   :  { %v60_v9 = vmul.f32 %v58_v8, %v48_v5  ;;  %v33_v5 = vld [vmem:[#allocation2 + $0x18] sm:$0xff] }
  0x9b   :  { %v37_v6 = vsub.f32 1.0, %v33_v5 }
  0x9c   :  { %220 = vrot.lane.b32.xlu0 %v54_v7, %s4683_s6  ;;  %62 = vrot.lane.b32.xlu1 %v60_v9, %s4684_s7 }
  0xa0   :  { %303 = vrot.lane.b32.xlu1 %v60_v9, %s4683_s6 }
  0xa4   :  { %223 = vrot.lane.b32.xlu1 %v60_v9, %s4681_s30 }
 0x10a   :  { %v144_v10 = vpop.permute.xlu1 %143  ;;  %v301_v14 = vpop.permute.xlu0 %300 }
 0x10b   :  { %v146_v11 = vsel %vm65_vm1, %v144_v10, %v60_v9 }
 0x10c   :  { %3728 = vmatmul.mubr.msk.f32.vlgmr.msra.gmra.mrb[0].mxu1 %vm68_vm2, %v146_v11  ;;  %v535_v11 = vld [vmem:[#allocation2 + $0xd0] sm:$0xff] }
 0x10d   :  { %3736 = vmatpush3.msra.mxu1 %v67_v4  ;;  %3737 = vmatprep.mubr.msk.f32.mxu1 %vm4680_vm0, %v4679_v3 }
 0x10e   :  { %v63_v12 = vpop.permute.xlu1 %62  ;;  %v221_v17 = vpop.permute.xlu0 %220 }
 0x10f   :  { %v66_v13 = vsel %vm65_vm1, %v54_v7, %v63_v12  ;;  %v536_v12 = vld [vmem:[#allocation2 + $0xd8] sm:$0xff] }
 0x110   :  { %3723 = vmatmul.mubr.msk.f32.vlgmr.msra.gmra.mrb[0].mxu0 %vm68_vm2, %v66_v13  ;;  %v4101_v13 = vpack.c.bf16 %v536_v12, %v535_v11 }
 0x111   :  { %3731 = vmatpush3.msra.mxu0 %v67_v4  ;;  %3732 = vmatprep.mubr.msk.f32.mxu0 %vm4680_vm0, %v4679_v3  ;;  %v36_v4 = vsub.f32 1.0, %v32_v62 }
 0x112   :  { %v304_v15 = vpop.permute.xlu1 %303  ;;  %4102 = vmatprep.subr.bf16.mxu0 %v4101_v13 }
 0x113   :  { %v306_v16 = vsel %vm65_vm1, %v301_v14, %v304_v15  ;;  %v452_v15 = vld [vmem:[#allocation2 + $0x98] sm:$0xff] }
 0x114   :  { %3738 = vmatmul.mubr.msk.f32.vlgmr.msra.gmra.mrb[2].mxu1 %vm68_vm2, %v306_v16 }
 0x116   :  { %v224_v18 = vpop.permute.xlu1 %223 }
 0x117   :  { %v226_v19 = vsel %vm65_vm1, %v221_v17, %v224_v18  ;;  %v460_v17 = vld [vmem:[#allocation2 + $0xb8] sm:$0xff] }
 0x118   :  { %3733 = vmatmul.mubr.msk.f32.vlgmr.msra.gmra.mrb[2].mxu0 %vm68_vm2, %v226_v19 }
 0x119   :  { %4104 = vmatpush3.bf16.msra.mxu0 %v4101_v13 }
 0x1df   :  { %v216_v20 = vpop.f32.mrb[0].mxu1 }
 0x1e0   :  { %v3729_v21 = vpop.f32.mrb[1].mxu1  ;;  %v381_v22 = vrot.slane %v216_v20, 4 }
 0x1e3   :  { %v138_v24 = vpop.f32.mrb[0].mxu0 }
 0x1e4   :  { %v387_v25 = vsel %vm386_vm3, %v138_v24, %v381_v22  ;;  %v3724_v26 = vpop.f32.mrb[1].mxu0 }
 0x1e5   :  { %v4756_v27 = vadd.f32 %v389_v23, %v387_v25 }
 0x1e7   :  { %v376_v29 = vpop.f32.mrb[2].mxu1  ;;  %v398_v30 = vsel %vm397_vm4, %v4756_v27, 0.0 }
 0x1e8   :  { %399 = vadd.xlane.f32.xlu0 %v398_v30  ;;  %v3739_v31 = vpop.f32.mrb[3].mxu1  ;;  %v384_v33 = vrot.slane %v376_v29, 4  ;;  %v537_v30 = vld [vmem:[#allocation2 + $0xe0] sm:$0xff] }
 0x1e9   :  { %v538_v31 = vld [vmem:[#allocation2 + $0xe8] sm:$0xff] }
 0x1eb   :  { %v296_v36 = vpop.f32.mrb[2].mxu0 }
 0x1ec   :  { %v388_v37 = vsel %vm386_vm3, %v296_v36, %v384_v33  ;;  %405 = vadd.xlane.f32.xlu0 %v404_v32  ;;  %v3734_v38 = vpop.f32.mrb[3].mxu0  ;;  %v539_v32 = vld [vmem:[#allocation2 + $0xf0] sm:$0xff]  ;;  %v4105_v36 = vpack.c.bf16 %v538_v31, %v537_v30  ;;  %v546_v30 = vld [vmem:[#allocation2 + $0x128] sm:$0xff]  ;;  %v545_v31 = vld [vmem:[#allocation2 + $0x120] sm:$0xff] }
 0x1ed   :  { %v4767_v39 = vadd.f32 %v390_v34, %v388_v37  ;;  %v540_v37 = vld [vmem:[#allocation2 + $0xf8] sm:$0xff] }
 0x1ee   :  { %4106 = vmatprep.subr.bf16.mxu0 %v4105_v36 }
 0x1ef   :  { %v401_v41 = vsel %vm397_vm4, %v4767_v39, 0.0  ;;  %4108 = vmatpush3.bf16.msra.mxu0 %v4105_v36 }
 0x1f0   :  { %408 = vadd.xlane.f32.xlu0 %v407_v40  ;;  %402 = vadd.xlane.f32.xlu1 %v401_v41  ;;  %v454_v40 = vld [vmem:[#allocation2 + $0xa8] sm:$0xff]  ;;  %v4109_v41 = vpack.c.bf16 %v540_v37, %v539_v32 }
 0x1f2   :  { %4110 = vmatprep.subr.bf16.mxu0 %v4109_v41 }
 0x1f3   :  { %4112 = vmatpush3.bf16.msra.mxu0 %v4109_v41 }
 0x275   :  { %v400_v42 = vpop.xlane.xlu0 %399 }
 0x276   :  { %v411_v63 = vmul.f32 0.03125, %v400_v42  ;;  %v541_v42 = vld [vmem:[#allocation2 + $0x100] sm:$0xff] }
 0x278   :  { %v4784_v0 = vsub.f32 %v4756_v27, %v411_v63 }
 0x279   :  { %v406_v43 = vpop.xlane.xlu0 %405 }
 0x27a   :  { %v413_v44 = vmul.f32 0.03125, %v406_v43  ;;  %v419_v1 = vmul.f32 %v4784_v0, %v4784_v0  ;;  %v542_v43 = vld [vmem:[#allocation2 + $0x108] sm:$0xff] }
 0x27c   :  { %v4774_v45 = vsub.f32 %v4758_v28, %v413_v44  ;;  %v423_v2 = vsel %vm397_vm4, %v419_v1, 0.0  ;;  %v461_v1 = vld [vmem:[#allocation2 + $0xc0] sm:$0xff] }
 0x27d   :  { %v403_v46 = vpop.xlane.xlu1 %402  ;;  %v409_v47 = vpop.xlane.xlu0 %408 }
 0x27e   :  { %v412_v48 = vmul.f32 0.03125, %v403_v46  ;;  %v414_v49 = vmul.f32 0.03125, %v409_v47  ;;  %v421_v50 = vmul.f32 %v4774_v45, %v4774_v45 }
 0x280   :  { %v416_v51 = vsub.f32 %v4767_v39, %v412_v48  ;;  %v418_v52 = vsub.f32 %v4764_v35, %v414_v49  ;;  %v429_v53 = vsel %vm397_vm4, %v421_v50, 0.0  ;;  %v4113_v48 = vpack.c.bf16 %v542_v43, %v541_v42  ;;  %v462_v50 = vld [vmem:[#allocation2 + $0xc8] sm:$0xff] }
 0x281   :  { %430 = vadd.xlane.f32.xlu1 %v429_v53 }
 0x282   :  { %v422_v54 = vmul.f32 %v418_v52, %v418_v52  ;;  %v420_v56 = vmul.f32 %v416_v51, %v416_v51  ;;  %4114 = vmatprep.subr.bf16.mxu0 %v4113_v48 }
 0x283   :  { %4116 = vmatpush3.bf16.msra.mxu0 %v4113_v48 }
 0x284   :  { %v432_v55 = vsel %vm397_vm4, %v422_v54, 0.0  ;;  %v426_v57 = vsel %vm397_vm4, %v420_v56, 0.0  ;;  %v451_v56 = vld [vmem:[#allocation2 + $0x90] sm:$0xff] }
 0x285   :  { %433 = vadd.xlane.f32.xlu0 %v432_v55 }
 0x289   :  { %427 = vadd.xlane.f32.xlu0 %v426_v57 }
 0x292   :  { %493 = vperm.xlu1 %4390, %v34_v59   ;;  %v459_v59 = vld [vmem:[#allocation2 + $0xb0] sm:$0xff] }
 0x29f   :  { %498 = vperm.xlu0 %4389, %v35_v61  }
 0x2a3   :  { %469 = vperm.xlu0 %4389, %v30_v58  }
 0x2a7   :  { %479 = vperm.xlu0 %4389, %v32_v62  }
 0x2b6   :  { %424 = vadd.xlane.f32.xlu1 %v423_v2 }
 0x2c7   :  { %503 = vperm.xlu1 %4390, %v36_v4  }
 0x2cb   :  { %508 = vperm.xlu1 %4390, %v37_v6  }
 0x2cf   :  { %474 = vperm.xlu1 %4390, %v31_v60   ;;  %v453_v60 = vld [vmem:[#allocation2 + $0xa0] sm:$0xff] }
 0x2d3   :  { %484 = vperm.xlu1 %4390, %v33_v5  }
 0x30e   :  { %v431_v24 = vpop.xlane.xlu1 %430 }
 0x30f   :  { %v437_v25 = vmul.f32 0.03125, %v431_v24 }
 0x311   :  { %v441_v33 = vadd.f32 1e-05, %v437_v25 }
 0x312   :  { %v434_v7 = vpop.xlane.xlu0 %433  ;;  %v4796_v29 = vpop.permute.xlu1 %493 }
 0x313   :  { %v438_v22 = vmul.f32 0.03125, %v434_v7 }
 0x315   :  { %v442_v23 = vadd.f32 1e-05, %v438_v22  ;;  %v543_v22 = vld [vmem:[#allocation2 + $0x110] sm:$0xff] }
 0x316   :  { %v428_v8 = vpop.xlane.xlu0 %427 }
 0x317   :  { %v436_v9 = vmul.f32 0.03125, %v428_v8 }
 0x319   :  { %v440_v10 = vadd.f32 1e-05, %v436_v9 }
 0x31b   :  { %4481 = vrsqrt.f32 %v440_v10 }
 0x31c   :  { %4483 = vrsqrt.f32 %v442_v23 }
 0x31d   :  { %4485 = vrsqrt.f32 %v441_v33 }
 0x31e   :  { %v4791_v20 = vpop.permute.xlu0 %498 }
 0x325   :  { %v4482_v14 = vpop.eup %4481 }
 0x326   :  { %v448_v16 = vmul.f32 %v4482_v14, %v416_v51  ;;  %v4484_v26 = vpop.eup %4483 }
 0x327   :  { %v450_v34 = vmul.f32 %v4484_v26, %v418_v52  ;;  %v4486_v54 = vpop.eup %4485 }
 0x328   :  { %v456_v18 = vmul.f32 %v452_v15, %v448_v16  ;;  %v449_v58 = vmul.f32 %v4486_v54, %v4774_v45 }
 0x329   :  { %v458_v47 = vmul.f32 %v454_v40, %v450_v34 }
 0x32a   :  { %v4789_v19 = vadd.f32 %v460_v17, %v456_v18  ;;  %v457_v63 = vmul.f32 %v453_v60, %v449_v58 }
 0x32b   :  { %v466_v51 = vadd.f32 %v462_v50, %v458_v47 }
 0x32c   :  { %v512_v21 = vmul.f32 %v4791_v20, %v4789_v19  ;;  %v465_v4 = vadd.f32 %v461_v1, %v457_v63  ;;  %v4876_v63 = vld [vmem:[#allocation2 + $0x38] sm:$0xff] }
 0x32e   :  { %521 = vrot.lane.b32.xlu1 %v512_v21, %s4685_s1 }
 0x343   :  { %v425_v38 = vpop.xlane.xlu1 %424 }
 0x344   :  { %v435_v44 = vmul.f32 0.03125, %v425_v38 }
 0x346   :  { %v439_v46 = vadd.f32 1e-05, %v435_v44 }
 0x347   :  { %v4798_v49 = vpop.permute.xlu1 %503 }
 0x348   :  { %4487 = vrsqrt.f32 %v439_v46  ;;  %v513_v5 = vmul.f32 %v4798_v49, %v465_v4 }
 0x34b   :  { %v4800_v52 = vpop.permute.xlu1 %508 }
 0x34c   :  { %v514_v53 = vmul.f32 %v4800_v52, %v466_v51 }
 0x34e   :  { %525 = vrot.lane.b32.xlu1 %v514_v53, %s4685_s1 }
 0x34f   :  { %v4810_v6 = vpop.permute.xlu1 %474 }
 0x350   :  { %v488_v10 = vmul.f32 %v4810_v6, %v4789_v19  ;;  %v544_v19 = vld [vmem:[#allocation2 + $0x118] sm:$0xff] }
 0x352   :  { %v4488_v55 = vpop.eup %4487 }
 0x353   :  { %v447_v57 = vmul.f32 %v4488_v55, %v4784_v0  ;;  %v4812_v0 = vpop.permute.xlu0 %469  ;;  %v4814_v45 = vpop.permute.xlu1 %484 }
 0x354   :  { %v490_v16 = vmul.f32 %v4814_v45, %v466_v51 }
 0x355   :  { %v455_v61 = vmul.f32 %v451_v56, %v447_v57  ;;  %v4869_v56 = vld [vmem:[#allocation2 + $0x30] sm:$0xff]  ;;  %v4871_v57 = vld [vmem:[#allocation2 + $0x28] sm:$0xff] }
 0x357   :  { %v463_v62 = vadd.f32 %v459_v59, %v455_v61  ;;  %v4816_v7 = vpop.permute.xlu0 %479 }
 0x358   :  { %v489_v15 = vmul.f32 %v4816_v7, %v465_v4  ;;  %v4879_v4 = vld [vmem:[#allocation2 + $0x40] sm:$0xff] }
 0x359   :  { %v511_v2 = vmul.f32 %v4796_v29, %v463_v62  ;;  %v487_v9 = vmul.f32 %v4812_v0, %v463_v62 }
 0x35b   :  { %519 = vrot.lane.b32.xlu0 %v511_v2, %s4685_s1 }
 0x35f   :  { %523 = vrot.lane.b32.xlu0 %v513_v5, %s4685_s1 }
 0x3a0   :  { %v522_v8 = vpop.permute.xlu1 %521 }
 0x3a1   :  { %v532_v13 = vsel %vm397_vm4, %v488_v10, %v522_v8 }
 0x3c0   :  { %v526_v14 = vpop.permute.xlu1 %525 }
 0x3c1   :  { %v534_v21 = vsel %vm397_vm4, %v490_v16, %v526_v14 }
 0x3cd   :  { %v520_v11 = vpop.permute.xlu0 %519 }
 0x3ce   :  { %v531_v12 = vsel %vm397_vm4, %v487_v9, %v520_v11 }
 0x3cf   :  { %3756 = vmatprep.mubr.msk.f32.mxu0 %vm547_vm5, %v531_v12 }
 0x3d0   :  { %3757 = vmatmul.mubr.msk.f32.vlgmr.msra.gmra.mrb[4].mxu0 %vm547_vm5, %v532_v13 }
 0x3d1   :  { %v524_v17 = vpop.permute.xlu0 %523 }
 0x3d2   :  { %v533_v18 = vsel %vm397_vm4, %v489_v15, %v524_v17 }
 0x3d3   :  { %3759 = vmatprep.mubr.msk.f32.mxu0 %vm547_vm5, %v533_v18 }
 0x3d4   :  { %3760 = vmatmul.mubr.msk.f32.gmra.mrb[6].mxu0 %vm547_vm5, %v534_v21 }
 0x4a3   :  { %v3758_v23 = vpop.f32.mrb[4].mxu0 }
 0x4a4   :  { %v632_v24 = vadd.f32 %v3758_v23, %v544_v19  ;;  %v626_v25 = vpop.f32.mrb[5].mxu0 }
 0x4a5   :  { %v627_v26 = vadd.f32 %v626_v25, %v543_v22 }
 0x4a6   :  { %v4857_v53 = vmul.f32 0.25, %v632_v24 }
 0x4a7   :  { %v3761_v32 = vpop.f32.mrb[6].mxu0  ;;  %v4831_v33 = vpack.i.bf16 %v632_v24, %v627_v26  ;;  %v4833_v34 = vmul.f32 0.25, %v627_v26 }
 0x4a8   :  { %v642_v36 = vadd.f32 %v3761_v32, %v546_v30  ;;  %v636_v37 = vpop.f32.mrb[7].mxu0 }
 0x4a9   :  { %v637_v38 = vadd.f32 %v636_v37, %v545_v31  ;;  %4392 = vrot.lane.b32.xlu0 %v4831_v33, %s4686_s8  ;;  %3770 = vmatprep.mubr.msk.f32.mxu1 %vm661_vm6, %v4833_v34 }
 0x4aa   :  { %v4865_v55 = vmul.f32 0.25, %v642_v36 }
 0x4ab   :  { %v4839_v40 = vpack.i.bf16 %v642_v36, %v637_v38  ;;  %v4859_v54 = vmul.f32 0.25, %v637_v38 }
 0x4ad   :  { %4397 = vrot.lane.b32.xlu1 %v4839_v40, %s4686_s8 }
 0x51b   :  { %v4393_v41 = vpop.permute.xlu0 %4392 }
 0x51c   :  { %v4395_v42 = vunpack.i.h.bf16 %v4393_v41  ;;  %v4394_v43 = vunpack.i.l.bf16 %v4393_v41 }
 0x51e   :  { %v4117_v46 = vpack.c.bf16 %v4395_v42, %v4394_v43 }
 0x51f   :  { %v4398_v47 = vpop.permute.xlu1 %4397 }
 0x520   :  { %v4400_v48 = vunpack.i.h.bf16 %v4398_v47  ;;  %v4399_v50 = vunpack.i.l.bf16 %v4398_v47  ;;  %4119 = vmatprep.subr.msk.bf16.mxu1 %vm4845_vm7, %v4117_v46 }
 0x521   :  { %4122 = vmatpush3.bf16.xpose.msk.msra.mxu1 %vm4845_vm7, %v4117_v46 }
 0x522   :  { %v4123_v51 = vpack.c.bf16 %v4400_v48, %v4399_v50 }
 0x524   :  { %4125 = vmatprep.subr.msk.bf16.mxu1 %vm4845_vm7, %v4123_v51 }
 0x529   :  { %4128 = vmatpush3.bf16.xpose.msk.msra.mxu1 %vm4845_vm7, %v4123_v51 }
 0x530   :  { %3771 = vmatmul.mubr.msk.f32.vlgmr.msra.gmra.mrb[4].mxu1 %vm661_vm6, %v4857_v53 }
 0x531   :  { %3773 = vmatprep.mubr.msk.f32.mxu1 %vm661_vm6, %v4859_v54 }
 0x534   :  { %3774 = vmatmul.mubr.msk.f32.gmra.mrb[6].mxu1 %vm661_vm6, %v4865_v55 }
 0x603   :  { %v3772_v58 = vpop.f32.mrb[4].mxu1 }
 0x604   :  { %v754_v59 = vadd.f32 %v3772_v58, %v4869_v56  ;;  %v748_v60 = vpop.f32.mrb[5].mxu1 }
 0x605   :  { %v749_v61 = vadd.f32 %v748_v60, %v4871_v57 }
 0x606   :  { %v770_v62 = vsel %vm397_vm4, %v754_v59, -inf }
 0x607   :  { %771 = vmax.xlane.f32.xlu1 %v770_v62  ;;  %v3775_v1 = vpop.f32.mrb[6].mxu1  ;;  %v767_v2 = vsel %vm397_vm4, %v749_v61, -inf }
 0x608   :  { %768 = vmax.xlane.f32.xlu0 %v767_v2  ;;  %v758_v5 = vpop.f32.mrb[7].mxu1  ;;  %v764_v9 = vadd.f32 %v3775_v1, %v4879_v4 }
 0x609   :  { %v759_v8 = vadd.f32 %v758_v5, %v4876_v63 }
 0x60a   :  { %v776_v11 = vsel %vm397_vm4, %v764_v9, -inf }
 0x60b   :  { %v773_v10 = vsel %vm397_vm4, %v759_v8, -inf }
 0x60c   :  { %774 = vmax.xlane.f32.xlu0 %v773_v10 }
 0x610   :  { %777 = vmax.xlane.f32.xlu0 %v776_v11 }
 0x618   :  { %4402 = vrot.lane.b32.xlu1 %v4831_v33, %s4687_s9 }
 0x61c   :  { %4412 = vrot.lane.b32.xlu1 %v4831_v33, %s4688_s10 }
 0x694   :  { %v772_v12 = vpop.xlane.xlu1 %771 }
 0x695   :  { %v780_v13 = vsub.f32 %v754_v59, %v772_v12  ;;  %v769_v14 = vpop.xlane.xlu0 %768 }
 0x696   :  { %v779_v15 = vsub.f32 %v749_v61, %v769_v14 }
 0x697   :  { %v785_v16 = vmul.f32 1.442695, %v780_v13 }
 0x698   :  { %v783_v17 = vmul.f32 1.442695, %v779_v15  ;;  %v4403_v18 = vpop.permute.xlu1 %4402 }
 0x699   :  { %4489 = vpow2.f32 %v785_v16  ;;  %v4405_v21 = vunpack.i.h.bf16 %v4403_v18  ;;  %v4404_v19 = vunpack.i.l.bf16 %v4403_v18  ;;  %v775_v30 = vpop.xlane.xlu0 %774 }
 0x69a   :  { %4491 = vpow2.f32 %v783_v17  ;;  %v781_v36 = vsub.f32 %v759_v8, %v775_v30 }
 0x69b   :  { %v4129_v22 = vpack.c.bf16 %v4405_v21, %v4404_v19 }
 0x69c   :  { %v787_v38 = vmul.f32 1.442695, %v781_v36  ;;  %v4413_v47 = vpop.permute.xlu1 %4412 }
 0x69d   :  { %4130 = vmatprep.subr.bf16.mxu1 %v4129_v22  ;;  %v778_v31 = vpop.xlane.xlu0 %777  ;;  %v4415_v58 = vunpack.i.h.bf16 %v4413_v47  ;;  %v4414_v59 = vunpack.i.l.bf16 %v4413_v47 }
 0x69e   :  { %4132 = vmatpush3.bf16.msra.mxu1 %v4129_v22  ;;  %v782_v32 = vsub.f32 %v764_v9, %v778_v31 }
 0x69f   :  { %v4137_v62 = vpack.c.bf16 %v4415_v58, %v4414_v59 }
 0x6a0   :  { %v789_v37 = vmul.f32 1.442695, %v782_v32 }
 0x6a2   :  { %4493 = vpow2.f32 %v789_v37 }
 0x6a3   :  { %v4490_v23 = vpop.eup %4489  ;;  %4495 = vpow2.f32 %v787_v38 }
 0x6a4   :  { %v4492_v24 = vpop.eup %4491  ;;  %v794_v25 = vsel %vm397_vm4, %v4490_v23, 0.0 }
 0x6a5   :  { %795 = vadd.xlane.f32.xlu0 %v794_v25  ;;  %v791_v26 = vsel %vm397_vm4, %v4492_v24, 0.0 }
 0x6a6   :  { %792 = vadd.xlane.f32.xlu1 %v791_v26 }
 0x6ac   :  { %v4494_v41 = vpop.eup %4493 }
 0x6ad   :  { %v4496_v42 = vpop.eup %4495  ;;  %v800_v43 = vsel %vm397_vm4, %v4494_v41, 0.0 }
 0x6ae   :  { %v797_v46 = vsel %vm397_vm4, %v4496_v42, 0.0 }
 0x6b7   :  { %4417 = vrot.lane.b32.xlu1 %v4839_v40, %s4688_s10 }
 0x6bb   :  { %4407 = vrot.lane.b32.xlu0 %v4839_v40, %s4687_s9 }
 0x6da   :  { %801 = vadd.xlane.f32.xlu0 %v800_v43 }
 0x6db   :  { %798 = vadd.xlane.f32.xlu1 %v797_v46 }
 0x6ec   :  { %926 = vrot.lane.b32.xlu1 %v4857_v53, %s4689_s11 }
 0x6f0   :  { %930 = vrot.lane.b32.xlu1 %v4865_v55, %s4689_s11  ;;  %924 = vrot.lane.b32.xlu0 %v4833_v34, %s4689_s11 }
 0x6f4   :  { %928 = vrot.lane.b32.xlu0 %v4859_v54, %s4689_s11 }
 0x732   :  { %v796_v48 = vpop.xlane.xlu0 %795 }
 0x733   :  { %4497 = vrcp.f32 %v796_v48  ;;  %v793_v50 = vpop.xlane.xlu1 %792 }
 0x734   :  { %4499 = vrcp.f32 %v793_v50 }
 0x736   :  { %v4408_v51 = vpop.permute.xlu0 %4407 }
 0x737   :  { %v4410_v60 = vunpack.i.h.bf16 %v4408_v51  ;;  %v4409_v61 = vunpack.i.l.bf16 %v4408_v51  ;;  %v4418_v1 = vpop.permute.xlu1 %4417 }
 0x738   :  { %v4420_v5 = vunpack.i.h.bf16 %v4418_v1  ;;  %v4419_v8 = vunpack.i.l.bf16 %v4418_v1 }
 0x739   :  { %v4133_v53 = vpack.c.bf16 %v4410_v60, %v4409_v61 }
 0x73a   :  { %v4143_v9 = vpack.c.bf16 %v4420_v5, %v4419_v8 }
 0x73b   :  { %4134 = vmatprep.subr.bf16.mxu1 %v4133_v53 }
 0x73c   :  { %4136 = vmatpush3.bf16.msra.mxu1 %v4133_v53 }
 0x73d   :  { %v4498_v55 = vpop.eup %4497  ;;  %4139 = vmatprep.subr.msk.bf16.mxu1 %vm4845_vm7, %v4137_v62 }
 0x73e   :  { %v4500_v34 = vpop.eup %4499  ;;  %v806_v54 = vmul.f32 %v4498_v55, %v4490_v23 }
 0x73f   :  { %v804_v2 = vmul.f32 %v4500_v34, %v4492_v24 }
 0x740   :  { %812 = vst.msk [vmem:[%s5498_s4 + $0x8] sm:$0xff] %vm397_vm4, %v806_v54 }
 0x741   :  { %3784 = vmatprep.mubr.msk.f32.mxu1 %vm397_vm4, %v804_v2  ;;  %811 = vst.msk [vmem:[%s5498_s4] sm:$0xff] %vm397_vm4, %v804_v2 }
 0x742   :  { %3785 = vmatmul.mubr.msk.f32.vlgmr.msra.gmra.mrb[8].mxu1 %vm397_vm4, %v806_v54 }
 0x745   :  { %4142 = vmatpush3.bf16.xpose.msk.msra.mxu1 %vm4845_vm7, %v4137_v62 }
 0x746   :  { %4145 = vmatprep.subr.msk.bf16.mxu1 %vm4845_vm7, %v4143_v9 }
 0x74d   :  { %4148 = vmatpush3.bf16.xpose.msk.msra.mxu1 %vm4845_vm7, %v4143_v9 }
 0x767   :  { %v802_v10 = vpop.xlane.xlu0 %801 }
 0x768   :  { %4501 = vrcp.f32 %v802_v10  ;;  %v799_v11 = vpop.xlane.xlu1 %798 }
 0x769   :  { %4503 = vrcp.f32 %v799_v11 }
 0x76b   :  { %v925_v16 = vpop.permute.xlu0 %924 }
 0x76c   :  { %v927_v17 = vpop.permute.xlu1 %926 }
 0x76f   :  { %v929_v18 = vpop.permute.xlu0 %928 }
 0x770   :  { %v931_v21 = vpop.permute.xlu1 %930 }
 0x772   :  { %v4502_v12 = vpop.eup %4501 }
 0x773   :  { %v4504_v13 = vpop.eup %4503  ;;  %v810_v14 = vmul.f32 %v4502_v12, %v4494_v41 }
 0x774   :  { %v808_v15 = vmul.f32 %v4504_v13, %v4496_v42 }
 0x775   :  { %814 = vst.msk [vmem:[%s5498_s4 + $0x18] sm:$0xff] %vm397_vm4, %v810_v14 }
 0x776   :  { %3787 = vmatprep.mubr.msk.f32.mxu1 %vm397_vm4, %v808_v15  ;;  %813 = vst.msk [vmem:[%s5498_s4 + $0x10] sm:$0xff] %vm397_vm4, %v808_v15 }
 0x777   :  { %3788 = vmatmul.mubr.msk.f32.gmra.mrb[10].mxu1 %vm397_vm4, %v810_v14 }
 0x778   :  { %3798 = vmatprep.mubr.msk.f32.mxu1 %vm661_vm6, %v925_v16 }
 0x77b   :  { %3799 = vmatmul.mubr.msk.f32.vlgmr.msra.gmra.mrb[12].mxu1 %vm661_vm6, %v927_v17 }
 0x77c   :  { %3801 = vmatprep.mubr.msk.f32.mxu1 %vm661_vm6, %v929_v18 }
 0x77f   :  { %3802 = vmatmul.mubr.msk.f32.gmra.mrb[14].mxu1 %vm661_vm6, %v931_v21 }
 0x815   :  { %v4937_v19 = vpop.f32.mrb[8].mxu1 }
 0x816   :  { %v4939_v22 = vpop.f32.mrb[9].mxu1 }
 0x84a   :  { %v4941_v23 = vpop.f32.mrb[10].mxu1 }
 0x84b   :  { %v4943_v24 = vpop.f32.mrb[11].mxu1 }
 0x84e   :  { %v3800_v25 = vpop.f32.mrb[12].mxu1 }
 0x84f   :  { %v1028_v26 = vadd.f32 %v3800_v25, %v4869_v56  ;;  %v1022_v30 = vpop.f32.mrb[13].mxu1 }
 0x850   :  { %v1023_v31 = vadd.f32 %v1022_v30, %v4871_v57 }
 0x851   :  { %v1044_v32 = vsel %vm397_vm4, %v1028_v26, -inf }
 0x852   :  { %1045 = vmax.xlane.f32.xlu1 %v1044_v32  ;;  %v3803_v36 = vpop.f32.mrb[14].mxu1  ;;  %v1041_v37 = vsel %vm397_vm4, %v1023_v31, -inf }
 0x853   :  { %v1032_v38 = vpop.f32.mrb[15].mxu1  ;;  %1042 = vmax.xlane.f32.xlu0 %v1041_v37  ;;  %v1038_v42 = vadd.f32 %v3803_v36, %v4879_v4 }
 0x854   :  { %v1033_v41 = vadd.f32 %v1032_v38, %v4876_v63  ;;  %v1259_v38 = vld [vmem:[#allocation2 + $0x130] sm:$0xff] }
 0x855   :  { %v1050_v56 = vsel %vm397_vm4, %v1038_v42, -inf }
 0x856   :  { %v1047_v43 = vsel %vm397_vm4, %v1033_v41, -inf }
 0x857   :  { %1048 = vmax.xlane.f32.xlu0 %v1047_v43 }
 0x85b   :  { %1051 = vmax.xlane.f32.xlu0 %v1050_v56 }
 0x8df   :  { %v1046_v46 = vpop.xlane.xlu1 %1045 }
 0x8e0   :  { %v1054_v57 = vsub.f32 %v1028_v26, %v1046_v46  ;;  %v1043_v47 = vpop.xlane.xlu0 %1042  ;;  %v1262_v46 = vld [vmem:[#allocation2 + $0x148] sm:$0xff] }
 0x8e1   :  { %v1053_v48 = vsub.f32 %v1023_v31, %v1043_v47  ;;  %v1263_v47 = vld [vmem:[#allocation2 + $0x150] sm:$0xff] }
 0x8e2   :  { %v1059_v50 = vmul.f32 1.442695, %v1054_v57 }
 0x8e3   :  { %v1057_v51 = vmul.f32 1.442695, %v1053_v48  ;;  %v1264_v48 = vld [vmem:[#allocation2 + $0x158] sm:$0xff] }
 0x8e4   :  { %4505 = vpow2.f32 %v1059_v50  ;;  %v1049_v58 = vpop.xlane.xlu0 %1048 }
 0x8e5   :  { %4507 = vpow2.f32 %v1057_v51  ;;  %v1055_v59 = vsub.f32 %v1033_v41, %v1049_v58  ;;  %v1260_v41 = vld [vmem:[#allocation2 + $0x138] sm:$0xff]  ;;  %v4165_v58 = vpack.c.bf16 %v1264_v48, %v1263_v47 }
 0x8e6   :  { %v4157_v56 = vpack.c.bf16 %v1260_v41, %v1259_v38  ;;  %v1270_v38 = vld [vmem:[#allocation2 + $0x188] sm:$0xff]  ;;  %v1269_v41 = vld [vmem:[#allocation2 + $0x180] sm:$0xff] }
 0x8e7   :  { %v1061_v60 = vmul.f32 1.442695, %v1055_v59  ;;  %v1265_v59 = vld [vmem:[#allocation2 + $0x160] sm:$0xff] }
 0x8e8   :  { %v1052_v63 = vpop.xlane.xlu0 %1051 }
 0x8e9   :  { %4509 = vpow2.f32 %v1061_v60  ;;  %v1056_v4 = vsub.f32 %v1038_v42, %v1052_v63  ;;  %v1261_v42 = vld [vmem:[#allocation2 + $0x140] sm:$0xff]  ;;  %v1266_v60 = vld [vmem:[#allocation2 + $0x168] sm:$0xff] }
 0x8ea   :  { %v4161_v57 = vpack.c.bf16 %v1262_v46, %v1261_v42  ;;  %v4169_v63 = vpack.c.bf16 %v1266_v60, %v1265_v59 }
 0x8eb   :  { %v1063_v61 = vmul.f32 1.442695, %v1056_v4 }
 0x8ed   :  { %4511 = vpow2.f32 %v1063_v61 }
 0x8ee   :  { %v4506_v53 = vpop.eup %4505 }
 0x8ef   :  { %v4508_v62 = vpop.eup %4507  ;;  %v1068_v55 = vsel %vm397_vm4, %v4506_v53, 0.0 }
 0x8f0   :  { %1069 = vadd.xlane.f32.xlu0 %v1068_v55  ;;  %v1065_v1 = vsel %vm397_vm4, %v4508_v62, 0.0 }
 0x8f1   :  { %1066 = vadd.xlane.f32.xlu1 %v1065_v1 }
 0x8f3   :  { %v4510_v34 = vpop.eup %4509 }
 0x8f4   :  { %v1071_v54 = vsel %vm397_vm4, %v4510_v34, 0.0 }
 0x8f5   :  { %1072 = vadd.xlane.f32.xlu1 %v1071_v54 }
 0x8f7   :  { %v4512_v2 = vpop.eup %4511 }
 0x8f8   :  { %v1074_v5 = vsel %vm397_vm4, %v4512_v2, 0.0 }
 0x8f9   :  { %1075 = vadd.xlane.f32.xlu0 %v1074_v5 }
 0x906   :  { %4422 = vrot.lane.b32.xlu1 %v4831_v33, %s4690_s20 }
 0x90f   :  { %4427 = vrot.lane.b32.xlu0 %v4839_v40, %s4690_s20  ;;  %s4625_s20 = scalar_lea.vmem %s3415_s19, 32 }
 0x910   :  { %p4626_p8 = scmp.ne.s32.totalorder %s3415_s19, %s4625_s20  ;;  %p4631_p10 = scmp.lt.s32.totalorder %s4625_s20, %s4625_s20 }
 0x912   :  { %p4632_p11 = por %p4631_p10, %p4630_p9 }
 0x914   :  { %p4633_p12 = pnand %p4632_p11, %p4626_p8 }
 0x97d   :  { %v1070_v9 = vpop.xlane.xlu0 %1069 }
 0x97e   :  { %v1067_v8 = vpop.xlane.xlu1 %1066 }
 0x97f   :  { %4513 = vrcp.f32 %v1067_v8 }
 0x980   :  { %4515 = vrcp.f32 %v1070_v9 }
 0x982   :  { %v1073_v10 = vpop.xlane.xlu1 %1072 }
 0x983   :  { %4517 = vrcp.f32 %v1073_v10 }
 0x986   :  { %v4423_v11 = vpop.permute.xlu1 %4422  ;;  %v1076_v12 = vpop.xlane.xlu0 %1075 }
 0x987   :  { %v4425_v13 = vunpack.i.h.bf16 %v4423_v11  ;;  %v4424_v14 = vunpack.i.l.bf16 %v4423_v11  ;;  %4519 = vrcp.f32 %v1076_v12 }
 0x989   :  { %v4514_v15 = vpop.eup %4513  ;;  %v4149_v16 = vpack.c.bf16 %v4425_v13, %v4424_v14 }
 0x98a   :  { %v4428_v17 = vpop.permute.xlu0 %4427  ;;  %v4959_v18 = vmul.f32 %v4514_v15, %v4508_v62  ;;  %v4516_v25 = vpop.eup %4515 }
 0x98b   :  { %v4430_v21 = vunpack.i.h.bf16 %v4428_v17  ;;  %v4429_v33 = vunpack.i.l.bf16 %v4428_v17  ;;  %4150 = vmatprep.subr.bf16.mxu0 %v4149_v16  ;;  %v4963_v30 = vmul.f32 %v4516_v25, %v4506_v53 }
 0x98c   :  { %4152 = vmatpush3.bf16.msra.mxu0 %v4149_v16  ;;  %3812 = vmatprep.mubr.msk.f32.mxu0 %vm397_vm4, %v4959_v18 }
 0x98d   :  { %v4153_v40 = vpack.c.bf16 %v4430_v21, %v4429_v33  ;;  %v4518_v26 = vpop.eup %4517  ;;  %v1268_v21 = vld [vmem:[#allocation2 + $0x178] sm:$0xff]  ;;  %v1267_v33 = vld [vmem:[#allocation2 + $0x170] sm:$0xff] }
 0x98e   :  { %v4965_v32 = vmul.f32 %v4518_v26, %v4510_v34 }
 0x98f   :  { %4154 = vmatprep.subr.bf16.mxu0 %v4153_v40 }
 0x990   :  { %4156 = vmatpush3.bf16.msra.mxu0 %v4153_v40 }
 0x991   :  { %v4520_v31 = vpop.eup %4519  ;;  %4158 = vmatprep.subr.bf16.mxu0 %v4157_v56 }
 0x992   :  { %v4971_v36 = vmul.f32 %v4520_v31, %v4512_v2 }
 0x993   :  { %3813 = vmatmul.mubr.msk.f32.vlgmr.msra.gmra.mrb[8].mxu0 %vm397_vm4, %v4963_v30 }
 0x994   :  { %3815 = vmatprep.mubr.msk.f32.mxu0 %vm397_vm4, %v4965_v32  ;;  %4160 = vmatpush3.bf16.msra.mxu0 %v4157_v56 }
 0x995   :  { %4162 = vmatprep.subr.bf16.mxu0 %v4161_v57 }
 0x997   :  { %3816 = vmatmul.mubr.msk.f32.gmra.mrb[10].mxu0 %vm397_vm4, %v4971_v36 }
 0x998   :  { %4164 = vmatpush3.bf16.msra.mxu0 %v4161_v57 }
 0x999   :  { %4166 = vmatprep.subr.bf16.mxu0 %v4165_v58 }
 0x99c   :  { %4168 = vmatpush3.bf16.msra.mxu0 %v4165_v58 }
 0x99d   :  { %4170 = vmatprep.subr.bf16.mxu0 %v4169_v63 }
 0x9a0   :  { %4172 = vmatpush3.bf16.msra.mxu0 %v4169_v63 }
 0xa66   :  { %v3814_v37 = vpop.f32.mrb[8].mxu0 }
 0xa67   :  { %v1192_v43 = vpop.f32.mrb[9].mxu0 }
 0xa68   :  { %1215 = vrot.lane.b32.xlu1 %v1192_v43, %s4691_s21 }
 0xa6a   :  { %v3817_v50 = vpop.f32.mrb[10].mxu0 }
 0xa6b   :  { %v1202_v51 = vpop.f32.mrb[11].mxu0 }
 0xa6c   :  { %1217 = vrot.lane.b32.xlu1 %v3814_v37, %s4691_s21  ;;  %1219 = vrot.lane.b32.xlu0 %v1202_v51, %s4691_s21 }
 0xa70   :  { %1221 = vrot.lane.b32.xlu1 %v3817_v50, %s4691_s21 }
 0xada   :  { %v1216_v4 = vpop.permute.xlu1 %1215 }
 0xadb   :  { %v1227_v61 = vsel %vm661_vm6, %v4939_v22, %v1216_v4 }
 0xadc   :  { %v1235_v53 = vmul.f32 %v1227_v61, %v4796_v29 }
 0xade   :  { %v1218_v62 = vpop.permute.xlu1 %1217  ;;  %1243 = vrot.lane.b32.xlu0 %v1235_v53, %s4685_s1  ;;  %v1220_v55 = vpop.permute.xlu0 %1219 }
 0xadf   :  { %v1228_v1 = vsel %vm661_vm6, %v4937_v19, %v1218_v62  ;;  %v1229_v34 = vsel %vm661_vm6, %v4943_v24, %v1220_v55  ;;  %v1231_v19 = vmul.f32 %v1227_v61, %v4812_v0 }
 0xae0   :  { %v1236_v54 = vmul.f32 %v1228_v1, %v4791_v20  ;;  %v1237_v2 = vmul.f32 %v1229_v34, %v4798_v49  ;;  %v1232_v10 = vmul.f32 %v1228_v1, %v4810_v6  ;;  %v1233_v11 = vmul.f32 %v1229_v34, %v4816_v7 }
 0xae2   :  { %1245 = vrot.lane.b32.xlu1 %v1236_v54, %s4685_s1  ;;  %v1222_v5 = vpop.permute.xlu1 %1221  ;;  %1247 = vrot.lane.b32.xlu0 %v1237_v2, %s4685_s1 }
 0xae3   :  { %v1230_v22 = vsel %vm661_vm6, %v4941_v23, %v1222_v5 }
 0xae4   :  { %v1238_v8 = vmul.f32 %v1230_v22, %v4800_v52  ;;  %v1234_v15 = vmul.f32 %v1230_v22, %v4814_v45 }
 0xae6   :  { %1249 = vrot.lane.b32.xlu1 %v1238_v8, %s4685_s1 }
 0xb50   :  { %v1244_v9 = vpop.permute.xlu0 %1243 }
 0xb51   :  { %v1255_v24 = vsel %vm397_vm4, %v1231_v19, %v1244_v9 }
 0xb52   :  { %3834 = vmatprep.mubr.msk.f32.mxu0 %vm547_vm5, %v1255_v24  ;;  %v1468_v24 = vld [vmem:[#allocation2 + $0x1d0] sm:$0xff] }
 0xb54   :  { %v1246_v12 = vpop.permute.xlu1 %1245  ;;  %v1248_v13 = vpop.permute.xlu0 %1247 }
 0xb55   :  { %v1256_v14 = vsel %vm397_vm4, %v1232_v10, %v1246_v12  ;;  %v1257_v23 = vsel %vm397_vm4, %v1233_v11, %v1248_v13  ;;  %v1469_v10 = vld [vmem:[#allocation2 + $0x1d8] sm:$0xff]  ;;  %v1470_v11 = vld [vmem:[#allocation2 + $0x1e0] sm:$0xff]  ;;  %v1471_v13 = vld [vmem:[#allocation2 + $0x1e8] sm:$0xff] }
 0xb56   :  { %3835 = vmatmul.mubr.msk.f32.vlgmr.msra.gmra.mrb[12].mxu0 %vm547_vm5, %v1256_v14  ;;  %v4173_v12 = vpack.c.bf16 %v1469_v10, %v1468_v24  ;;  %v4177_v14 = vpack.c.bf16 %v1471_v13, %v1470_v11 }
 0xb57   :  { %3837 = vmatprep.mubr.msk.f32.mxu0 %vm547_vm5, %v1257_v23  ;;  %v1472_v23 = vld [vmem:[#allocation2 + $0x1f0] sm:$0xff] }
 0xb58   :  { %v1250_v16 = vpop.permute.xlu1 %1249  ;;  %4174 = vmatprep.subr.bf16.mxu1 %v4173_v12 }
 0xb59   :  { %v1258_v17 = vsel %vm397_vm4, %v1234_v15, %v1250_v16  ;;  %v1473_v15 = vld [vmem:[#allocation2 + $0x1f8] sm:$0xff]  ;;  %4176 = vmatpush3.bf16.msra.mxu1 %v4173_v12  ;;  %v1435_v12 = vld [vmem:[#allocation2 + $0x1c8] sm:$0xff] }
 0xb5a   :  { %3838 = vmatmul.mubr.msk.f32.gmra.mrb[14].mxu0 %vm547_vm5, %v1258_v17  ;;  %4178 = vmatprep.subr.bf16.mxu1 %v4177_v14  ;;  %v4181_v16 = vpack.c.bf16 %v1473_v15, %v1472_v23  ;;  %v1474_v17 = vld [vmem:[#allocation2 + $0x200] sm:$0xff] }
 0xb5d   :  { %4180 = vmatpush3.bf16.msra.mxu1 %v4177_v14 }
 0xb5e   :  { %4182 = vmatprep.subr.bf16.mxu1 %v4181_v16 }
 0xb61   :  { %4184 = vmatpush3.bf16.msra.mxu1 %v4181_v16 }
 0xc29   :  { %v3836_v40 = vpop.f32.mrb[12].mxu0 }
 0xc2a   :  { %v1355_v25 = vadd.f32 %v3836_v40, %v1268_v21  ;;  %v1349_v26 = vpop.f32.mrb[13].mxu0  ;;  %v1475_v21 = vld [vmem:[#allocation2 + $0x208] sm:$0xff] }
 0xc2b   :  { %v1350_v31 = vadd.f32 %v1349_v26, %v1267_v33  ;;  %v4185_v33 = vpack.c.bf16 %v1475_v21, %v1474_v17 }
 0xc2c   :  { %v5008_v37 = vadd.f32 %v1355_v25, %v4767_v39 }
 0xc2d   :  { %v5011_v42 = vadd.f32 %v1350_v31, %v4756_v27  ;;  %v3839_v43 = vpop.f32.mrb[14].mxu0  ;;  %4186 = vmatprep.subr.bf16.mxu1 %v4185_v33 }
 0xc2e   :  { %v1359_v56 = vpop.f32.mrb[15].mxu0  ;;  %v1375_v46 = vsel %vm397_vm4, %v5008_v37, 0.0  ;;  %v1365_v57 = vadd.f32 %v3839_v43, %v1270_v38  ;;  %4188 = vmatpush3.bf16.msra.mxu1 %v4185_v33 }
 0xc2f   :  { %v1360_v47 = vadd.f32 %v1359_v56, %v1269_v41  ;;  %1376 = vadd.xlane.f32.xlu1 %v1375_v46  ;;  %v1372_v48 = vsel %vm397_vm4, %v5011_v42, 0.0 }
 0xc30   :  { %1373 = vadd.xlane.f32.xlu0 %v1372_v48  ;;  %v5021_v50 = vadd.f32 %v1365_v57, %v4764_v35 }
 0xc31   :  { %v5018_v39 = vadd.f32 %v1360_v47, %v4758_v28 }
 0xc32   :  { %v1381_v51 = vsel %vm397_vm4, %v5021_v50, 0.0 }
 0xc33   :  { %v1378_v27 = vsel %vm397_vm4, %v5018_v39, 0.0 }
 0xc34   :  { %1379 = vadd.xlane.f32.xlu0 %v1378_v27 }
 0xc38   :  { %1382 = vadd.xlane.f32.xlu0 %v1381_v51  ;;  %v1425_v51 = vld [vmem:[#allocation2 + $0x198] sm:$0xff] }
 0xcbc   :  { %v1377_v58 = vpop.xlane.xlu1 %1376 }
 0xcbd   :  { %v1385_v59 = vmul.f32 0.03125, %v1377_v58  ;;  %v1374_v60 = vpop.xlane.xlu0 %1373 }
 0xcbe   :  { %v1384_v63 = vmul.f32 0.03125, %v1374_v60  ;;  %v1424_v60 = vld [vmem:[#allocation2 + $0x190] sm:$0xff] }
 0xcbf   :  { %v1389_v4 = vsub.f32 %v5008_v37, %v1385_v59 }
 0xcc0   :  { %v1388_v28 = vsub.f32 %v5011_v42, %v1384_v63  ;;  %v1433_v63 = vld [vmem:[#allocation2 + $0x1b8] sm:$0xff] }
 0xcc1   :  { %v1380_v61 = vpop.xlane.xlu0 %1379  ;;  %v1393_v53 = vmul.f32 %v1389_v4, %v1389_v4 }
 0xcc2   :  { %v1386_v35 = vmul.f32 0.03125, %v1380_v61  ;;  %v1392_v62 = vmul.f32 %v1388_v28, %v1388_v28 }
 0xcc3   :  { %v1399_v55 = vsel %vm397_vm4, %v1393_v53, 0.0 }
 0xcc4   :  { %v5031_v1 = vsub.f32 %v5018_v39, %v1386_v35  ;;  %1400 = vadd.xlane.f32.xlu0 %v1399_v55  ;;  %v1396_v34 = vsel %vm397_vm4, %v1392_v62, 0.0  ;;  %v1432_v35 = vld [vmem:[#allocation2 + $0x1b0] sm:$0xff] }
 0xcc5   :  { %1397 = vadd.xlane.f32.xlu1 %v1396_v34  ;;  %v1383_v54 = vpop.xlane.xlu0 %1382 }
 0xcc6   :  { %v1387_v2 = vmul.f32 0.03125, %v1383_v54  ;;  %v1394_v5 = vmul.f32 %v5031_v1, %v5031_v1  ;;  %v1426_v54 = vld [vmem:[#allocation2 + $0x1a0] sm:$0xff] }
 0xcc8   :  { %v5037_v22 = vsub.f32 %v5021_v50, %v1387_v2  ;;  %v1402_v8 = vsel %vm397_vm4, %v1394_v5, 0.0 }
 0xcc9   :  { %1403 = vadd.xlane.f32.xlu1 %v1402_v8 }
 0xcca   :  { %v1395_v19 = vmul.f32 %v5037_v22, %v5037_v22 }
 0xccc   :  { %v1405_v9 = vsel %vm397_vm4, %v1395_v19, 0.0  ;;  %v1434_v19 = vld [vmem:[#allocation2 + $0x1c0] sm:$0xff] }
 0xccd   :  { %1406 = vadd.xlane.f32.xlu0 %v1405_v9 }
 0xd51   :  { %v1401_v40 = vpop.xlane.xlu0 %1400 }
 0xd52   :  { %v1409_v25 = vmul.f32 0.03125, %v1401_v40  ;;  %v1398_v26 = vpop.xlane.xlu1 %1397 }
 0xd53   :  { %v1408_v31 = vmul.f32 0.03125, %v1398_v26 }
 0xd54   :  { %v1413_v38 = vadd.f32 1e-05, %v1409_v25 }
 0xd55   :  { %v1412_v41 = vadd.f32 1e-05, %v1408_v31 }
 0xd56   :  { %4521 = vrsqrt.f32 %v1413_v38  ;;  %v1404_v43 = vpop.xlane.xlu1 %1403 }
 0xd57   :  { %4523 = vrsqrt.f32 %v1412_v41  ;;  %v1410_v56 = vmul.f32 0.03125, %v1404_v43  ;;  %v1641_v43 = vld [vmem:[#allocation2 + $0x230] sm:$0xff] }
 0xd59   :  { %v1414_v46 = vadd.f32 1e-05, %v1410_v56  ;;  %v1642_v56 = vld [vmem:[#allocation2 + $0x238] sm:$0xff] }
 0xd5a   :  { %v1407_v57 = vpop.xlane.xlu0 %1406 }
 0xd5b   :  { %4525 = vrsqrt.f32 %v1414_v46  ;;  %v1411_v47 = vmul.f32 0.03125, %v1407_v57  ;;  %v1643_v46 = vld [vmem:[#allocation2 + $0x240] sm:$0xff]  ;;  %v4189_v57 = vpack.c.bf16 %v1642_v56, %v1641_v43 }
 0xd5d   :  { %v1415_v48 = vadd.f32 1e-05, %v1411_v47  ;;  %v1644_v47 = vld [vmem:[#allocation2 + $0x248] sm:$0xff]  ;;  %4190 = vmatprep.subr.bf16.mxu0 %v4189_v57 }
 0xd5e   :  { %4192 = vmatpush3.bf16.msra.mxu0 %v4189_v57 }
 0xd5f   :  { %4527 = vrsqrt.f32 %v1415_v48  ;;  %v4193_v48 = vpack.c.bf16 %v1644_v47, %v1643_v46 }
 0xd60   :  { %v4522_v27 = vpop.eup %4521 }
 0xd61   :  { %v4524_v58 = vpop.eup %4523  ;;  %v1421_v59 = vmul.f32 %v4522_v27, %v1389_v4  ;;  %v1427_v4 = vld [vmem:[#allocation2 + $0x1a8] sm:$0xff]  ;;  %v1645_v27 = vld [vmem:[#allocation2 + $0x250] sm:$0xff]  ;;  %4194 = vmatprep.subr.bf16.mxu0 %v4193_v48 }
 0xd62   :  { %v1420_v61 = vmul.f32 %v4524_v58, %v1388_v28  ;;  %4196 = vmatpush3.bf16.msra.mxu0 %v4193_v48 }
 0xd63   :  { %v1429_v53 = vmul.f32 %v1425_v51, %v1421_v59  ;;  %v1646_v51 = vld [vmem:[#allocation2 + $0x258] sm:$0xff]  ;;  %v1647_v59 = vld [vmem:[#allocation2 + $0x260] sm:$0xff] }
 0xd64   :  { %v1428_v62 = vmul.f32 %v1424_v60, %v1420_v61  ;;  %v4197_v58 = vpack.c.bf16 %v1646_v51, %v1645_v27  ;;  %v1648_v60 = vld [vmem:[#allocation2 + $0x268] sm:$0xff]  ;;  %v1649_v61 = vld [vmem:[#allocation2 + $0x270] sm:$0xff]  ;;  %v1655_v51 = vld [vmem:[#allocation2 + $0x2a0] sm:$0xff] }
 0xd65   :  { %v4526_v55 = vpop.eup %4525  ;;  %v1437_v34 = vadd.f32 %v1433_v63, %v1429_v53  ;;  %v4201_v63 = vpack.c.bf16 %v1648_v60, %v1647_v59  ;;  %v1650_v53 = vld [vmem:[#allocation2 + $0x278] sm:$0xff] }
 0xd66   :  { %v1436_v2 = vadd.f32 %v1432_v35, %v1428_v62  ;;  %v1422_v5 = vmul.f32 %v4526_v55, %v5031_v1  ;;  %4198 = vmatprep.subr.bf16.mxu0 %v4197_v58  ;;  %v4205_v35 = vpack.c.bf16 %v1650_v53, %v1649_v61  ;;  %v1651_v62 = vld [vmem:[#allocation2 + $0x280] sm:$0xff]  ;;  %v1652_v55 = vld [vmem:[#allocation2 + $0x288] sm:$0xff] }
 0xd67   :  { %v1445_v8 = vmul.f32 %v1437_v34, %v4791_v20  ;;  %v1441_v17 = vmul.f32 %v1437_v34, %v4810_v6  ;;  %4200 = vmatpush3.bf16.msra.mxu0 %v4197_v58  ;;  %v4209_v34 = vpack.c.bf16 %v1652_v55, %v1651_v62  ;;  %v1656_v58 = vld [vmem:[#allocation2 + $0x2a8] sm:$0xff] }
 0xd68   :  { %v1444_v9 = vmul.f32 %v1436_v2, %v4796_v29  ;;  %v1430_v24 = vmul.f32 %v1426_v54, %v1422_v5  ;;  %v1440_v16 = vmul.f32 %v1436_v2, %v4812_v0  ;;  %4202 = vmatprep.subr.bf16.mxu0 %v4201_v63  ;;  %v1653_v54 = vld [vmem:[#allocation2 + $0x290] sm:$0xff]  ;;  %v1654_v2 = vld [vmem:[#allocation2 + $0x298] sm:$0xff]  ;;  %v4217_v59 = vpack.c.bf16 %v1656_v58, %v1655_v51 }
 0xd69   :  { %v4528_v10 = vpop.eup %4527  ;;  %1454 = vrot.lane.b32.xlu0 %v1445_v8, %s4685_s1  ;;  %v4213_v5 = vpack.c.bf16 %v1654_v2, %v1653_v54  ;;  %v1477_v8 = vld [vmem:[#allocation2 + $0x218] sm:$0xff] }
 0xd6a   :  { %1452 = vrot.lane.b32.xlu1 %v1444_v9, %s4685_s1  ;;  %v1438_v28 = vadd.f32 %v1434_v19, %v1430_v24  ;;  %v1423_v11 = vmul.f32 %v4528_v10, %v5037_v22  ;;  %v1476_v19 = vld [vmem:[#allocation2 + $0x210] sm:$0xff] }
 0xd6b   :  { %4204 = vmatpush3.bf16.msra.mxu0 %v4201_v63 }
 0xd6c   :  { %v1446_v13 = vmul.f32 %v1438_v28, %v4798_v49  ;;  %v1431_v14 = vmul.f32 %v1427_v4, %v1423_v11  ;;  %v1442_v40 = vmul.f32 %v1438_v28, %v4816_v7  ;;  %4206 = vmatprep.subr.bf16.mxu0 %v4205_v35 }
 0xd6e   :  { %1456 = vrot.lane.b32.xlu1 %v1446_v13, %s4685_s1  ;;  %v1439_v1 = vadd.f32 %v1435_v12, %v1431_v14  ;;  %v1479_v13 = vld [vmem:[#allocation2 + $0x228] sm:$0xff] }
 0xd6f   :  { %4208 = vmatpush3.bf16.msra.mxu0 %v4205_v35 }
 0xd70   :  { %v1447_v23 = vmul.f32 %v1439_v1, %v4800_v52  ;;  %v1443_v31 = vmul.f32 %v1439_v1, %v4814_v45  ;;  %4210 = vmatprep.subr.bf16.mxu0 %v4209_v34  ;;  %v1478_v1 = vld [vmem:[#allocation2 + $0x220] sm:$0xff] }
 0xd72   :  { %1458 = vrot.lane.b32.xlu1 %v1447_v23, %s4685_s1 }
 0xd73   :  { %4212 = vmatpush3.bf16.msra.mxu0 %v4209_v34 }
 0xd74   :  { %4214 = vmatprep.subr.bf16.mxu0 %v4213_v5 }
 0xd77   :  { %4216 = vmatpush3.bf16.msra.mxu0 %v4213_v5 }
 0xd78   :  { %4218 = vmatprep.subr.bf16.mxu0 %v4217_v59 }
 0xd7b   :  { %4220 = vmatpush3.bf16.msra.mxu0 %v4217_v59  ;;  %v1660_v59 = vld [vmem:[#allocation2 + $0x2c8] sm:$0xff] }
 0xddb   :  { %v1455_v15 = vpop.permute.xlu0 %1454 }
 0xddc   :  { %v1453_v21 = vpop.permute.xlu1 %1452  ;;  %v1465_v22 = vsel %vm397_vm4, %v1441_v17, %v1455_v15 }
 0xddd   :  { %v1464_v33 = vsel %vm397_vm4, %v1440_v16, %v1453_v21 }
 0xdde   :  { %3856 = vmatprep.mubr.msk.f32.mxu1 %vm547_vm5, %v1464_v33 }
 0xddf   :  { %3857 = vmatmul.mubr.msk.f32.vlgmr.msra.gmra.mrb[16].mxu1 %vm547_vm5, %v1465_v22 }
 0xde0   :  { %v1457_v25 = vpop.permute.xlu1 %1456 }
 0xde1   :  { %v1466_v26 = vsel %vm397_vm4, %v1442_v40, %v1457_v25 }
 0xde2   :  { %3859 = vmatprep.mubr.msk.f32.mxu1 %vm547_vm5, %v1466_v26 }
 0xde4   :  { %v1459_v38 = vpop.permute.xlu1 %1458 }
 0xde5   :  { %v1467_v41 = vsel %vm397_vm4, %v1443_v31, %v1459_v38 }
 0xde6   :  { %3860 = vmatmul.mubr.msk.f32.gmra.mrb[18].mxu1 %vm547_vm5, %v1467_v41 }
 0xeb2   :  { %v3858_v9 = vpop.f32.mrb[16].mxu1 }
 0xeb3   :  { %v1564_v24 = vadd.f32 %v3858_v9, %v1477_v8  ;;  %v1558_v10 = vpop.f32.mrb[17].mxu1 }
 0xeb4   :  { %v1559_v4 = vadd.f32 %v1558_v10, %v1476_v19 }
 0xeb5   :  { %v1578_v28 = vmul.f32 %v1564_v24, %v1564_v24 }
 0xeb6   :  { %v1577_v11 = vmul.f32 %v1559_v4, %v1559_v4 }
 0xeb7   :  { %v1582_v12 = vmul.f32 %v1578_v28, %v1564_v24 }
 0xeb8   :  { %v1581_v14 = vmul.f32 %v1577_v11, %v1559_v4 }
 0xeb9   :  { %v1586_v23 = vmul.f32 0.044715, %v1582_v12  ;;  %v3861_v15 = vpop.f32.mrb[18].mxu1 }
 0xeba   :  { %v1585_v16 = vmul.f32 0.044715, %v1581_v14  ;;  %v1574_v17 = vadd.f32 %v3861_v15, %v1479_v13  ;;  %v1568_v21 = vpop.f32.mrb[19].mxu1 }
 0xebb   :  { %v1590_v33 = vadd.f32 %v1586_v23, %v1564_v24  ;;  %v1569_v22 = vadd.f32 %v1568_v21, %v1478_v1 }
 0xebc   :  { %v1589_v40 = vadd.f32 %v1585_v16, %v1559_v4  ;;  %v1580_v25 = vmul.f32 %v1574_v17, %v1574_v17 }
 0xebd   :  { %v1594_v26 = vmul.f32 0.7978846, %v1590_v33  ;;  %v1579_v31 = vmul.f32 %v1569_v22, %v1569_v22 }
 0xebe   :  { %v1593_v38 = vmul.f32 0.7978846, %v1589_v40  ;;  %v1584_v41 = vmul.f32 %v1580_v25, %v1574_v17 }
 0xebf   :  { %4529 = vtanh.f32 %v1594_v26  ;;  %v1583_v43 = vmul.f32 %v1579_v31, %v1569_v22 }
 0xec0   :  { %4531 = vtanh.f32 %v1593_v38  ;;  %v1588_v56 = vmul.f32 0.044715, %v1584_v41 }
 0xec1   :  { %v1587_v46 = vmul.f32 0.044715, %v1583_v43  ;;  %v1658_v43 = vld [vmem:[#allocation2 + $0x2b8] sm:$0xff] }
 0xec2   :  { %v1592_v57 = vadd.f32 %v1588_v56, %v1574_v17  ;;  %v1657_v56 = vld [vmem:[#allocation2 + $0x2b0] sm:$0xff] }
 0xec3   :  { %v1591_v47 = vadd.f32 %v1587_v46, %v1569_v22 }
 0xec4   :  { %v1596_v48 = vmul.f32 0.7978846, %v1592_v57 }
 0xec5   :  { %v1595_v27 = vmul.f32 0.7978846, %v1591_v47 }
 0xec6   :  { %4533 = vtanh.f32 %v1596_v48 }
 0xec7   :  { %4535 = vtanh.f32 %v1595_v27 }
 0xec9   :  { %v4530_v60 = vpop.eup %4529 }
 0xeca   :  { %v4532_v63 = vpop.eup %4531  ;;  %v1602_v61 = vadd.f32 1.0, %v4530_v60 }
 0xecb   :  { %v1601_v53 = vadd.f32 1.0, %v4532_v63  ;;  %v1659_v63 = vld [vmem:[#allocation2 + $0x2c0] sm:$0xff] }
 0xecc   :  { %v1606_v35 = vmul.f32 0.5, %v1602_v61 }
 0xecd   :  { %v1605_v62 = vmul.f32 0.5, %v1601_v53 }
 0xece   :  { %v1610_v55 = vmul.f32 %v1606_v35, %v1564_v24 }
 0xecf   :  { %v1609_v34 = vmul.f32 %v1605_v62, %v1559_v4 }
 0xed0   :  { %v4534_v54 = vpop.eup %4533  ;;  %v1618_v2 = vmul.f32 %v1610_v55, %v4791_v20  ;;  %v1614_v23 = vmul.f32 %v1610_v55, %v4810_v6 }
 0xed1   :  { %v4536_v5 = vpop.eup %4535  ;;  %v1617_v8 = vmul.f32 %v1609_v34, %v4796_v29  ;;  %v1604_v19 = vadd.f32 1.0, %v4534_v54  ;;  %v1613_v21 = vmul.f32 %v1609_v34, %v4812_v0 }
 0xed2   :  { %v1603_v9 = vadd.f32 1.0, %v4536_v5 }
 0xed3   :  { %v4431_v10 = vpack.i.bf16 %v1618_v2, %v1617_v8  ;;  %v1608_v28 = vmul.f32 0.5, %v1604_v19 }
 0xed4   :  { %v1607_v11 = vmul.f32 0.5, %v1603_v9 }
 0xed5   :  { %4432 = vrot.lane.b32.xlu0 %v4431_v10, %s4687_s9  ;;  %v1612_v12 = vmul.f32 %v1608_v28, %v1574_v17 }
 0xed6   :  { %v1611_v13 = vmul.f32 %v1607_v11, %v1569_v22 }
 0xed7   :  { %v1620_v14 = vmul.f32 %v1612_v12, %v4800_v52  ;;  %v1616_v31 = vmul.f32 %v1612_v12, %v4814_v45 }
 0xed8   :  { %v1619_v24 = vmul.f32 %v1611_v13, %v4798_v49  ;;  %v1615_v26 = vmul.f32 %v1611_v13, %v4816_v7 }
 0xeda   :  { %v4436_v4 = vpack.i.bf16 %v1620_v14, %v1619_v24 }
 0xedc   :  { %4437 = vrot.lane.b32.xlu1 %v4436_v4, %s4687_s9 }
 0xf47   :  { %v4433_v1 = vpop.permute.xlu0 %4432 }
 0xf48   :  { %v4435_v15 = vunpack.i.h.bf16 %v4433_v1  ;;  %v4434_v16 = vunpack.i.l.bf16 %v4433_v1 }
 0xf4a   :  { %v1637_v33 = vsel %vm547_vm5, %v1613_v21, %v4434_v16  ;;  %v1638_v40 = vsel %vm547_vm5, %v1614_v23, %v4435_v15 }
 0xf4b   :  { %3894 = vmatprep.mubr.f32.mxu0 %v1637_v33 }
 0xf4c   :  { %3895 = vmatmul.mubr.f32.vlgmr.msra.gmra.mrb[16].mxu0 %v1638_v40 }
 0xf4e   :  { %v4438_v17 = vpop.permute.xlu1 %4437 }
 0xf4f   :  { %v4440_v22 = vunpack.i.h.bf16 %v4438_v17  ;;  %v4439_v25 = vunpack.i.l.bf16 %v4438_v17 }
 0xf51   :  { %v1639_v38 = vsel %vm547_vm5, %v1615_v26, %v4439_v25  ;;  %v1640_v41 = vsel %vm547_vm5, %v1616_v31, %v4440_v22 }
 0xf52   :  { %3897 = vmatprep.mubr.f32.mxu0 %v1639_v38 }
 0xf53   :  { %3898 = vmatmul.mubr.f32.gmra.mrb[18].mxu0 %v1640_v41 }
0x101f   :  { %v3896_v46 = vpop.f32.mrb[16].mxu0 }
0x1020   :  { %v1733_v57 = vadd.f32 %v3896_v46, %v1658_v43  ;;  %v1727_v47 = vpop.f32.mrb[17].mxu0 }
0x1021   :  { %v1728_v48 = vadd.f32 %v1727_v47, %v1657_v56 }
0x1022   :  { %v1747_v27 = vadd.f32 %v1733_v57, %v5008_v37  ;;  %v1803_v57 = vld [vmem:[#allocation2 + $0x2d8] sm:$0xff] }
0x1023   :  { %v1746_v51 = vadd.f32 %v1728_v48, %v5011_v42 }
0x1024   :  { %v1753_v58 = vsel %vm397_vm4, %v1747_v27, 0.0 }
0x1025   :  { %1754 = vadd.xlane.f32.xlu1 %v1753_v58  ;;  %v1750_v60 = vsel %vm397_vm4, %v1746_v51, 0.0 }
0x1026   :  { %v3899_v61 = vpop.f32.mrb[18].mxu0  ;;  %1751 = vadd.xlane.f32.xlu0 %v1750_v60  ;;  %v1810_v60 = vld [vmem:[#allocation2 + $0x2f0] sm:$0xff] }
0x1027   :  { %v1737_v53 = vpop.f32.mrb[19].mxu0  ;;  %v1743_v35 = vadd.f32 %v3899_v61, %v1660_v59 }
0x1028   :  { %v1738_v62 = vadd.f32 %v1737_v53, %v1659_v63 }
0x1029   :  { %v1749_v37 = vadd.f32 %v1743_v35, %v5021_v50 }
0x102a   :  { %v1748_v55 = vadd.f32 %v1738_v62, %v5018_v39 }
0x102b   :  { %v1759_v42 = vsel %vm397_vm4, %v1749_v37, 0.0 }
0x102c   :  { %v1756_v34 = vsel %vm397_vm4, %v1748_v55, 0.0 }
0x102d   :  { %1757 = vadd.xlane.f32.xlu0 %v1756_v34  ;;  %v1804_v34 = vld [vmem:[#allocation2 + $0x2e0] sm:$0xff] }
0x1031   :  { %1760 = vadd.xlane.f32.xlu0 %v1759_v42  ;;  %v1812_v42 = vld [vmem:[#allocation2 + $0x300] sm:$0xff] }
0x10b2   :  { %v1755_v54 = vpop.xlane.xlu1 %1754 }
0x10b3   :  { %v1763_v2 = vmul.f32 0.03125, %v1755_v54  ;;  %v1752_v5 = vpop.xlane.xlu0 %1751 }
0x10b4   :  { %v1762_v8 = vmul.f32 0.03125, %v1752_v5  ;;  %v1805_v5 = vld [vmem:[#allocation2 + $0x2e8] sm:$0xff] }
0x10b5   :  { %v1767_v19 = vsub.f32 %v1747_v27, %v1763_v2  ;;  %v1802_v27 = vld [vmem:[#allocation2 + $0x2d0] sm:$0xff] }
0x10b6   :  { %v1766_v9 = vsub.f32 %v1746_v51, %v1762_v8  ;;  %v1811_v51 = vld [vmem:[#allocation2 + $0x2f8] sm:$0xff] }
0x10b7   :  { %v1771_v10 = vmul.f32 %v1767_v19, %v1767_v19 }
0x10b8   :  { %v1770_v28 = vmul.f32 %v1766_v9, %v1766_v9 }
0x10b9   :  { %v1777_v11 = vsel %vm397_vm4, %v1771_v10, 0.0 }
0x10ba   :  { %1778 = vadd.xlane.f32.xlu0 %v1777_v11  ;;  %v1758_v39 = vpop.xlane.xlu0 %1757  ;;  %v1774_v12 = vsel %vm397_vm4, %v1770_v28, 0.0 }
0x10bb   :  { %v1764_v13 = vmul.f32 0.03125, %v1758_v39  ;;  %1775 = vadd.xlane.f32.xlu1 %v1774_v12 }
0x10bd   :  { %v1768_v50 = vsub.f32 %v1748_v55, %v1764_v13 }
0x10be   :  { %v1761_v14 = vpop.xlane.xlu0 %1760 }
0x10bf   :  { %v1765_v24 = vmul.f32 0.03125, %v1761_v14  ;;  %v1772_v4 = vmul.f32 %v1768_v50, %v1768_v50 }
0x10c1   :  { %v1769_v1 = vsub.f32 %v1749_v37, %v1765_v24  ;;  %v1780_v23 = vsel %vm397_vm4, %v1772_v4, 0.0 }
0x10c2   :  { %1781 = vadd.xlane.f32.xlu1 %v1780_v23 }
0x10c3   :  { %v1773_v15 = vmul.f32 %v1769_v1, %v1769_v1 }
0x10c5   :  { %v1783_v16 = vsel %vm397_vm4, %v1773_v15, 0.0 }
0x10c6   :  { %1784 = vadd.xlane.f32.xlu0 %v1783_v16 }
0x1147   :  { %v1779_v21 = vpop.xlane.xlu0 %1778 }
0x1148   :  { %v1787_v33 = vmul.f32 0.03125, %v1779_v21  ;;  %v1776_v40 = vpop.xlane.xlu1 %1775 }
0x1149   :  { %v1786_v17 = vmul.f32 0.03125, %v1776_v40 }
0x114a   :  { %v1791_v22 = vadd.f32 1e-05, %v1787_v33 }
0x114b   :  { %v1790_v25 = vadd.f32 1e-05, %v1786_v17 }
0x114c   :  { %4537 = vrsqrt.f32 %v1791_v22 }
0x114d   :  { %4539 = vrsqrt.f32 %v1790_v25 }
0x114f   :  { %v1782_v26 = vpop.xlane.xlu1 %1781 }
0x1150   :  { %v1788_v31 = vmul.f32 0.03125, %v1782_v26 }
0x1152   :  { %v1792_v38 = vadd.f32 1e-05, %v1788_v31 }
0x1153   :  { %v1785_v41 = vpop.xlane.xlu0 %1784 }
0x1154   :  { %4541 = vrsqrt.f32 %v1792_v38  ;;  %v1789_v43 = vmul.f32 0.03125, %v1785_v41 }
0x1156   :  { %v4538_v56 = vpop.eup %4537  ;;  %v1793_v46 = vadd.f32 1e-05, %v1789_v43  ;;  %v1930_v43 = vld [vmem:[#allocation2 + $0x390] sm:$0xff] }
0x1157   :  { %v4540_v47 = vpop.eup %4539  ;;  %v1799_v48 = vmul.f32 %v4538_v56, %v1767_v19  ;;  %v1931_v56 = vld [vmem:[#allocation2 + $0x398] sm:$0xff] }
0x1158   :  { %4543 = vrsqrt.f32 %v1793_v46  ;;  %v1798_v58 = vmul.f32 %v4540_v47, %v1766_v9  ;;  %v1813_v9 = vld [vmem:[#allocation2 + $0x308] sm:$0xff]  ;;  %v1932_v46 = vld [vmem:[#allocation2 + $0x3a0] sm:$0xff] }
0x1159   :  { %v1807_v59 = vmul.f32 %v1803_v57, %v1799_v48  ;;  %v4221_v57 = vpack.c.bf16 %v1931_v56, %v1930_v43  ;;  %v1933_v47 = vld [vmem:[#allocation2 + $0x3a8] sm:$0xff] }
0x115a   :  { %v1806_v63 = vmul.f32 %v1802_v27, %v1798_v58  ;;  %v4225_v48 = vpack.c.bf16 %v1933_v47, %v1932_v46  ;;  %v1934_v27 = vld [vmem:[#allocation2 + $0x3b0] sm:$0xff]  ;;  %v1888_v47 = vld [vmem:[#allocation2 + $0x360] sm:$0xff] }
0x115b   :  { %v5091_v61 = vadd.f32 %v1811_v51, %v1807_v59  ;;  %v1935_v51 = vld [vmem:[#allocation2 + $0x3b8] sm:$0xff]  ;;  %4222 = vmatprep.subr.bf16.mxu1 %v4221_v57  ;;  %v1936_v59 = vld [vmem:[#allocation2 + $0x3c0] sm:$0xff] }
0x115c   :  { %v5093_v53 = vadd.f32 %v1810_v60, %v1806_v63  ;;  %4224 = vmatpush3.bf16.msra.mxu1 %v4221_v57  ;;  %v4229_v58 = vpack.c.bf16 %v1935_v51, %v1934_v27  ;;  %v1937_v60 = vld [vmem:[#allocation2 + $0x3c8] sm:$0xff]  ;;  %v1872_v57 = vld [vmem:[#allocation2 + $0x320] sm:$0xff] }
0x115d   :  { %v1821_v35 = vsel %vm397_vm4, %v5091_v61, 0.0  ;;  %4226 = vmatprep.subr.bf16.mxu1 %v4225_v48  ;;  %v4233_v63 = vpack.c.bf16 %v1937_v60, %v1936_v59  ;;  %v1896_v27 = vld [vmem:[#allocation2 + $0x380] sm:$0xff] }
0x115e   :  { %v4542_v62 = vpop.eup %4541  ;;  %1822 = vadd.xlane.f32.xlu0 %v1821_v35  ;;  %v1818_v55 = vsel %vm397_vm4, %v5093_v53, 0.0 }
0x115f   :  { %1819 = vadd.xlane.f32.xlu1 %v1818_v55  ;;  %v1800_v37 = vmul.f32 %v4542_v62, %v1768_v50 }
0x1160   :  { %4228 = vmatpush3.bf16.msra.mxu1 %v4225_v48  ;;  %v1880_v48 = vld [vmem:[#allocation2 + $0x340] sm:$0xff] }
0x1161   :  { %v1808_v54 = vmul.f32 %v1804_v34, %v1800_v37  ;;  %4230 = vmatprep.subr.bf16.mxu1 %v4229_v58 }
0x1162   :  { %v4544_v2 = vpop.eup %4543 }
0x1163   :  { %v5099_v8 = vadd.f32 %v1812_v42, %v1808_v54  ;;  %v1801_v19 = vmul.f32 %v4544_v2, %v1769_v1 }
0x1164   :  { %4232 = vmatpush3.bf16.msra.mxu1 %v4229_v58 }
0x1165   :  { %v1824_v10 = vsel %vm397_vm4, %v5099_v8, 0.0  ;;  %v1809_v28 = vmul.f32 %v1805_v5, %v1801_v19  ;;  %4234 = vmatprep.subr.bf16.mxu1 %v4233_v63  ;;  %v2067_v19 = vld [vmem:[#allocation2 + $0x3f0] sm:$0xff] }
0x1166   :  { %1825 = vadd.xlane.f32.xlu1 %v1824_v10 }
0x1167   :  { %v5103_v11 = vadd.f32 %v1813_v9, %v1809_v28  ;;  %v2068_v9 = vld [vmem:[#allocation2 + $0x3f8] sm:$0xff] }
0x1168   :  { %4236 = vmatpush3.bf16.msra.mxu1 %v4233_v63  ;;  %v5127_v28 = vpack.c.bf16 %v2068_v9, %v2067_v19  ;;  %v1873_v63 = vld [vmem:[#allocation2 + $0x328] sm:$0xff] }
0x1169   :  { %v1827_v39 = vsel %vm397_vm4, %v5103_v11, 0.0  ;;  %v1889_v19 = vld [vmem:[#allocation2 + $0x368] sm:$0xff] }
0x116a   :  { %1828 = vadd.xlane.f32.xlu0 %v1827_v39  ;;  %4238 = vmatprep.subr.bf16.mxu1 %v5127_v28 }
0x11eb   :  { %v1823_v12 = vpop.xlane.xlu0 %1822 }
0x11ec   :  { %v1831_v13 = vmul.f32 0.03125, %v1823_v12  ;;  %v1820_v50 = vpop.xlane.xlu1 %1819 }
0x11ed   :  { %v1830_v14 = vmul.f32 0.03125, %v1820_v50  ;;  %v1871_v50 = vld [vmem:[#allocation2 + $0x318] sm:$0xff] }
0x11ee   :  { %v1835_v24 = vsub.f32 %v5091_v61, %v1831_v13 }
0x11ef   :  { %v5109_v4 = vsub.f32 %v5093_v53, %v1830_v14 }
0x11f0   :  { %v1839_v1 = vmul.f32 %v1835_v24, %v1835_v24 }
0x11f1   :  { %v1838_v23 = vmul.f32 %v5109_v4, %v5109_v4 }
0x11f2   :  { %v1845_v15 = vsel %vm397_vm4, %v1839_v1, 0.0 }
0x11f3   :  { %v1826_v16 = vpop.xlane.xlu1 %1825  ;;  %1846 = vadd.xlane.f32.xlu0 %v1845_v15  ;;  %v1842_v21 = vsel %vm397_vm4, %v1838_v23, 0.0  ;;  %v1870_v23 = vld [vmem:[#allocation2 + $0x310] sm:$0xff] }
0x11f4   :  { %v1832_v33 = vmul.f32 0.03125, %v1826_v16  ;;  %1843 = vadd.xlane.f32.xlu1 %v1842_v21  ;;  %v1886_v15 = vld [vmem:[#allocation2 + $0x350] sm:$0xff]  ;;  %v1879_v16 = vld [vmem:[#allocation2 + $0x338] sm:$0xff] }
0x11f6   :  { %v5116_v40 = vsub.f32 %v5099_v8, %v1832_v33 }
0x11f7   :  { %v1829_v17 = vpop.xlane.xlu0 %1828 }
0x11f8   :  { %v1833_v22 = vmul.f32 0.03125, %v1829_v17  ;;  %v1840_v25 = vmul.f32 %v5116_v40, %v5116_v40  ;;  %v1878_v17 = vld [vmem:[#allocation2 + $0x330] sm:$0xff] }
0x11fa   :  { %v5121_v26 = vsub.f32 %v5103_v11, %v1833_v22  ;;  %v1848_v31 = vsel %vm397_vm4, %v1840_v25, 0.0 }
0x11fb   :  { %1849 = vadd.xlane.f32.xlu1 %v1848_v31  ;;  %v1894_v31 = vld [vmem:[#allocation2 + $0x370] sm:$0xff] }
0x11fc   :  { %v1841_v38 = vmul.f32 %v5121_v26, %v5121_v26 }
0x11fe   :  { %v1851_v41 = vsel %vm397_vm4, %v1841_v38, 0.0 }
0x11ff   :  { %1852 = vadd.xlane.f32.xlu0 %v1851_v41 }
0x1280   :  { %v1847_v35 = vpop.xlane.xlu0 %1846 }
0x1281   :  { %v1855_v62 = vmul.f32 0.03125, %v1847_v35  ;;  %v1844_v55 = vpop.xlane.xlu1 %1843  ;;  %v1887_v35 = vld [vmem:[#allocation2 + $0x358] sm:$0xff] }
0x1282   :  { %v1854_v34 = vmul.f32 0.03125, %v1844_v55 }
0x1283   :  { %v1859_v37 = vadd.f32 1e-05, %v1855_v62 }
0x1284   :  { %v1858_v42 = vadd.f32 1e-05, %v1854_v34 }
0x1285   :  { %4545 = vrsqrt.f32 %v1859_v37  ;;  %v1881_v37 = vld [vmem:[#allocation2 + $0x348] sm:$0xff] }
0x1286   :  { %4547 = vrsqrt.f32 %v1858_v42 }
0x1288   :  { %v1850_v54 = vpop.xlane.xlu1 %1849 }
0x1289   :  { %v1856_v2 = vmul.f32 0.03125, %v1850_v54 }
0x128b   :  { %v1860_v5 = vadd.f32 1e-05, %v1856_v2 }
0x128c   :  { %v1853_v10 = vpop.xlane.xlu0 %1852 }
0x128d   :  { %4549 = vrsqrt.f32 %v1860_v5  ;;  %v1857_v39 = vmul.f32 0.03125, %v1853_v10  ;;  %v1895_v5 = vld [vmem:[#allocation2 + $0x378] sm:$0xff] }
0x128f   :  { %v4546_v12 = vpop.eup %4545  ;;  %v1861_v13 = vadd.f32 1e-05, %v1857_v39 }
0x1290   :  { %v4548_v14 = vpop.eup %4547  ;;  %v1867_v1 = vmul.f32 %v4546_v12, %v1835_v24 }
0x1291   :  { %4551 = vrsqrt.f32 %v1861_v13  ;;  %v1866_v21 = vmul.f32 %v4548_v14, %v5109_v4  ;;  %v1897_v13 = vld [vmem:[#allocation2 + $0x388] sm:$0xff] }
0x1292   :  { %v1875_v33 = vmul.f32 %v1871_v50, %v1867_v1  ;;  %v1891_v2 = vmul.f32 %v1887_v35, %v1867_v1  ;;  %v2069_v1 = vld [vmem:[#allocation2 + $0x400] sm:$0xff] }
0x1293   :  { %v1874_v22 = vmul.f32 %v1870_v23, %v1866_v21  ;;  %v1890_v25 = vmul.f32 %v1886_v15, %v1866_v21  ;;  %v2070_v23 = vld [vmem:[#allocation2 + $0x408] sm:$0xff] }
0x1294   :  { %v1883_v38 = vadd.f32 %v1879_v16, %v1875_v33  ;;  %v1899_v39 = vadd.f32 %v1895_v5, %v1891_v2 }
0x1295   :  { %v1882_v41 = vadd.f32 %v1878_v17, %v1874_v22  ;;  %v5132_v56 = vadd.f32 %v1894_v31, %v1890_v25  ;;  %v4241_v22 = vpack.c.bf16 %v2070_v23, %v2069_v1  ;;  %v2071_v31 = vld [vmem:[#allocation2 + $0x410] sm:$0xff]  ;;  %v2078_v1 = vld [vmem:[#allocation2 + $0x448] sm:$0xff]  ;;  %v2077_v23 = vld [vmem:[#allocation2 + $0x440] sm:$0xff] }
0x1296   :  { %v1907_v43 = vmul.f32 %v1883_v38, %v4791_v20  ;;  %v1903_v21 = vmul.f32 %v1883_v38, %v4810_v6  ;;  %v2074_v38 = vld [vmem:[#allocation2 + $0x428] sm:$0xff] }
0x1297   :  { %v4550_v46 = vpop.eup %4549  ;;  %v1906_v24 = vmul.f32 %v1882_v41, %v4796_v29  ;;  %v2043_v51 = vmul.f32 %v5132_v56, %v4812_v0  ;;  %v1902_v16 = vmul.f32 %v1882_v41, %v4812_v0 }
0x1298   :  { %1916 = vrot.lane.b32.xlu0 %v1907_v43, %s4685_s1  ;;  %v1868_v4 = vmul.f32 %v4550_v46, %v5116_v40  ;;  %v2072_v43 = vld [vmem:[#allocation2 + $0x418] sm:$0xff] }
0x1299   :  { %1914 = vrot.lane.b32.xlu1 %v1906_v24, %s4685_s1  ;;  %v4245_v46 = vpack.c.bf16 %v2072_v43, %v2071_v31  ;;  %v2073_v24 = vld [vmem:[#allocation2 + $0x420] sm:$0xff]  ;;  %v1939_v43 = vld [vmem:[#allocation2 + $0x3d8] sm:$0xff] }
0x129a   :  { %v1876_v58 = vmul.f32 %v1872_v57, %v1868_v4  ;;  %v1892_v59 = vmul.f32 %v1888_v47, %v1868_v4  ;;  %v4249_v4 = vpack.c.bf16 %v2074_v38, %v2073_v24  ;;  %v1941_v24 = vld [vmem:[#allocation2 + $0x3e8] sm:$0xff] }
0x129b   :  { %v4552_v60 = vpop.eup %4551 }
0x129c   :  { %2051 = vrot.lane.b32.xlu0 %v2043_v51, %s4685_s1  ;;  %v1884_v62 = vadd.f32 %v1880_v48, %v1876_v58  ;;  %v1900_v55 = vadd.f32 %v1896_v27, %v1892_v59  ;;  %v1869_v34 = vmul.f32 %v4552_v60, %v5121_v26  ;;  %v2044_v26 = vmul.f32 %v1899_v39, %v4810_v6 }
0x129d   :  { %v2040_v60 = vmul.f32 %v1899_v39, %v4791_v20  ;;  %v2076_v39 = vld [vmem:[#allocation2 + $0x438] sm:$0xff] }
0x129e   :  { %v1908_v40 = vmul.f32 %v1884_v62, %v4798_v49  ;;  %v2045_v42 = vmul.f32 %v1900_v55, %v4816_v7  ;;  %v1877_v54 = vmul.f32 %v1873_v63, %v1869_v34  ;;  %v1893_v12 = vmul.f32 %v1889_v19, %v1869_v34 }
0x129f   :  { %v1904_v41 = vmul.f32 %v1884_v62, %v4816_v7 }
0x12a0   :  { %1918 = vrot.lane.b32.xlu1 %v1908_v40, %s4685_s1  ;;  %2055 = vrot.lane.b32.xlu0 %v2045_v42, %s4685_s1  ;;  %v1885_v9 = vadd.f32 %v1881_v37, %v1877_v54  ;;  %v1901_v50 = vadd.f32 %v1897_v13, %v1893_v12  ;;  %v1938_v54 = vld [vmem:[#allocation2 + $0x3d0] sm:$0xff] }
0x12a1   :  { %v2075_v12 = vld [vmem:[#allocation2 + $0x430] sm:$0xff] }
0x12a2   :  { %v1909_v10 = vmul.f32 %v1885_v9, %v4800_v52  ;;  %v2046_v14 = vmul.f32 %v1901_v50, %v4814_v45  ;;  %v1905_v27 = vmul.f32 %v1885_v9, %v4814_v45  ;;  %v2042_v34 = vmul.f32 %v1901_v50, %v4800_v52 }
0x12a4   :  { %1920 = vrot.lane.b32.xlu1 %v1909_v10, %s4685_s1 }
0x12a8   :  { %2053 = vrot.lane.b32.xlu1 %v2044_v26, %s4685_s1 }
0x12ac   :  { %2057 = vrot.lane.b32.xlu1 %v2046_v14, %s4685_s1 }
0x130a   :  { %v1917_v15 = vpop.permute.xlu0 %1916 }
0x130b   :  { %v1915_v33 = vpop.permute.xlu1 %1914  ;;  %v1927_v25 = vsel %vm397_vm4, %v1903_v21, %v1917_v15 }
0x130c   :  { %v1926_v17 = vsel %vm397_vm4, %v1902_v16, %v1915_v33 }
0x130d   :  { %3916 = vmatprep.mubr.msk.f32.mxu1 %vm547_vm5, %v1926_v17 }
0x130e   :  { %3917 = vmatmul.mubr.msk.f32.vlgmr.msra.gmra.mrb[20].mxu1 %vm547_vm5, %v1927_v25  ;;  %v2052_v48 = vpop.permute.xlu0 %2051 }
0x130f   :  { %4240 = vmatpush3.bf16.msra.mxu1 %v5127_v28  ;;  %v2039_v28 = vmul.f32 %v5132_v56, %v4796_v29  ;;  %v2041_v56 = vmul.f32 %v1900_v55, %v4798_v49 }
0x1310   :  { %4242 = vmatprep.subr.bf16.mxu1 %v4241_v22 }
0x1311   :  { %v2063_v59 = vsel %vm397_vm4, %v2039_v28, %v2052_v48  ;;  %v5202_v28 = vld [vmem:[#allocation2 + $0x48] sm:$0xff] }
0x1312   :  { %v1919_v57 = vpop.permute.xlu1 %1918  ;;  %v2056_v35 = vpop.permute.xlu0 %2055 }
0x1313   :  { %v1928_v47 = vsel %vm397_vm4, %v1904_v41, %v1919_v57  ;;  %4244 = vmatpush3.bf16.msra.mxu1 %v4241_v22  ;;  %v2065_v37 = vsel %vm397_vm4, %v2041_v56, %v2056_v35  ;;  %v5207_v35 = vld [vmem:[#allocation2 + $0x58] sm:$0xff] }
0x1314   :  { %3919 = vmatprep.mubr.msk.f32.mxu1 %vm547_vm5, %v1928_v47  ;;  %4246 = vmatprep.subr.bf16.mxu1 %v4245_v46 }
0x1316   :  { %v1921_v51 = vpop.permute.xlu1 %1920 }
0x1317   :  { %v1929_v58 = vsel %vm397_vm4, %v1905_v27, %v1921_v51  ;;  %4248 = vmatpush3.bf16.msra.mxu1 %v4245_v46  ;;  %v1940_v46 = vld [vmem:[#allocation2 + $0x3e0] sm:$0xff]  ;;  %v5200_v27 = vld [vmem:[#allocation2 + $0x50] sm:$0xff] }
0x1318   :  { %3920 = vmatmul.mubr.msk.f32.gmra.mrb[22].mxu1 %vm547_vm5, %v1929_v58  ;;  %4250 = vmatprep.subr.bf16.mxu1 %v4249_v4 }
0x1319   :  { %3938 = vmatprep.mubr.msk.f32.mxu1 %vm547_vm5, %v2063_v59 }
0x131a   :  { %v2054_v63 = vpop.permute.xlu1 %2053 }
0x131b   :  { %v2064_v62 = vsel %vm397_vm4, %v2040_v60, %v2054_v63  ;;  %4252 = vmatpush3.bf16.msra.mxu1 %v4249_v4 }
0x131e   :  { %3939 = vmatmul.mubr.msk.f32.vlgmr.msra.gmra.mrb[24].mxu1 %vm547_vm5, %v2064_v62  ;;  %v2058_v40 = vpop.permute.xlu1 %2057 }
0x131f   :  { %v2066_v42 = vsel %vm397_vm4, %v2042_v34, %v2058_v40  ;;  %3941 = vmatprep.mubr.msk.f32.mxu1 %vm547_vm5, %v2065_v37  ;;  %v5210_v34 = vld [vmem:[#allocation2 + $0x60] sm:$0xff] }
0x1322   :  { %3942 = vmatmul.mubr.msk.f32.gmra.mrb[26].mxu1 %vm547_vm5, %v2066_v42 }
0x13e1   :  { %v3918_v2 = vpop.f32.mrb[20].mxu1 }
0x13e2   :  { %v2020_v5 = vpop.f32.mrb[21].mxu1  ;;  %v2026_v41 = vadd.f32 %v3918_v2, %v1939_v43 }
0x13e3   :  { %v2021_v19 = vadd.f32 %v2020_v5, %v1938_v54 }
0x13e4   :  { %v2177_v57 = vmul.f32 0.25, %v2026_v41 }
0x13e5   :  { %v5178_v9 = vmul.f32 0.25, %v2021_v19 }
0x13e7   :  { %3952 = vmatprep.mubr.msk.f32.mxu0 %vm661_vm6, %v5178_v9 }
0x13eb   :  { %v3921_v55 = vpop.f32.mrb[22].mxu1 }
0x13ec   :  { %v2030_v10 = vpop.f32.mrb[23].mxu1  ;;  %v2036_v47 = vadd.f32 %v3921_v55, %v1941_v24 }
0x13ed   :  { %v2031_v38 = vadd.f32 %v2030_v10, %v1940_v46 }
0x13ee   :  { %v2179_v48 = vmul.f32 0.25, %v2036_v47 }
0x13ef   :  { %v5194_v4 = vmul.f32 0.25, %v2031_v38 }
0x13f1   :  { %v3940_v13 = vpop.f32.mrb[24].mxu1 }
0x13f2   :  { %v2163_v26 = vadd.f32 %v3940_v13, %v2076_v39  ;;  %v2157_v50 = vpop.f32.mrb[25].mxu1 }
0x13f3   :  { %v2158_v14 = vadd.f32 %v2157_v50, %v2075_v12 }
0x13f5   :  { %v3943_v15 = vpop.f32.mrb[26].mxu1  ;;  %v4253_v16 = vpack.c.bf16 %v2163_v26, %v2158_v14  ;;  %v5182_v21 = vpack.i.bf16 %v2163_v26, %v2158_v14 }
0x13f6   :  { %v2173_v33 = vadd.f32 %v3943_v15, %v2078_v1  ;;  %v2167_v17 = vpop.f32.mrb[27].mxu1 }
0x13f7   :  { %v2168_v22 = vadd.f32 %v2167_v17, %v2077_v23  ;;  %4255 = vmatprep.subr.msk.bf16.mxu0 %vm4845_vm7, %v4253_v16 }
0x13f8   :  { %4258 = vmatpush3.bf16.xpose.msk.msra.mxu0 %vm4845_vm7, %v4253_v16 }
0x13f9   :  { %v4259_v25 = vpack.c.bf16 %v2173_v33, %v2168_v22  ;;  %v5188_v31 = vpack.i.bf16 %v2173_v33, %v2168_v22 }
0x13fb   :  { %4261 = vmatprep.subr.msk.bf16.mxu0 %vm4845_vm7, %v4259_v25 }
0x1400   :  { %4264 = vmatpush3.bf16.xpose.msk.msra.mxu0 %vm4845_vm7, %v4259_v25 }
0x1407   :  { %3953 = vmatmul.mubr.msk.f32.vlgmr.msra.gmra.mrb[20].mxu0 %vm661_vm6, %v2177_v57 }
0x1408   :  { %3955 = vmatprep.mubr.msk.f32.mxu0 %vm661_vm6, %v5194_v4 }
0x140b   :  { %3956 = vmatmul.mubr.msk.f32.gmra.mrb[22].mxu0 %vm661_vm6, %v2179_v48 }
0x14da   :  { %v3954_v51 = vpop.f32.mrb[20].mxu0 }
0x14db   :  { %v2276_v58 = vadd.f32 %v3954_v51, %v5200_v27  ;;  %v2270_v59 = vpop.f32.mrb[21].mxu0 }
0x14dc   :  { %v2271_v60 = vadd.f32 %v2270_v59, %v5202_v28 }
0x14dd   :  { %v2292_v63 = vsel %vm397_vm4, %v2276_v58, -inf }
0x14de   :  { %2293 = vmax.xlane.f32.xlu1 %v2292_v63  ;;  %v3957_v62 = vpop.f32.mrb[22].mxu0  ;;  %v2289_v56 = vsel %vm397_vm4, %v2271_v60, -inf }
0x14df   :  { %v2280_v37 = vpop.f32.mrb[23].mxu0  ;;  %2290 = vmax.xlane.f32.xlu0 %v2289_v56  ;;  %v2286_v42 = vadd.f32 %v3957_v62, %v5210_v34 }
0x14e0   :  { %v2281_v40 = vadd.f32 %v2280_v37, %v5207_v35 }
0x14e1   :  { %v2298_v2 = vsel %vm397_vm4, %v2286_v42, -inf }
0x14e2   :  { %v2295_v54 = vsel %vm397_vm4, %v2281_v40, -inf }
0x14e3   :  { %2296 = vmax.xlane.f32.xlu0 %v2295_v54 }
0x14e7   :  { %2299 = vmax.xlane.f32.xlu0 %v2298_v2 }
0x14ef   :  { %4442 = vrot.lane.b32.xlu1 %v5182_v21, %s4686_s8 }
0x14f3   :  { %4452 = vrot.lane.b32.xlu1 %v5182_v21, %s4689_s11 }
0x14f7   :  { %4457 = vrot.lane.b32.xlu1 %v5188_v31, %s4689_s11 }
0x156b   :  { %v2294_v5 = vpop.xlane.xlu1 %2293 }
0x156c   :  { %v2302_v19 = vsub.f32 %v2276_v58, %v2294_v5  ;;  %v2291_v55 = vpop.xlane.xlu0 %2290 }
0x156d   :  { %v2301_v10 = vsub.f32 %v2271_v60, %v2291_v55 }
0x156e   :  { %v2307_v39 = vmul.f32 1.442695, %v2302_v19 }
0x156f   :  { %v2305_v12 = vmul.f32 1.442695, %v2301_v10  ;;  %v4443_v13 = vpop.permute.xlu1 %4442 }
0x1570   :  { %4553 = vpow2.f32 %v2307_v39  ;;  %v4445_v26 = vunpack.i.h.bf16 %v4443_v13  ;;  %v4444_v50 = vunpack.i.l.bf16 %v4443_v13  ;;  %v2297_v33 = vpop.xlane.xlu0 %2296 }
0x1571   :  { %4555 = vpow2.f32 %v2305_v12  ;;  %v2303_v25 = vsub.f32 %v2281_v40, %v2297_v33 }
0x1572   :  { %v4265_v14 = vpack.c.bf16 %v4445_v26, %v4444_v50 }
0x1573   :  { %v2309_v46 = vmul.f32 1.442695, %v2303_v25 }
0x1574   :  { %4266 = vmatprep.subr.bf16.mxu1 %v4265_v14  ;;  %v2300_v17 = vpop.xlane.xlu0 %2299 }
0x1575   :  { %4268 = vmatpush3.bf16.msra.mxu1 %v4265_v14  ;;  %v2304_v22 = vsub.f32 %v2286_v42, %v2300_v17 }
0x1577   :  { %v2311_v43 = vmul.f32 1.442695, %v2304_v22 }
0x1579   :  { %4557 = vpow2.f32 %v2311_v43 }
0x157a   :  { %v4554_v1 = vpop.eup %4553  ;;  %4559 = vpow2.f32 %v2309_v46 }
0x157b   :  { %v4556_v23 = vpop.eup %4555  ;;  %v2316_v15 = vsel %vm397_vm4, %v4554_v1, 0.0 }
0x157c   :  { %2317 = vadd.xlane.f32.xlu0 %v2316_v15  ;;  %v2313_v16 = vsel %vm397_vm4, %v4556_v23, 0.0 }
0x157d   :  { %2314 = vadd.xlane.f32.xlu1 %v2313_v16 }
0x1583   :  { %v4558_v41 = vpop.eup %4557 }
0x1584   :  { %v4560_v24 = vpop.eup %4559  ;;  %v2322_v38 = vsel %vm397_vm4, %v4558_v41, 0.0 }
0x1585   :  { %v2319_v47 = vsel %vm397_vm4, %v4560_v24, 0.0 }
0x158e   :  { %2461 = vrot.lane.b32.xlu1 %v2177_v57, %s4689_s11  ;;  %v4453_v57 = vpop.permute.xlu1 %4452 }
0x158f   :  { %v4455_v63 = vunpack.i.h.bf16 %v4453_v57  ;;  %v4454_v62 = vunpack.i.l.bf16 %v4453_v57 }
0x1591   :  { %v4273_v42 = vpack.c.bf16 %v4455_v63, %v4454_v62 }
0x1592   :  { %4447 = vrot.lane.b32.xlu0 %v5188_v31, %s4686_s8  ;;  %v4458_v51 = vpop.permute.xlu1 %4457 }
0x1593   :  { %v4460_v54 = vunpack.i.h.bf16 %v4458_v51  ;;  %v4459_v2 = vunpack.i.l.bf16 %v4458_v51 }
0x1595   :  { %v4279_v19 = vpack.c.bf16 %v4460_v54, %v4459_v2 }
0x15b1   :  { %2323 = vadd.xlane.f32.xlu0 %v2322_v38 }
0x15b2   :  { %2320 = vadd.xlane.f32.xlu1 %v2319_v47 }
0x15c3   :  { %2465 = vrot.lane.b32.xlu1 %v2179_v48, %s4689_s11 }
0x15c7   :  { %2459 = vrot.lane.b32.xlu0 %v5178_v9, %s4689_s11 }
0x15cb   :  { %2463 = vrot.lane.b32.xlu0 %v5194_v4, %s4689_s11 }
0x1609   :  { %v2318_v58 = vpop.xlane.xlu0 %2317 }
0x160a   :  { %4561 = vrcp.f32 %v2318_v58  ;;  %v2315_v59 = vpop.xlane.xlu1 %2314 }
0x160b   :  { %4563 = vrcp.f32 %v2315_v59 }
0x160d   :  { %v4448_v60 = vpop.permute.xlu0 %4447 }
0x160e   :  { %v4450_v56 = vunpack.i.h.bf16 %v4448_v60  ;;  %v4449_v37 = vunpack.i.l.bf16 %v4448_v60  ;;  %v2462_v55 = vpop.permute.xlu1 %2461 }
0x1610   :  { %v4269_v40 = vpack.c.bf16 %v4450_v56, %v4449_v37 }
0x1612   :  { %4270 = vmatprep.subr.bf16.mxu1 %v4269_v40 }
0x1613   :  { %4272 = vmatpush3.bf16.msra.mxu1 %v4269_v40 }
0x1614   :  { %v4562_v48 = vpop.eup %4561  ;;  %4275 = vmatprep.subr.msk.bf16.mxu1 %vm4845_vm7, %v4273_v42 }
0x1615   :  { %v4564_v9 = vpop.eup %4563  ;;  %v5238_v5 = vmul.f32 %v4562_v48, %v4554_v1 }
0x1616   :  { %v5236_v4 = vmul.f32 %v4564_v9, %v4556_v23 }
0x1618   :  { %3966 = vmatprep.mubr.msk.f32.mxu1 %vm397_vm4, %v5236_v4 }
0x1619   :  { %3967 = vmatmul.mubr.msk.f32.vlgmr.msra.gmra.mrb[28].mxu1 %vm397_vm4, %v5238_v5 }
0x161c   :  { %4278 = vmatpush3.bf16.xpose.msk.msra.mxu1 %vm4845_vm7, %v4273_v42 }
0x161d   :  { %4281 = vmatprep.subr.msk.bf16.mxu1 %vm4845_vm7, %v4279_v19 }
0x1624   :  { %4284 = vmatpush3.bf16.xpose.msk.msra.mxu1 %vm4845_vm7, %v4279_v19 }
0x163e   :  { %v2324_v10 = vpop.xlane.xlu0 %2323 }
0x163f   :  { %4565 = vrcp.f32 %v2324_v10  ;;  %v2321_v39 = vpop.xlane.xlu1 %2320 }
0x1640   :  { %4567 = vrcp.f32 %v2321_v39 }
0x1642   :  { %v2460_v50 = vpop.permute.xlu0 %2459 }
0x1643   :  { %v2466_v1 = vpop.permute.xlu1 %2465 }
0x1646   :  { %v2464_v44 = vpop.permute.xlu0 %2463 }
0x1649   :  { %v4566_v12 = vpop.eup %4565 }
0x164a   :  { %v4568_v13 = vpop.eup %4567  ;;  %v5252_v14 = vmul.f32 %v4566_v12, %v4558_v41 }
0x164b   :  { %v5250_v26 = vmul.f32 %v4568_v13, %v4560_v24 }
0x164d   :  { %3969 = vmatprep.mubr.msk.f32.mxu1 %vm397_vm4, %v5250_v26 }
0x164e   :  { %3970 = vmatmul.mubr.msk.f32.gmra.mrb[30].mxu1 %vm397_vm4, %v5252_v14 }
0x164f   :  { %3980 = vmatprep.mubr.msk.f32.mxu1 %vm661_vm6, %v2460_v50 }
0x1652   :  { %3981 = vmatmul.mubr.msk.f32.vlgmr.msra.gmra.mrb[32].mxu1 %vm661_vm6, %v2462_v55 }
0x1653   :  { %3983 = vmatprep.mubr.msk.f32.mxu1 %vm661_vm6, %v2464_v44 }
0x1656   :  { %3984 = vmatmul.mubr.msk.f32.gmra.mrb[34].mxu1 %vm661_vm6, %v2466_v1 }
0x16ec   :  { %v5262_v23 = vpop.f32.mrb[28].mxu1 }
0x16ed   :  { %v5264_v15 = vpop.f32.mrb[29].mxu1 }
0x1721   :  { %v5266_v16 = vpop.f32.mrb[30].mxu1 }
0x1722   :  { %v5268_v33 = vpop.f32.mrb[31].mxu1 }
0x1725   :  { %v3982_v17 = vpop.f32.mrb[32].mxu1 }
0x1726   :  { %v2563_v22 = vadd.f32 %v3982_v17, %v5200_v27  ;;  %v2557_v25 = vpop.f32.mrb[33].mxu1 }
0x1727   :  { %v2558_v43 = vadd.f32 %v2557_v25, %v5202_v28 }
0x1728   :  { %v2579_v46 = vsel %vm397_vm4, %v2563_v22, -inf }
0x1729   :  { %2580 = vmax.xlane.f32.xlu1 %v2579_v46  ;;  %v3985_v41 = vpop.f32.mrb[34].mxu1  ;;  %v2576_v24 = vsel %vm397_vm4, %v2558_v43, -inf }
0x172a   :  { %v2567_v38 = vpop.f32.mrb[35].mxu1  ;;  %2577 = vmax.xlane.f32.xlu0 %v2576_v24  ;;  %v2573_v57 = vadd.f32 %v3985_v41, %v5210_v34 }
0x172b   :  { %v2568_v47 = vadd.f32 %v2567_v38, %v5207_v35 }
0x172c   :  { %v2585_v27 = vsel %vm397_vm4, %v2573_v57, -inf }
0x172d   :  { %v2582_v51 = vsel %vm397_vm4, %v2568_v47, -inf }
0x172e   :  { %2583 = vmax.xlane.f32.xlu0 %v2582_v51 }
0x1732   :  { %2586 = vmax.xlane.f32.xlu0 %v2585_v27 }
0x17b6   :  { %v2581_v58 = vpop.xlane.xlu1 %2580 }
0x17b7   :  { %v2589_v28 = vsub.f32 %v2563_v22, %v2581_v58  ;;  %v2578_v59 = vpop.xlane.xlu0 %2577 }
0x17b8   :  { %v2588_v60 = vsub.f32 %v2558_v43, %v2578_v59  ;;  %v2794_v59 = vld [vmem:[#allocation2 + $0x450] sm:$0xff] }
0x17b9   :  { %v2594_v63 = vmul.f32 1.442695, %v2589_v28 }
0x17ba   :  { %v2592_v62 = vmul.f32 1.442695, %v2588_v60  ;;  %v2795_v60 = vld [vmem:[#allocation2 + $0x458] sm:$0xff] }
0x17bb   :  { %4569 = vpow2.f32 %v2594_v63  ;;  %v2584_v56 = vpop.xlane.xlu0 %2583  ;;  %v2796_v63 = vld [vmem:[#allocation2 + $0x460] sm:$0xff] }
0x17bc   :  { %4571 = vpow2.f32 %v2592_v62  ;;  %v2590_v37 = vsub.f32 %v2568_v47, %v2584_v56  ;;  %v4293_v56 = vpack.c.bf16 %v2795_v60, %v2794_v59  ;;  %v2803_v59 = vld [vmem:[#allocation2 + $0x498] sm:$0xff]  ;;  %v2802_v60 = vld [vmem:[#allocation2 + $0x490] sm:$0xff] }
0x17be   :  { %v2596_v40 = vmul.f32 1.442695, %v2590_v37  ;;  %v2797_v37 = vld [vmem:[#allocation2 + $0x468] sm:$0xff] }
0x17bf   :  { %v2587_v35 = vpop.xlane.xlu0 %2586 }
0x17c0   :  { %4573 = vpow2.f32 %v2596_v40  ;;  %v2591_v34 = vsub.f32 %v2573_v57, %v2587_v35  ;;  %v4297_v40 = vpack.c.bf16 %v2797_v37, %v2796_v63  ;;  %v2798_v35 = vld [vmem:[#allocation2 + $0x470] sm:$0xff] }
0x17c2   :  { %v2598_v42 = vmul.f32 1.442695, %v2591_v34  ;;  %v2799_v34 = vld [vmem:[#allocation2 + $0x478] sm:$0xff] }
0x17c4   :  { %4575 = vpow2.f32 %v2598_v42 }
0x17c5   :  { %v4570_v48 = vpop.eup %4569 }
0x17c6   :  { %v4572_v9 = vpop.eup %4571  ;;  %v2603_v54 = vsel %vm397_vm4, %v4570_v48, 0.0 }
0x17c7   :  { %2604 = vadd.xlane.f32.xlu0 %v2603_v54  ;;  %v2600_v2 = vsel %vm397_vm4, %v4572_v9, 0.0  ;;  %v2800_v54 = vld [vmem:[#allocation2 + $0x480] sm:$0xff] }
0x17c8   :  { %2601 = vadd.xlane.f32.xlu1 %v2600_v2  ;;  %v2801_v2 = vld [vmem:[#allocation2 + $0x488] sm:$0xff] }
0x17ca   :  { %v4574_v19 = vpop.eup %4573 }
0x17cb   :  { %v2606_v55 = vsel %vm397_vm4, %v4574_v19, 0.0 }
0x17cc   :  { %2607 = vadd.xlane.f32.xlu1 %v2606_v55 }
0x17ce   :  { %v4576_v10 = vpop.eup %4575 }
0x17cf   :  { %v2609_v39 = vsel %vm397_vm4, %v4576_v10, 0.0 }
0x17d0   :  { %2610 = vadd.xlane.f32.xlu0 %v2609_v39 }
0x17dd   :  { %4462 = vrot.lane.b32.xlu1 %v5182_v21, %s4688_s10 }
0x17e6   :  { %4467 = vrot.lane.b32.xlu0 %v5188_v31, %s4688_s10 }
0x1854   :  { %v2605_v13 = vpop.xlane.xlu0 %2604 }
0x1855   :  { %v2602_v12 = vpop.xlane.xlu1 %2601 }
0x1856   :  { %4577 = vrcp.f32 %v2602_v12 }
0x1857   :  { %4579 = vrcp.f32 %v2605_v13 }
0x1859   :  { %v2608_v50 = vpop.xlane.xlu1 %2607 }
0x185a   :  { %4581 = vrcp.f32 %v2608_v50 }
0x185d   :  { %v4463_v44 = vpop.permute.xlu1 %4462  ;;  %v2611_v1 = vpop.xlane.xlu0 %2610 }
0x185e   :  { %v4465_v17 = vunpack.i.h.bf16 %v4463_v44  ;;  %v4464_v22 = vunpack.i.l.bf16 %v4463_v44  ;;  %4583 = vrcp.f32 %v2611_v1 }
0x1860   :  { %v4578_v25 = vpop.eup %4577  ;;  %v4285_v43 = vpack.c.bf16 %v4465_v17, %v4464_v22 }
0x1861   :  { %v4468_v46 = vpop.permute.xlu0 %4467  ;;  %v5286_v41 = vmul.f32 %v4578_v25, %v4572_v9  ;;  %v4580_v38 = vpop.eup %4579  ;;  %v4301_v9 = vpack.c.bf16 %v2799_v34, %v2798_v35  ;;  %v2805_v35 = vld [vmem:[#allocation2 + $0x4a8] sm:$0xff]  ;;  %v2804_v34 = vld [vmem:[#allocation2 + $0x4a0] sm:$0xff] }
0x1862   :  { %v4470_v21 = vunpack.i.h.bf16 %v4468_v46  ;;  %v4469_v24 = vunpack.i.l.bf16 %v4468_v46  ;;  %4286 = vmatprep.subr.bf16.mxu0 %v4285_v43  ;;  %v5290_v57 = vmul.f32 %v4580_v38, %v4570_v48 }
0x1863   :  { %4288 = vmatpush3.bf16.msra.mxu0 %v4285_v43  ;;  %3994 = vmatprep.mubr.msk.f32.mxu0 %vm397_vm4, %v5286_v41 }
0x1864   :  { %v4289_v31 = vpack.c.bf16 %v4470_v21, %v4469_v24  ;;  %v4582_v47 = vpop.eup %4581 }
0x1865   :  { %v5292_v27 = vmul.f32 %v4582_v47, %v4574_v19  ;;  %v4305_v19 = vpack.c.bf16 %v2801_v2, %v2800_v54 }
0x1866   :  { %4290 = vmatprep.subr.bf16.mxu0 %v4289_v31 }
0x1867   :  { %4292 = vmatpush3.bf16.msra.mxu0 %v4289_v31 }
0x1868   :  { %v4584_v51 = vpop.eup %4583  ;;  %4294 = vmatprep.subr.bf16.mxu0 %v4293_v56 }
0x1869   :  { %v5298_v58 = vmul.f32 %v4584_v51, %v4576_v10 }
0x186a   :  { %3995 = vmatmul.mubr.msk.f32.vlgmr.msra.gmra.mrb[24].mxu0 %vm397_vm4, %v5290_v57 }
0x186b   :  { %3997 = vmatprep.mubr.msk.f32.mxu0 %vm397_vm4, %v5292_v27  ;;  %4296 = vmatpush3.bf16.msra.mxu0 %v4293_v56 }
0x186c   :  { %4298 = vmatprep.subr.bf16.mxu0 %v4297_v40 }
0x186e   :  { %3998 = vmatmul.mubr.msk.f32.gmra.mrb[26].mxu0 %vm397_vm4, %v5298_v58 }
0x186f   :  { %4300 = vmatpush3.bf16.msra.mxu0 %v4297_v40 }
0x1870   :  { %4302 = vmatprep.subr.bf16.mxu0 %v4301_v9 }
0x1873   :  { %4304 = vmatpush3.bf16.msra.mxu0 %v4301_v9 }
0x1874   :  { %4306 = vmatprep.subr.bf16.mxu0 %v4305_v19 }
0x1877   :  { %4308 = vmatpush3.bf16.msra.mxu0 %v4305_v19 }
0x193d   :  { %v3996_v28 = vpop.f32.mrb[24].mxu0 }
0x193e   :  { %v2727_v62 = vpop.f32.mrb[25].mxu0 }
0x193f   :  { %2750 = vrot.lane.b32.xlu1 %v2727_v62, %s4691_s21 }
0x1941   :  { %v3999_v42 = vpop.f32.mrb[26].mxu0 }
0x1942   :  { %v2737_v48 = vpop.f32.mrb[27].mxu0 }
0x1943   :  { %2752 = vrot.lane.b32.xlu1 %v3996_v28, %s4691_s21  ;;  %2754 = vrot.lane.b32.xlu0 %v2737_v48, %s4691_s21 }
0x1947   :  { %2756 = vrot.lane.b32.xlu1 %v3999_v42, %s4691_s21 }
0x19b1   :  { %v2751_v55 = vpop.permute.xlu1 %2750 }
0x19b2   :  { %v2762_v10 = vsel %vm661_vm6, %v5264_v15, %v2751_v55 }
0x19b3   :  { %v2770_v39 = vmul.f32 %v2762_v10, %v4796_v29 }
0x19b5   :  { %v2753_v12 = vpop.permute.xlu1 %2752  ;;  %2778 = vrot.lane.b32.xlu0 %v2770_v39, %s4685_s1  ;;  %v2755_v13 = vpop.permute.xlu0 %2754 }
0x19b6   :  { %v2763_v50 = vsel %vm661_vm6, %v5262_v23, %v2753_v12  ;;  %v2764_v44 = vsel %vm661_vm6, %v5268_v33, %v2755_v13  ;;  %v2766_v23 = vmul.f32 %v2762_v10, %v4812_v0 }
0x19b7   :  { %v2771_v1 = vmul.f32 %v2763_v50, %v4791_v20  ;;  %v2772_v17 = vmul.f32 %v2764_v44, %v4798_v49  ;;  %v2767_v46 = vmul.f32 %v2763_v50, %v4810_v6  ;;  %v2768_v21 = vmul.f32 %v2764_v44, %v4816_v7 }
0x19b9   :  { %2780 = vrot.lane.b32.xlu1 %v2771_v1, %s4685_s1  ;;  %v2757_v22 = vpop.permute.xlu1 %2756  ;;  %2782 = vrot.lane.b32.xlu0 %v2772_v17, %s4685_s1 }
0x19ba   :  { %v2765_v15 = vsel %vm661_vm6, %v5266_v16, %v2757_v22 }
0x19bb   :  { %v2773_v25 = vmul.f32 %v2765_v15, %v4800_v52  ;;  %v2769_v47 = vmul.f32 %v2765_v15, %v4814_v45 }
0x19bd   :  { %2784 = vrot.lane.b32.xlu1 %v2773_v25, %s4685_s1 }
0x1a27   :  { %v2779_v43 = vpop.permute.xlu0 %2778 }
0x1a28   :  { %v2790_v33 = vsel %vm397_vm4, %v2766_v23, %v2779_v43 }
0x1a29   :  { %4016 = vmatprep.mubr.msk.f32.mxu0 %vm547_vm5, %v2790_v33 }
0x1a2b   :  { %v2781_v24 = vpop.permute.xlu1 %2780  ;;  %v2783_v31 = vpop.permute.xlu0 %2782 }
0x1a2c   :  { %v2791_v38 = vsel %vm397_vm4, %v2767_v46, %v2781_v24  ;;  %v2792_v16 = vsel %vm397_vm4, %v2768_v21, %v2783_v31 }
0x1a2d   :  { %4017 = vmatmul.mubr.msk.f32.vlgmr.msra.gmra.mrb[28].mxu0 %vm547_vm5, %v2791_v38 }
0x1a2e   :  { %4019 = vmatprep.mubr.msk.f32.mxu0 %vm547_vm5, %v2792_v16 }
0x1a2f   :  { %v2785_v51 = vpop.permute.xlu1 %2784 }
0x1a30   :  { %v2793_v28 = vsel %vm397_vm4, %v2769_v47, %v2785_v51  ;;  %v3003_v47 = vld [vmem:[#allocation2 + $0x4f0] sm:$0xff]  ;;  %v3004_v51 = vld [vmem:[#allocation2 + $0x4f8] sm:$0xff] }
0x1a31   :  { %4020 = vmatmul.mubr.msk.f32.gmra.mrb[30].mxu0 %vm547_vm5, %v2793_v28  ;;  %v3005_v28 = vld [vmem:[#allocation2 + $0x500] sm:$0xff] }
0x1b00   :  { %v4018_v63 = vpop.f32.mrb[28].mxu0 }
0x1b01   :  { %v2890_v62 = vadd.f32 %v4018_v63, %v2803_v59  ;;  %v2884_v56 = vpop.f32.mrb[29].mxu0  ;;  %v4309_v59 = vpack.c.bf16 %v3004_v51, %v3003_v47 }
0x1b02   :  { %v2885_v37 = vadd.f32 %v2884_v56, %v2802_v60  ;;  %v3006_v60 = vld [vmem:[#allocation2 + $0x508] sm:$0xff]  ;;  %v3008_v56 = vld [vmem:[#allocation2 + $0x518] sm:$0xff] }
0x1b03   :  { %v2904_v40 = vadd.f32 %v2890_v62, %v5091_v61  ;;  %v4313_v63 = vpack.c.bf16 %v3006_v60, %v3005_v28  ;;  %v3007_v62 = vld [vmem:[#allocation2 + $0x510] sm:$0xff]  ;;  %4310 = vmatprep.subr.bf16.mxu1 %v4309_v59  ;;  %v2969_v28 = vld [vmem:[#allocation2 + $0x4e0] sm:$0xff] }
0x1b04   :  { %v2903_v42 = vadd.f32 %v2885_v37, %v5093_v53  ;;  %v4021_v48 = vpop.f32.mrb[30].mxu0  ;;  %4312 = vmatpush3.bf16.msra.mxu1 %v4309_v59  ;;  %v4317_v37 = vpack.c.bf16 %v3008_v56, %v3007_v62  ;;  %v2970_v56 = vld [vmem:[#allocation2 + $0x4e8] sm:$0xff] }
0x1b05   :  { %v2894_v9 = vpop.f32.mrb[31].mxu0  ;;  %v2910_v54 = vsel %vm397_vm4, %v2904_v40, 0.0  ;;  %v2900_v2 = vadd.f32 %v4021_v48, %v2805_v35  ;;  %4314 = vmatprep.subr.bf16.mxu1 %v4313_v63  ;;  %v3010_v35 = vld [vmem:[#allocation2 + $0x528] sm:$0xff] }
0x1b06   :  { %v2895_v19 = vadd.f32 %v2894_v9, %v2804_v34  ;;  %2911 = vadd.xlane.f32.xlu1 %v2910_v54  ;;  %v2907_v55 = vsel %vm397_vm4, %v2903_v42, 0.0 }
0x1b07   :  { %2908 = vadd.xlane.f32.xlu0 %v2907_v55  ;;  %v2906_v39 = vadd.f32 %v2900_v2, %v5103_v11 }
0x1b08   :  { %v5339_v10 = vadd.f32 %v2895_v19, %v5099_v8  ;;  %4316 = vmatpush3.bf16.msra.mxu1 %v4313_v63 }
0x1b09   :  { %v2916_v53 = vsel %vm397_vm4, %v2906_v39, 0.0  ;;  %4318 = vmatprep.subr.bf16.mxu1 %v4317_v37 }
0x1b0a   :  { %v2913_v61 = vsel %vm397_vm4, %v5339_v10, 0.0 }
0x1b0b   :  { %2914 = vadd.xlane.f32.xlu0 %v2913_v61 }
0x1b0c   :  { %4320 = vmatpush3.bf16.msra.mxu1 %v4317_v37 }
0x1b0f   :  { %2917 = vadd.xlane.f32.xlu0 %v2916_v53 }
0x1b93   :  { %v2912_v12 = vpop.xlane.xlu1 %2911 }
0x1b94   :  { %v2920_v13 = vmul.f32 0.03125, %v2912_v12  ;;  %v2909_v50 = vpop.xlane.xlu0 %2908 }
0x1b95   :  { %v2919_v44 = vmul.f32 0.03125, %v2909_v50 }
0x1b96   :  { %v2924_v1 = vsub.f32 %v2904_v40, %v2920_v13  ;;  %v3009_v40 = vld [vmem:[#allocation2 + $0x520] sm:$0xff] }
0x1b97   :  { %v2923_v17 = vsub.f32 %v2903_v42, %v2919_v44  ;;  %v4321_v34 = vpack.c.bf16 %v3010_v35, %v3009_v40  ;;  %v2960_v44 = vld [vmem:[#allocation2 + $0x4b8] sm:$0xff] }
0x1b98   :  { %v2915_v22 = vpop.xlane.xlu0 %2914  ;;  %v2928_v15 = vmul.f32 %v2924_v1, %v2924_v1 }
0x1b99   :  { %v2921_v25 = vmul.f32 0.03125, %v2915_v22  ;;  %v2927_v8 = vmul.f32 %v2923_v17, %v2923_v17  ;;  %4322 = vmatprep.subr.bf16.mxu1 %v4321_v34 }
0x1b9a   :  { %v2934_v23 = vsel %vm397_vm4, %v2928_v15, 0.0  ;;  %4324 = vmatpush3.bf16.msra.mxu1 %v4321_v34 }
0x1b9b   :  { %v2925_v11 = vsub.f32 %v5339_v10, %v2921_v25  ;;  %2935 = vadd.xlane.f32.xlu0 %v2934_v23  ;;  %v2931_v43 = vsel %vm397_vm4, %v2927_v8, 0.0  ;;  %v2959_v25 = vld [vmem:[#allocation2 + $0x4b0] sm:$0xff]  ;;  %v2968_v23 = vld [vmem:[#allocation2 + $0x4d8] sm:$0xff] }
0x1b9c   :  { %2932 = vadd.xlane.f32.xlu1 %v2931_v43  ;;  %v2918_v33 = vpop.xlane.xlu0 %2917 }
0x1b9d   :  { %v2922_v46 = vmul.f32 0.03125, %v2918_v33  ;;  %v2929_v21 = vmul.f32 %v2925_v11, %v2925_v11  ;;  %v2967_v33 = vld [vmem:[#allocation2 + $0x4d0] sm:$0xff] }
0x1b9f   :  { %v5348_v24 = vsub.f32 %v2906_v39, %v2922_v46  ;;  %v2937_v31 = vsel %vm397_vm4, %v2929_v21, 0.0 }
0x1ba0   :  { %2938 = vadd.xlane.f32.xlu1 %v2937_v31 }
0x1ba1   :  { %v2930_v38 = vmul.f32 %v5348_v24, %v5348_v24 }
0x1ba3   :  { %v2940_v16 = vsel %vm397_vm4, %v2930_v38, 0.0  ;;  %v2961_v38 = vld [vmem:[#allocation2 + $0x4c0] sm:$0xff] }
0x1ba4   :  { %2941 = vadd.xlane.f32.xlu0 %v2940_v16 }
0x1c28   :  { %v2936_v42 = vpop.xlane.xlu0 %2935 }
0x1c29   :  { %v2944_v48 = vmul.f32 0.03125, %v2936_v42  ;;  %v2933_v9 = vpop.xlane.xlu1 %2932 }
0x1c2a   :  { %v2943_v54 = vmul.f32 0.03125, %v2933_v9 }
0x1c2b   :  { %v2948_v2 = vadd.f32 1e-05, %v2944_v48 }
0x1c2c   :  { %v2947_v19 = vadd.f32 1e-05, %v2943_v54 }
0x1c2d   :  { %4585 = vrsqrt.f32 %v2948_v2  ;;  %v2939_v55 = vpop.xlane.xlu1 %2938 }
0x1c2e   :  { %4587 = vrsqrt.f32 %v2947_v19  ;;  %v2945_v39 = vmul.f32 0.03125, %v2939_v55 }
0x1c30   :  { %v2949_v61 = vadd.f32 1e-05, %v2945_v39 }
0x1c31   :  { %v2942_v53 = vpop.xlane.xlu0 %2941 }
0x1c32   :  { %4589 = vrsqrt.f32 %v2949_v61  ;;  %v2946_v12 = vmul.f32 0.03125, %v2942_v53 }
0x1c34   :  { %v2950_v13 = vadd.f32 1e-05, %v2946_v12  ;;  %v3176_v12 = vld [vmem:[#allocation2 + $0x550] sm:$0xff] }
0x1c36   :  { %4591 = vrsqrt.f32 %v2950_v13  ;;  %v3177_v13 = vld [vmem:[#allocation2 + $0x558] sm:$0xff] }
0x1c37   :  { %v4586_v50 = vpop.eup %4585 }
0x1c38   :  { %v4588_v22 = vpop.eup %4587  ;;  %v2956_v15 = vmul.f32 %v4586_v50, %v2924_v1  ;;  %v2962_v1 = vld [vmem:[#allocation2 + $0x4c8] sm:$0xff]  ;;  %v3178_v50 = vld [vmem:[#allocation2 + $0x560] sm:$0xff] }
0x1c39   :  { %v2955_v8 = vmul.f32 %v4588_v22, %v2923_v17  ;;  %v3179_v22 = vld [vmem:[#allocation2 + $0x568] sm:$0xff] }
0x1c3a   :  { %v2964_v43 = vmul.f32 %v2960_v44, %v2956_v15  ;;  %v4325_v44 = vpack.c.bf16 %v3177_v13, %v3176_v12  ;;  %v4329_v15 = vpack.c.bf16 %v3179_v22, %v3178_v50 }
0x1c3b   :  { %v2963_v46 = vmul.f32 %v2959_v25, %v2955_v8  ;;  %v3180_v25 = vld [vmem:[#allocation2 + $0x570] sm:$0xff]  ;;  %v3181_v8 = vld [vmem:[#allocation2 + $0x578] sm:$0xff] }
0x1c3c   :  { %v4590_v21 = vpop.eup %4589  ;;  %v2972_v31 = vadd.f32 %v2968_v23, %v2964_v43  ;;  %4326 = vmatprep.subr.bf16.mxu0 %v4325_v44  ;;  %v4333_v23 = vpack.c.bf16 %v3181_v8, %v3180_v25  ;;  %v3182_v43 = vld [vmem:[#allocation2 + $0x580] sm:$0xff] }
0x1c3d   :  { %v2957_v16 = vmul.f32 %v4590_v21, %v2925_v11  ;;  %v2971_v47 = vadd.f32 %v2967_v33, %v2963_v46  ;;  %4328 = vmatpush3.bf16.msra.mxu0 %v4325_v44  ;;  %v3183_v33 = vld [vmem:[#allocation2 + $0x588] sm:$0xff]  ;;  %v3184_v21 = vld [vmem:[#allocation2 + $0x590] sm:$0xff] }
0x1c3e   :  { %v2980_v51 = vmul.f32 %v2972_v31, %v4791_v20  ;;  %v2976_v48 = vmul.f32 %v2972_v31, %v4810_v6  ;;  %4330 = vmatprep.subr.bf16.mxu0 %v4329_v15  ;;  %v4337_v46 = vpack.c.bf16 %v3183_v33, %v3182_v43  ;;  %v3185_v31 = vld [vmem:[#allocation2 + $0x598] sm:$0xff]  ;;  %v3190_v33 = vld [vmem:[#allocation2 + $0x5c0] sm:$0xff] }
0x1c3f   :  { %v2979_v59 = vmul.f32 %v2971_v47, %v4796_v29  ;;  %v2965_v60 = vmul.f32 %v2961_v38, %v2957_v16  ;;  %v2975_v42 = vmul.f32 %v2971_v47, %v4812_v0  ;;  %v3186_v38 = vld [vmem:[#allocation2 + $0x5a0] sm:$0xff]  ;;  %v3187_v16 = vld [vmem:[#allocation2 + $0x5a8] sm:$0xff] }
0x1c40   :  { %v4592_v63 = vpop.eup %4591  ;;  %2989 = vrot.lane.b32.xlu0 %v2980_v51, %s4685_s1  ;;  %v4345_v47 = vpack.c.bf16 %v3187_v16, %v3186_v38  ;;  %v3188_v51 = vld [vmem:[#allocation2 + $0x5b0] sm:$0xff] }
0x1c41   :  { %v2958_v17 = vmul.f32 %v4592_v63, %v5348_v24  ;;  %2987 = vrot.lane.b32.xlu1 %v2979_v59, %s4685_s1  ;;  %v2973_v62 = vadd.f32 %v2969_v28, %v2965_v60  ;;  %4332 = vmatpush3.bf16.msra.mxu0 %v4329_v15  ;;  %v3189_v28 = vld [vmem:[#allocation2 + $0x5b8] sm:$0xff]  ;;  %v3011_v63 = vld [vmem:[#allocation2 + $0x530] sm:$0xff] }
0x1c42   :  { %4334 = vmatprep.subr.bf16.mxu0 %v4333_v23  ;;  %v4349_v59 = vpack.c.bf16 %v3189_v28, %v3188_v51  ;;  %v3012_v60 = vld [vmem:[#allocation2 + $0x538] sm:$0xff] }
0x1c43   :  { %v2981_v37 = vmul.f32 %v2973_v62, %v4798_v49  ;;  %v2966_v11 = vmul.f32 %v2962_v1, %v2958_v17  ;;  %v2977_v2 = vmul.f32 %v2973_v62, %v4816_v7 }
0x1c45   :  { %2991 = vrot.lane.b32.xlu1 %v2981_v37, %s4685_s1  ;;  %v2974_v40 = vadd.f32 %v2970_v56, %v2966_v11  ;;  %4336 = vmatpush3.bf16.msra.mxu0 %v4333_v23 }
0x1c46   :  { %4338 = vmatprep.subr.bf16.mxu0 %v4337_v46 }
0x1c47   :  { %v2982_v35 = vmul.f32 %v2974_v40, %v4800_v52  ;;  %v2978_v39 = vmul.f32 %v2974_v40, %v4814_v45 }
0x1c49   :  { %2993 = vrot.lane.b32.xlu1 %v2982_v35, %s4685_s1  ;;  %4340 = vmatpush3.bf16.msra.mxu0 %v4337_v46  ;;  %v3014_v35 = vld [vmem:[#allocation2 + $0x548] sm:$0xff] }
0x1c4a   :  { %v3191_v46 = vld [vmem:[#allocation2 + $0x5c8] sm:$0xff] }
0x1cb2   :  { %v2990_v34 = vpop.permute.xlu0 %2989 }
0x1cb3   :  { %v2988_v24 = vpop.permute.xlu1 %2987  ;;  %v3000_v54 = vsel %vm397_vm4, %v2976_v48, %v2990_v34 }
0x1cb4   :  { %v2999_v9 = vsel %vm397_vm4, %v2975_v42, %v2988_v24  ;;  %v3013_v42 = vld [vmem:[#allocation2 + $0x540] sm:$0xff] }
0x1cb5   :  { %4038 = vmatprep.mubr.msk.f32.mxu1 %vm547_vm5, %v2999_v9 }
0x1cb6   :  { %4039 = vmatmul.mubr.msk.f32.vlgmr.msra.gmra.mrb[36].mxu1 %vm547_vm5, %v3000_v54 }
0x1cb7   :  { %v2992_v19 = vpop.permute.xlu1 %2991 }
0x1cb8   :  { %v3001_v55 = vsel %vm397_vm4, %v2977_v2, %v2992_v19 }
0x1cb9   :  { %4041 = vmatprep.mubr.msk.f32.mxu1 %vm547_vm5, %v3001_v55 }
0x1cbb   :  { %v2994_v61 = vpop.permute.xlu1 %2993 }
0x1cbc   :  { %v3002_v53 = vsel %vm397_vm4, %v2978_v39, %v2994_v61 }
0x1cbd   :  { %4042 = vmatmul.mubr.msk.f32.gmra.mrb[38].mxu1 %vm547_vm5, %v3002_v53 }
0x1cbe   :  { %4098 = vmatprep.mubr.msk.f32.mxu1 %vm4680_vm0, %v4679_v3  ;;  %v4341_v3 = vpack.c.bf16 %v3185_v31, %v3184_v21  ;;  %v4353_v21 = vpack.c.bf16 %v3191_v46, %v3190_v33 }
0x1cc0   :  { %4342 = vmatprep.subr.bf16.mxu0 %v4341_v3 }
0x1cc1   :  { %4344 = vmatpush3.bf16.msra.mxu0 %v4341_v3 }
0x1cc2   :  { %4346 = vmatprep.subr.bf16.mxu0 %v4345_v47 }
0x1cc5   :  { %4348 = vmatpush3.bf16.msra.mxu0 %v4345_v47 }
0x1cc6   :  { %4350 = vmatprep.subr.bf16.mxu0 %v4349_v59 }
0x1cc9   :  { %4352 = vmatpush3.bf16.msra.mxu0 %v4349_v59 }
0x1cca   :  { %4354 = vmatprep.subr.bf16.mxu0 %v4353_v21 }
0x1ccd   :  { %4356 = vmatpush3.bf16.msra.mxu0 %v4353_v21 }
0x1d89   :  { %v4040_v1 = vpop.f32.mrb[36].mxu1 }
0x1d8a   :  { %v3099_v17 = vadd.f32 %v4040_v1, %v3012_v60  ;;  %v3093_v62 = vpop.f32.mrb[37].mxu1 }
0x1d8b   :  { %v3094_v56 = vadd.f32 %v3093_v62, %v3011_v63 }
0x1d8c   :  { %v3113_v37 = vmul.f32 %v3099_v17, %v3099_v17 }
0x1d8d   :  { %v3112_v11 = vmul.f32 %v3094_v56, %v3094_v56 }
0x1d8e   :  { %v3117_v40 = vmul.f32 %v3113_v37, %v3099_v17 }
0x1d8f   :  { %v3116_v34 = vmul.f32 %v3112_v11, %v3094_v56 }
0x1d90   :  { %v3121_v48 = vmul.f32 0.044715, %v3117_v40  ;;  %v4043_v24 = vpop.f32.mrb[38].mxu1 }
0x1d91   :  { %v3120_v9 = vmul.f32 0.044715, %v3116_v34  ;;  %v3109_v54 = vadd.f32 %v4043_v24, %v3014_v35  ;;  %v3103_v2 = vpop.f32.mrb[39].mxu1 }
0x1d92   :  { %v3125_v19 = vadd.f32 %v3121_v48, %v3099_v17  ;;  %v3104_v55 = vadd.f32 %v3103_v2, %v3013_v42 }
0x1d93   :  { %v3124_v39 = vadd.f32 %v3120_v9, %v3094_v56  ;;  %v3115_v61 = vmul.f32 %v3109_v54, %v3109_v54 }
0x1d94   :  { %v3129_v53 = vmul.f32 0.7978846, %v3125_v19  ;;  %v3114_v12 = vmul.f32 %v3104_v55, %v3104_v55 }
0x1d95   :  { %v3128_v13 = vmul.f32 0.7978846, %v3124_v39  ;;  %v3119_v50 = vmul.f32 %v3115_v61, %v3109_v54 }
0x1d96   :  { %4593 = vtanh.f32 %v3129_v53  ;;  %v3118_v44 = vmul.f32 %v3114_v12, %v3104_v55 }
0x1d97   :  { %4595 = vtanh.f32 %v3128_v13  ;;  %v3123_v22 = vmul.f32 0.044715, %v3119_v50  ;;  %v3192_v50 = vld [vmem:[#allocation2 + $0x5e0] sm:$0xff] }
0x1d98   :  { %v3122_v15 = vmul.f32 0.044715, %v3118_v44 }
0x1d99   :  { %v3127_v25 = vadd.f32 %v3123_v22, %v3109_v54 }
0x1d9a   :  { %v3126_v8 = vadd.f32 %v3122_v15, %v3104_v55 }
0x1d9b   :  { %v3131_v23 = vmul.f32 0.7978846, %v3127_v25 }
0x1d9c   :  { %v3130_v43 = vmul.f32 0.7978846, %v3126_v8 }
0x1d9d   :  { %4597 = vtanh.f32 %v3131_v23 }
0x1d9e   :  { %4599 = vtanh.f32 %v3130_v43 }
0x1da0   :  { %v4594_v31 = vpop.eup %4593 }
0x1da1   :  { %v4596_v3 = vpop.eup %4595  ;;  %v3137_v38 = vadd.f32 1.0, %v4594_v31  ;;  %v3310_v31 = vld [vmem:[#allocation2 + $0x600] sm:$0xff] }
0x1da2   :  { %v3136_v16 = vadd.f32 1.0, %v4596_v3  ;;  %v3311_v3 = vld [vmem:[#allocation2 + $0x608] sm:$0xff] }
0x1da3   :  { %v3141_v47 = vmul.f32 0.5, %v3137_v38  ;;  %v4358_v38 = vpack.c.bf16 %v3311_v3, %v3310_v31 }
0x1da4   :  { %v3140_v51 = vmul.f32 0.5, %v3136_v16  ;;  %v4692_v16 = vmov 0.0|0.0  }
0x1da5   :  { %v3145_v28 = vmul.f32 %v3141_v47, %v3099_v17  ;;  %4357 = vmatprep.subr.bf16.mxu1 %v4692_v16  ;;  %v3312_v47 = vld [vmem:[#allocation2 + $0x610] sm:$0xff] }
0x1da6   :  { %v3144_v59 = vmul.f32 %v3140_v51, %v3094_v56  ;;  %4359 = vmatpush3.bf16.msra.mxu1 %v4358_v38  ;;  %v3313_v51 = vld [vmem:[#allocation2 + $0x618] sm:$0xff] }
0x1da7   :  { %v4598_v60 = vpop.eup %4597  ;;  %v3153_v63 = vmul.f32 %v3145_v28, %v4791_v20  ;;  %v3149_v19 = vmul.f32 %v3145_v28, %v4810_v6  ;;  %4360 = vmatprep.subr.bf16.mxu1 %v4692_v16  ;;  %v4361_v28 = vpack.c.bf16 %v3313_v51, %v3312_v47 }
0x1da8   :  { %v4600_v1 = vpop.eup %4599  ;;  %v3139_v62 = vadd.f32 1.0, %v4598_v60  ;;  %v3152_v37 = vmul.f32 %v3144_v59, %v4796_v29  ;;  %v3148_v29 = vmul.f32 %v3144_v59, %v4812_v0  ;;  %v3314_v59 = vld [vmem:[#allocation2 + $0x620] sm:$0xff]  ;;  %v3315_v60 = vld [vmem:[#allocation2 + $0x628] sm:$0xff] }
0x1da9   :  { %v3138_v11 = vadd.f32 1.0, %v4600_v1  ;;  %v3316_v1 = vld [vmem:[#allocation2 + $0x630] sm:$0xff] }
0x1daa   :  { %v3143_v40 = vmul.f32 0.5, %v3139_v62  ;;  %v4471_v35 = vpack.i.bf16 %v3153_v63, %v3152_v37  ;;  %4362 = vmatpush3.bf16.msra.mxu1 %v4361_v28  ;;  %v4364_v63 = vpack.c.bf16 %v3315_v60, %v3314_v59  ;;  %v3317_v62 = vld [vmem:[#allocation2 + $0x638] sm:$0xff] }
0x1dab   :  { %v3142_v34 = vmul.f32 0.5, %v3138_v11  ;;  %4363 = vmatprep.subr.bf16.mxu1 %v4692_v16  ;;  %v4367_v37 = vpack.c.bf16 %v3317_v62, %v3316_v1 }
0x1dac   :  { %v3147_v42 = vmul.f32 %v3143_v40, %v3109_v54  ;;  %4472 = vrot.lane.b32.xlu0 %v4471_v35, %s4687_s9 }
0x1dad   :  { %v3146_v48 = vmul.f32 %v3142_v34, %v3104_v55 }
0x1dae   :  { %v3155_v24 = vmul.f32 %v3147_v42, %v4800_v52  ;;  %v3151_v53 = vmul.f32 %v3147_v42, %v4814_v45  ;;  %4365 = vmatpush3.bf16.msra.mxu1 %v4364_v63  ;;  %v3512_v42 = vld [vmem:[#allocation2 + $0x5f8] ss:$0 sm:$0xff] }
0x1daf   :  { %v3154_v17 = vmul.f32 %v3146_v48, %v4798_v49  ;;  %v3150_v49 = vmul.f32 %v3146_v48, %v4816_v7  ;;  %4366 = vmatprep.subr.bf16.mxu1 %v4692_v16 }
0x1db1   :  { %v4476_v56 = vpack.i.bf16 %v3155_v24, %v3154_v17 }
0x1db2   :  { %4368 = vmatpush3.bf16.msra.mxu1 %v4367_v37 }
0x1db3   :  { %4477 = vrot.lane.b32.xlu1 %v4476_v56, %s4687_s9 }
0x1e1e   :  { %v4473_v20 = vpop.permute.xlu0 %4472 }
0x1e1f   :  { %v4475_v9 = vunpack.i.h.bf16 %v4473_v20  ;;  %v4474_v2 = vunpack.i.l.bf16 %v4473_v20 }
0x1e21   :  { %v3172_v39 = vsel %vm547_vm5, %v3148_v29, %v4474_v2  ;;  %v3173_v54 = vsel %vm547_vm5, %v3149_v19, %v4475_v9 }
0x1e22   :  { %4076 = vmatprep.mubr.f32.mxu0 %v3172_v39 }
0x1e23   :  { %4077 = vmatmul.mubr.f32.vlgmr.msra.gmra.mrb[32].mxu0 %v3173_v54 }
0x1e25   :  { %v4478_v55 = vpop.permute.xlu1 %4477 }
0x1e26   :  { %v4480_v52 = vunpack.i.h.bf16 %v4478_v55  ;;  %v4479_v61 = vunpack.i.l.bf16 %v4478_v55 }
0x1e28   :  { %v3174_v12 = vsel %vm547_vm5, %v3150_v49, %v4479_v61  ;;  %v3175_v13 = vsel %vm547_vm5, %v3151_v53, %v4480_v52 }
0x1e29   :  { %4079 = vmatprep.mubr.f32.mxu0 %v3174_v12 }
0x1e2a   :  { %4080 = vmatmul.mubr.f32.gmra.mrb[34].mxu0 %v3175_v13 }
0x1ef6   :  { %v4078_v6 = vpop.f32.mrb[32].mxu0 }
0x1ef7   :  { %v3259_v0 = vpop.f32.mrb[33].mxu0 }
0x1efd   :  { %v4081_v44 = vpop.f32.mrb[34].mxu0 }
0x1efe   :  { %v3267_v22 = vpop.f32.mrb[35].mxu0 }
0x1eff   :  { %v3268_v15 = vadd.f32 %v3267_v22, %v3192_v50 }
0x1f01   :  { %v3275_v25 = vadd.f32 %v3268_v15, %v5339_v10 }
0x1f03   :  { %v3277_v8 = vrot.slane %v3275_v25, 2 }
0x1f05   :  { %3278 = vrot.lane.b32.xlu0 %v3277_v8, %s4685_s1 }
0x1f77   :  { %v3279_v7 = vpop.permute.xlu0 %3278 }
0x1f78   :  { %v3281_v45 = vsel %vm397_vm4, %v3275_v25, %v3279_v7 }
0x1f79   :  { %v3284_v23 = vsel %vm3282_vm8, %v3281_v45, 0.0  ;;  %3283 = vst.msk [vmem:[#allocation6] sm:$0x3] %vm3282_vm8, %v3281_v45 }
0x1f7a   :  { %3285 = vadd.xlane.f32.xlu1 %v3284_v23 }
0x1f8b   :  { %1091 = vrot.lane.b32.xlu1 %v4963_v30, %s4685_s1 }
0x1f8f   :  { %1093 = vrot.lane.b32.xlu1 %v4965_v32, %s4685_s1 }
0x1f93   :  { %2337 = vrot.lane.b32.xlu1 %v5236_v4, %s4687_s9 }
0x1f97   :  { %2341 = vrot.lane.b32.xlu1 %v5250_v26, %s4687_s9 }
0x1f9b   :  { %2624 = vrot.lane.b32.xlu1 %v5286_v41, %s4686_s8 }
0x1f9f   :  { %2628 = vrot.lane.b32.xlu1 %v5292_v27, %s4686_s8 }
0x2007   :  { %v3286_v10 = vpop.xlane.xlu1 %3285 }
0x2008   :  { %v3288_v43 = vmul.f32 0.015625, %v3286_v10 }
0x200a   :  { %v3289_v33 = vsub.f32 %v3281_v45, %v3288_v43 }
0x200b   :  { %v1092_v30 = vpop.permute.xlu1 %1091 }
0x200c   :  { %1103 = vst.msk [vmem:[%s5498_s4 + $0x8] sm:$0xff] %vm1101_vm9, %v1092_v30  ;;  %v3290_v32 = vmul.f32 %v3289_v33, %v3289_v33 }
0x200e   :  { %v3291_v4 = vsel %vm3282_vm8, %v3290_v32, 0.0 }
0x200f   :  { %3292 = vadd.xlane.f32.xlu0 %v3291_v4  ;;  %v1094_v26 = vpop.permute.xlu1 %1093 }
0x2010   :  { %1104 = vst.msk [vmem:[%s5498_s4 + $0x10] sm:$0xff] %vm1101_vm9, %v1094_v26 }
0x2013   :  { %v2338_v41 = vpop.permute.xlu1 %2337 }
0x2017   :  { %v2342_v27 = vpop.permute.xlu1 %2341 }
0x2018   :  { %2352 = vst.msk [vmem:[%s5498_s4 + $0x10] sm:$0xff] %vm2349_vm10, %v2342_v27 }
0x201b   :  { %v2625_v46 = vpop.permute.xlu1 %2624 }
0x201f   :  { %v2629_v21 = vpop.permute.xlu1 %2628 }
0x2020   :  { %2639 = vst.msk [vmem:[%s5498_s4 + $0x10] sm:$0xff] %vm2636_vm11, %v2629_v21 }
0x2025   :  { %1089 = vrot.lane.b32.xlu0 %v4959_v18, %s4685_s1 }
0x2029   :  { %1095 = vrot.lane.b32.xlu0 %v4971_v36, %s4685_s1 }
0x202d   :  { %2339 = vrot.lane.b32.xlu0 %v5238_v5, %s4687_s9 }
0x2031   :  { %2343 = vrot.lane.b32.xlu0 %v5252_v14, %s4687_s9 }
0x2035   :  { %2626 = vrot.lane.b32.xlu0 %v5290_v57, %s4686_s8 }
0x2039   :  { %2630 = vrot.lane.b32.xlu0 %v5298_v58, %s4686_s8  ;;  %v3511_v58 = vld [vmem:[#allocation2 + $0x5f0] ss:$0 sm:$0xff] }
0x209c   :  { %v3293_v18 = vpop.xlane.xlu0 %3292 }
0x209d   :  { %v3294_v36 = vmul.f32 0.015625, %v3293_v18 }
0x209f   :  { %v3295_v11 = vadd.f32 1e-05, %v3294_v36 }
0x20a0   :  { %v1090_v40 = vpop.permute.xlu0 %1089 }
0x20a1   :  { %4601 = vrsqrt.f32 %v3295_v11  ;;  %1102 = vst.msk [vmem:[%s5498_s4] sm:$0xff] %vm1101_vm9, %v1090_v40 }
0x20a2   :  { %2350 = vst.msk [vmem:[%s5498_s4] sm:$0xff] %vm2349_vm10, %v2338_v41 }
0x20a3   :  { %2637 = vst.msk [vmem:[%s5498_s4] sm:$0xff] %vm2636_vm11, %v2625_v46 }
0x20a4   :  { %v1096_v5 = vpop.permute.xlu0 %1095 }
0x20a5   :  { %1105 = vst.msk [vmem:[%s5498_s4 + $0x18] sm:$0xff] %vm1101_vm9, %v1096_v5 }
0x20a8   :  { %v2340_v14 = vpop.permute.xlu0 %2339 }
0x20a9   :  { %2351 = vst.msk [vmem:[%s5498_s4 + $0x8] sm:$0xff] %vm2349_vm10, %v2340_v14 }
0x20ab   :  { %v4602_v57 = vpop.eup %4601 }
0x20ac   :  { %v3297_v35 = vmul.f32 %v4602_v57, %v3289_v33  ;;  %v2344_v34 = vpop.permute.xlu0 %2343 }
0x20ad   :  { %2353 = vst.msk [vmem:[%s5498_s4 + $0x18] sm:$0xff] %vm2349_vm10, %v2344_v34 }
0x20ae   :  { %v3303_v48 = vmul.f32 %v3511_v58, %v3297_v35 }
0x20b0   :  { %v3309_v24 = vadd.f32 %v3512_v42, %v3303_v48  ;;  %v2627_v17 = vpop.permute.xlu0 %2626 }
0x20b1   :  { %2638 = vst.msk [vmem:[%s5498_s4 + $0x8] sm:$0xff] %vm2636_vm11, %v2627_v17 }
0x20b2   :  { %4099 = vmatmul.mubr.msk.f32.vlgmr.msra.gmra.mrb[40].mxu1 %vm547_vm5, %v3309_v24 }
0x20b4   :  { %v2631_v56 = vpop.permute.xlu0 %2630 }
0x20b5   :  { %2640 = vst.msk [vmem:[%s5498_s4 + $0x18] sm:$0xff] %vm2636_vm11, %v2631_v56 }
0x20b6   :  { %4636 = shalt.err (!%p4633_p12)
}
0x20b7   :  { %s4637_s23 = scalar_lea.hbm %s5497_s3, 32 }
0x20b8   :  { %p4638_p13 = scmp.ne.s32.totalorder %s5497_s3, %s4637_s23  ;;  %p4641_p0 = scmp.lt.u32.totalorder %s4637_s23, %s5497_s3 }
0x20ba   :  { %p4643_p1 = pnand %p4641_p0, %p4638_p13 }
0x20bc   :  { %4646 = shalt.err (!%p4643_p1)
}
0x20bd   :  { %3417 = dma.vmem_to_hbm [thread:$0]  %s3415_s19, 32, %s5497_s3, [#allocation7]   ;;  %v3513_v20 = vld [vmem:[#allocation2 + $0x640] ss:$0 sm:$0xff]  ;;  %vm3396_vm12 = vcmask 17408  }
0x20be   :  { %s4694_s0 = smov [#allocation5]  }
0x20bf   :  { %s3404_s29 = sshll.u32 %s4694_s0, 4  ;;  %s3405_s29 = int_to_ptr.vmem [resolvable:$true] %s3404_s29 }
0x20c0   :  { %s4647_s30 = scalar_lea.vmem %s3405_s29, 32  ;;  %p4652_p3 = scmp.lt.s32.totalorder %s3405_s29, %s3405_s29 }
0x20c1   :  { %p4648_p2 = scmp.ne.s32.totalorder %s3405_s29, %s4647_s30  ;;  %p4653_p4 = scmp.lt.s32.totalorder %s4647_s30, %s4647_s30 }
0x20c3   :  { %p4654_p5 = por %p4653_p4, %p4652_p3 }
0x20c5   :  { %p4655_p6 = pnand %p4654_p5, %p4648_p2 }
0x2185   :  { %v3392_v9 = vpop.f32.mrb[40].mxu1 }
0x2186   :  { %v3393_v2 = vadd.f32 %v3513_v20, %v3392_v9  ;;  %v4100_v29 = vpop.f32.mrb[41].mxu1 }
0x2188   :  { %3397 = vst.msk [vmem:[#allocation5] sm:$0x3] %vm3396_vm12, %v3393_v2 }
0x2189   :  { %4658 = shalt.err (!%p4655_p6)
}
0x218a   :  { %s4659_s3 = scalar_lea.hbm %s5496_s2, 32 }
0x218b   :  { %p4660_p7 = scmp.ne.s32.totalorder %s5496_s2, %s4659_s3  ;;  %p4663_p8 = scmp.lt.u32.totalorder %s4659_s3, %s5496_s2 }
0x218d   :  { %p4665_p9 = pnand %p4663_p8, %p4660_p7 }
0x218f   :  { %4668 = shalt.err (!%p4665_p9)
}
0x2190   :  { %3407 = dma.vmem_to_hbm [thread:$0]  %s3405_s29, 32, %s5496_s2, [#allocation4]  }
0x2191   :  { %4671 = dma.done.wait [#allocation4], 32  }
0x2192   :  { %4672 = vsyncadd [#allocation4], 4294967264 }
0x2193   :  { %4673 = dma.done.wait [#allocation7], 32  }
0x2194   :  { %4674 = vsyncadd [#allocation7], 4294967264 }
0x2195   :  { %3428 = vsyncpa [#allocation3], 1 }
0x2196   :  { %3429 = vsyncpa [#allocation4], 1 }
0x2197   :  { %3430 = vsyncpa [#allocation7], 1 }

</bundles_post_ra>
